<compile_context>
chip_gen: v7x
topology: tpu7x:2x2x1
jax: 0.10.0
libtpu: 0.0.40
codegen_flags: <defaults>
</compile_context>

<pallas_src>
import functools

import jax
import jax.numpy as jnp
from jax.experimental import pallas as pl
from jax.experimental.pallas import tpu as pltpu


def _round_up(x, m):
    return (x + m - 1) // m * m


# ----------------------------------------------------------------------------
# Parameter packing: PyTorch (4H, in) gate-stacked weights -> transposed,
# per-gate zero-padded (in_pad, 4*H_pad) so every gate block is lane-aligned.
# ----------------------------------------------------------------------------
def _pack_gate_matrix(w, H, H_pad, in_dim_pad, dtype):
    """w: (4H, in_dim) stacked [i, f, g, o] -> (in_dim_pad, 4*H_pad), zero padded."""
    _, in_dim = w.shape
    w4 = w.reshape(4, H, in_dim).astype(jnp.float32)
    out = jnp.zeros((4, H_pad, in_dim_pad), jnp.float32)
    out = out.at[:, :H, :in_dim].set(w4)
    out = jnp.transpose(out, (2, 0, 1)).reshape(in_dim_pad, 4 * H_pad)
    return out.astype(dtype)


def _pack_gate_bias(b, H, H_pad):
    """b: (4H,) -> (1, 4*H_pad) f32, per-gate zero padded."""
    b4 = b.reshape(4, H).astype(jnp.float32)
    out = jnp.zeros((4, H_pad), jnp.float32).at[:, :H].set(b4)
    return out.reshape(1, 4 * H_pad)


def _pack_decoder(w_dec, b_dec, H, H_pad, f_out_pad, dtype):
    """w_dec: (f_out, H), b_dec: (f_out,) -> (H_pad, f_out_pad), (1, f_out_pad)."""
    f_out = w_dec.shape[0]
    w = jnp.zeros((H_pad, f_out_pad), jnp.float32)
    w = w.at[:H, :f_out].set(jnp.transpose(w_dec).astype(jnp.float32))
    b = jnp.zeros((1, f_out_pad), jnp.float32).at[0, :f_out].set(
        b_dec.astype(jnp.float32))
    return w.astype(dtype), b


def _sigmoid(x):
    # Single-EUP form of the logistic: sigmoid(x) = 0.5 * tanh(0.5*x) + 0.5.
    return 0.5 * jnp.tanh(0.5 * x) + 0.5


# ----------------------------------------------------------------------------
# Fused kernel: per time-chunk input projection + multi-layer LSTM recurrence
# (h/c carried in VMEM scratch across grid steps) + decoder.
# ----------------------------------------------------------------------------
def _fused_lstm_kernel(x_ref, wih0_ref, wihr_ref, whh_ref, b_ref,
                       wdec_ref, bdec_ref, out_ref,
                       h_scr, c_scr, gates_scr, hseq_scr,
                       *, tc, num_layers, compute_dtype):
    @pl.when(pl.program_id(0) == 0)
    def _init():
        h_scr[...] = jnp.zeros_like(h_scr)
        c_scr[...] = jnp.zeros_like(c_scr)

    _, b_pad, h_pad = h_scr.shape

    for l in range(num_layers):               # static unroll over layers
        # ---- hoisted per-chunk input-side projection (+ bias) for layer l ----
        if l == 0:
            x_in = x_ref[...]                                  # (chunk_rows, F_in) bf16
            w_in = wih0_ref[...]                               # (F_in, 4*H_pad)  bf16
        else:
            x_in = hseq_scr[...].astype(compute_dtype)          # prev layer hidden
            w_in = wihr_ref[l - 1]                             # (H_pad, 4*H_pad) bf16
        gates_scr[...] = (
            jnp.dot(x_in, w_in, preferred_element_type=jnp.float32) + b_ref[l])

        # ---- per-step recurrence: only h @ W_hh remains on the serial path ----
        def step(s, carry, l=l):
            row = pl.multiple_of(s * b_pad, b_pad)
            h_prev = h_scr[l]                                  # (b_pad, h_pad) f32
            c_prev = c_scr[l]
            gates = gates_scr[pl.ds(row, b_pad), :] + jnp.dot(
                h_prev.astype(compute_dtype), whh_ref[l],
                preferred_element_type=jnp.float32)
            i_g = _sigmoid(gates[:, 0 * h_pad:1 * h_pad])
            f_g = _sigmoid(gates[:, 1 * h_pad:2 * h_pad])
            g_g = jnp.tanh(gates[:, 2 * h_pad:3 * h_pad])
            o_g = _sigmoid(gates[:, 3 * h_pad:4 * h_pad])
            c_new = f_g * c_prev + i_g * g_g
            h_new = o_g * jnp.tanh(c_new)
            h_scr[l] = h_new
            c_scr[l] = c_new
            hseq_scr[pl.ds(row, b_pad), :] = h_new
            return carry

        jax.lax.fori_loop(0, tc, step, 0, unroll=min(tc, 8))
        # TODO(synk): inter-layer dropout (training mode) not implemented (eval = identity).

    # ---- fused decoder over the whole chunk: lane-dense (mult-of-128) write ----
    out_ref[...] = (
        jnp.dot(hseq_scr[...].astype(compute_dtype), wdec_ref[...],
                preferred_element_type=jnp.float32)
        + bdec_ref[...]).astype(out_ref.dtype)


def _fused_forward(x_flat, w_ih0, wih_rest, whh_stack, b_stack, w_dec, b_dec,
                   *, num_layers, tc, b_pad, h_pad, f_out_pad, compute_dtype):
    n_rows, f_in = x_flat.shape
    chunk_rows = tc * b_pad
    n_chunks = n_rows // chunk_rows
    G4 = 4 * h_pad
    L = num_layers
    Lr = wih_rest.shape[0]

    kernel = functools.partial(_fused_lstm_kernel, tc=tc, num_layers=L,
                               compute_dtype=compute_dtype)
    return pl.pallas_call(
        kernel,
        out_shape=jax.ShapeDtypeStruct((n_rows, f_out_pad), jnp.float32),
        grid_spec=pltpu.PrefetchScalarGridSpec(
            num_scalar_prefetch=0,
            grid=(n_chunks,),
            in_specs=[
                pl.BlockSpec((chunk_rows, f_in), lambda c: (c, 0)),       # x chunk
                pl.BlockSpec((f_in, G4), lambda c: (0, 0)),               # layer-0 W_ih^T
                pl.BlockSpec((Lr, h_pad, G4), lambda c: (0, 0, 0)),       # layers>=1 W_ih^T
                pl.BlockSpec((L, h_pad, G4), lambda c: (0, 0, 0)),        # W_hh^T (all layers)
                pl.BlockSpec((L, 1, G4), lambda c: (0, 0, 0)),            # biases (b_ih+b_hh)
                pl.BlockSpec((h_pad, f_out_pad), lambda c: (0, 0)),       # decoder W^T
                pl.BlockSpec((1, f_out_pad), lambda c: (0, 0)),           # decoder bias
            ],
            out_specs=pl.BlockSpec((chunk_rows, f_out_pad), lambda c: (c, 0)),
            scratch_shapes=[
                pltpu.VMEM((L, b_pad, h_pad), jnp.float32),     # h carry (all layers)
                pltpu.VMEM((L, b_pad, h_pad), jnp.float32),     # c carry (all layers)
                pltpu.VMEM((chunk_rows, G4), jnp.float32),      # per-chunk x-side gates
                pltpu.VMEM((chunk_rows, h_pad), jnp.float32),   # per-chunk layer hidden seq
            ],
        ),
        compiler_params=pltpu.CompilerParams(
            dimension_semantics=("arbitrary",),   # recurrence carried in scratch
            vmem_limit_bytes=48 * 1024 * 1024,    # safe on v7x (64 MiB), plenty on v5e/v6e
        ),
    )(x_flat, w_ih0, wih_rest, whh_stack, b_stack, w_dec, b_dec)


# ----------------------------------------------------------------------------
# Full module forward (packing / padding glue in plain JAX, hot loop in Pallas).
# ----------------------------------------------------------------------------
def lstm_module_forward(x, params, hidden_dim, hidden_layers,
                        matmul_dtype=jnp.bfloat16, time_chunk=32):
    """x: (B, T, f_in) batch_first -> (B, T, f_out)."""
    B, T, F_in = x.shape
    H = hidden_dim
    L = hidden_layers
    f_out = params["dec_w"].shape[0]

    H_pad = _round_up(H, 128)
    B_pad = _round_up(B, 8)
    F_out_pad = _round_up(f_out, 128)
    TC = min(time_chunk, T)
    T_pad = _round_up(T, TC)
    G4 = 4 * H_pad

    # ---- pack & pad parameters ----
    p0 = params["lstm"][0]
    w_ih0 = _pack_gate_matrix(p0["w_ih"], H, H_pad, F_in, matmul_dtype)   # (F_in, 4H_pad)

    whh_stack = jnp.zeros((L, H_pad, G4), matmul_dtype)
    b_stack = jnp.zeros((L, 1, G4), jnp.float32)
    wih_rest = jnp.zeros((max(L - 1, 1), H_pad, G4), matmul_dtype)
    for l in range(L):
        p = params["lstm"][l]
        whh_stack = whh_stack.at[l].set(
            _pack_gate_matrix(p["w_hh"], H, H_pad, H_pad, matmul_dtype))
        b_stack = b_stack.at[l, 0].set(
            _pack_gate_bias(p["b_ih"] + p["b_hh"], H, H_pad)[0])
        if l > 0:
            wih_rest = wih_rest.at[l - 1].set(
                _pack_gate_matrix(p["w_ih"], H, H_pad, H_pad, matmul_dtype))

    w_dec, b_dec = _pack_decoder(params["dec_w"], params["dec_b"],
                                 H, H_pad, F_out_pad, matmul_dtype)

    # ---- input: batch/time pad, time-major, flatten rows (bf16, no f32 blowup) ----
    x_p = jnp.zeros((B_pad, T_pad, F_in), matmul_dtype)
    x_p = x_p.at[:B, :T].set(x.astype(matmul_dtype))
    x_flat = jnp.transpose(x_p, (1, 0, 2)).reshape(T_pad * B_pad, F_in)

    # ---- single fused Pallas kernel: projection + recurrence + decoder ----
    out_flat = _fused_forward(
        x_flat, w_ih0, wih_rest, whh_stack, b_stack, w_dec, b_dec,
        num_layers=L, tc=TC, b_pad=B_pad, h_pad=H_pad, f_out_pad=F_out_pad,
        compute_dtype=matmul_dtype)

    # small slab: slice valid region first, then transpose back to batch_first
    out = out_flat.reshape(T_pad, B_pad, F_out_pad)[:T, :B, :f_out]
    return jnp.transpose(out, (1, 0, 2))   # (B, T, f_out)


# ----------------------------------------------------------------------------
# Pure-JAX reference (lax.scan).  `matmul_dtype` lets it mirror the kernel's
# bf16-operand / f32-accumulate numerics, or run full f32 (PyTorch-faithful).
# ----------------------------------------------------------------------------
def _ref_forward(x, params, H, L, matmul_dtype):
    def mm(a, b):
        return jnp.dot(a.astype(matmul_dtype), b.astype(matmul_dtype),
                       preferred_element_type=jnp.float32)

    h_seq = jnp.transpose(x, (1, 0, 2)).astype(jnp.float32)   # (T, B, F)
    B = h_seq.shape[1]
    for l in range(L):
        p = params["lstm"][l]
        w_ih_t = jnp.transpose(p["w_ih"])
        w_hh_t = jnp.transpose(p["w_hh"])
        b = (p["b_ih"] + p["b_hh"]).astype(jnp.float32)

        def step(carry, x_t, w_ih_t=w_ih_t, w_hh_t=w_hh_t, b=b):
            h, c = carry
            gates = mm(x_t, w_ih_t) + mm(h, w_hh_t) + b
            i = jax.nn.sigmoid(gates[:, 0 * H:1 * H])
            f = jax.nn.sigmoid(gates[:, 1 * H:2 * H])
            g = jnp.tanh(gates[:, 2 * H:3 * H])
            o = jax.nn.sigmoid(gates[:, 3 * H:4 * H])
            c = f * c + i * g
            h = o * jnp.tanh(c)
            return (h, c), h

        init = (jnp.zeros((B, H), jnp.float32), jnp.zeros((B, H), jnp.float32))
        _, h_seq = jax.lax.scan(step, init, h_seq)

    out = jnp.transpose(h_seq, (1, 0, 2))          # (B, T, H)
    return mm(out, jnp.transpose(params["dec_w"])) + params["dec_b"]


# ----------------------------------------------------------------------------
# Deterministic parameter initialization (mirrors PyTorch init shapes/ranges).
# ----------------------------------------------------------------------------
def init_params(key, f_in, f_out, hidden_dim, hidden_layers):
    params = {"lstm": []}
    stdv = 1.0 / float(jnp.sqrt(hidden_dim))
    for layer in range(hidden_layers):
        in_dim = f_in if layer == 0 else hidden_dim
        key, k1, k2, k3, k4 = jax.random.split(key, 5)
        params["lstm"].append({
            "w_ih": jax.random.uniform(k1, (4 * hidden_dim, in_dim),
                                       jnp.float32, -stdv, stdv),
            "w_hh": jax.random.uniform(k2, (4 * hidden_dim, hidden_dim),
                                       jnp.float32, -stdv, stdv),
            "b_ih": jax.random.uniform(k3, (4 * hidden_dim,),
                                       jnp.float32, -stdv, stdv),
            "b_hh": jax.random.uniform(k4, (4 * hidden_dim,),
                                       jnp.float32, -stdv, stdv),
        })
    key, kd = jax.random.split(key)
    params["dec_w"] = jax.random.uniform(kd, (f_out, hidden_dim),
                                         jnp.float32, -0.1, 0.1)
    params["dec_b"] = jnp.zeros((f_out,), jnp.float32)  # init_weights(): bias.zero_()
    return params


if __name__ == "__main__":
    B, T = 2, 8
    F_IN, F_OUT = 32, 16
    HIDDEN_DIM, HIDDEN_LAYERS = 32, 2

    key = jax.random.PRNGKey(0)
    key, kx = jax.random.split(key)
    x = jax.random.normal(kx, (B, T, F_IN), dtype=jnp.float32)
    params = init_params(key, F_IN, F_OUT, HIDDEN_DIM, HIDDEN_LAYERS)

    fwd = jax.jit(functools.partial(
        lstm_module_forward, hidden_dim=HIDDEN_DIM, hidden_layers=HIDDEN_LAYERS,
        matmul_dtype=jnp.bfloat16, time_chunk=32))
    out = jax.block_until_ready(fwd(x, params))
    assert out.shape == (B, T, F_OUT)

    # Tight check vs a reference mirroring the kernel's bf16-matmul / f32-accumulate numerics.
    ref_bf16 = _ref_forward(x, params, HIDDEN_DIM, HIDDEN_LAYERS, jnp.bfloat16)
    err_bf16 = float(jnp.max(jnp.abs(out - ref_bf16)))
    assert jnp.allclose(out, ref_bf16, atol=5e-3, rtol=5e-3), \
        f"bf16-mirrored ref max abs err {err_bf16}"

    # Looser sanity check vs the full-f32 PyTorch-faithful reference.
    ref_f32 = _ref_forward(x, params, HIDDEN_DIM, HIDDEN_LAYERS, jnp.float32)
    err_f32 = float(jnp.max(jnp.abs(out - ref_f32)))
    assert jnp.allclose(out, ref_f32, atol=5e-2, rtol=5e-2), \
        f"f32 ref max abs err {err_f32}"

    print("KERNEL_OK")
</pallas_src>

<mosaic_0001>
module attributes {stable_mosaic.version = 11 : i64} {
  func.func @_fused_lstm_kernel(%arg0: i32, %arg1: memref<64x32xbf16, #tpu.memory_space<vmem>>, %arg2: memref<32x512xbf16, #tpu.memory_space<vmem>>, %arg3: memref<1x128x512xbf16, #tpu.memory_space<vmem>>, %arg4: memref<2x128x512xbf16, #tpu.memory_space<vmem>>, %arg5: memref<2x1x512xf32, #tpu.memory_space<vmem>>, %arg6: memref<128x128xbf16, #tpu.memory_space<vmem>>, %arg7: memref<1x128xf32, #tpu.memory_space<vmem>>, %arg8: memref<64x128xf32, #tpu.memory_space<vmem>>, %arg9: memref<2x8x128xf32, #tpu.memory_space<vmem>>, %arg10: memref<2x8x128xf32, #tpu.memory_space<vmem>>, %arg11: memref<64x512xf32, #tpu.memory_space<vmem>>, %arg12: memref<64x128xf32, #tpu.memory_space<vmem>>) attributes {dimension_semantics = [#tpu.dimension_semantics<arbitrary>], iteration_bounds = array<i64: 1>, scalar_prefetch = 0 : i64, scratch_operands = 4 : i64, tpu.core_type = #tpu.core_type<tc>, window_params = [{transform_indices = @transform_0, window_bounds = array<i64: 64, 32>}, {pipeline_mode = #tpu.pipeline_mode<synchronous>, transform_indices = @transform_1, window_bounds = array<i64: 32, 512>}, {pipeline_mode = #tpu.pipeline_mode<synchronous>, transform_indices = @transform_2, window_bounds = array<i64: 1, 128, 512>}, {pipeline_mode = #tpu.pipeline_mode<synchronous>, transform_indices = @transform_3, window_bounds = array<i64: 2, 128, 512>}, {pipeline_mode = #tpu.pipeline_mode<synchronous>, transform_indices = @transform_4, window_bounds = array<i64: 2, 1, 512>}, {pipeline_mode = #tpu.pipeline_mode<synchronous>, transform_indices = @transform_5, window_bounds = array<i64: 128, 128>}, {pipeline_mode = #tpu.pipeline_mode<synchronous>, transform_indices = @transform_6, window_bounds = array<i64: 1, 128>}, {transform_indices = @transform_7, window_bounds = array<i64: 64, 128>}]} {
    %c0_i32 = arith.constant 0 : i32
    %0 = arith.cmpi eq, %arg0, %c0_i32 : i32
    %1 = arith.extui %0 : i1 to i32
    %c0_i32_0 = arith.constant 0 : i32
    %2 = arith.cmpi ne, %1, %c0_i32_0 : i32
    scf.if %2 {
      %cst_486 = arith.constant 0.000000e+00 : f32
      %861 = vector.broadcast %cst_486 : f32 to vector<2x8x128xf32>
      %c0_487 = arith.constant 0 : index
      %c0_488 = arith.constant 0 : index
      %c0_489 = arith.constant 0 : index
      %862 = vector.load %arg9[%c0_487, %c0_488, %c0_489] : memref<2x8x128xf32, #tpu.memory_space<vmem>>, vector<2x8x128xf32>
      tpu.vector_store %arg9[%c0_487, %c0_488, %c0_489], %861 {strides = array<i32>} : memref<2x8x128xf32, #tpu.memory_space<vmem>>, vector<2x8x128xf32>,
      %cst_490 = arith.constant 0.000000e+00 : f32
      %863 = vector.broadcast %cst_490 : f32 to vector<2x8x128xf32>
      %c0_491 = arith.constant 0 : index
      %c0_492 = arith.constant 0 : index
      %c0_493 = arith.constant 0 : index
      %864 = vector.load %arg10[%c0_491, %c0_492, %c0_493] : memref<2x8x128xf32, #tpu.memory_space<vmem>>, vector<2x8x128xf32>
      tpu.vector_store %arg10[%c0_491, %c0_492, %c0_493], %863 {strides = array<i32>} : memref<2x8x128xf32, #tpu.memory_space<vmem>>, vector<2x8x128xf32>,
    } else {
    }
    %c0 = arith.constant 0 : index
    %c0_1 = arith.constant 0 : index
    %3 = vector.load %arg1[%c0, %c0_1] : memref<64x32xbf16, #tpu.memory_space<vmem>>, vector<64x32xbf16>
    %c0_2 = arith.constant 0 : index
    %c0_3 = arith.constant 0 : index
    %4 = vector.load %arg2[%c0_2, %c0_3] : memref<32x512xbf16, #tpu.memory_space<vmem>>, vector<32x512xbf16>
    %cst = arith.constant dense<0.000000e+00> : vector<64x512xf32>
    %5 = tpu.matmul %3, %4, %cst {dimension_numbers = #tpu.dot_dimension_numbers<[1], [0], [0], [1], [0, 0, 1, 1], [], []>} : vector<64x32xbf16>, vector<32x512xbf16>, vector<64x512xf32> -> vector<64x512xf32>
    %c0_4 = arith.constant 0 : index
    %c0_5 = arith.constant 0 : index
    %c0_6 = arith.constant 0 : index
    %6 = vector.load %arg5[%c0_4, %c0_5, %c0_6] : memref<2x1x512xf32, #tpu.memory_space<vmem>>, vector<1x1x512xf32>
    %7 = vector.shape_cast %6 : vector<1x1x512xf32> to vector<1x512xf32>
    %8 = vector.broadcast %7 : vector<1x512xf32> to vector<64x512xf32>
    %9 = arith.addf %5, %8 : vector<64x512xf32>
    %c0_7 = arith.constant 0 : index
    %c0_8 = arith.constant 0 : index
    %10 = vector.load %arg11[%c0_7, %c0_8] : memref<64x512xf32, #tpu.memory_space<vmem>>, vector<64x512xf32>
    tpu.vector_store %arg11[%c0_7, %c0_8], %9 {strides = array<i32>} : memref<64x512xf32, #tpu.memory_space<vmem>>, vector<64x512xf32>,
    %c0_i32_9 = arith.constant 0 : i32
    %c8_i32 = arith.constant 8 : i32
    %11 = arith.muli %c0_i32_9, %c8_i32 : i32
    %12 = tpu.assume_multiple %11, 8 : i32
    %c0_10 = arith.constant 0 : index
    %c0_11 = arith.constant 0 : index
    %c0_12 = arith.constant 0 : index
    %13 = vector.load %arg9[%c0_10, %c0_11, %c0_12] : memref<2x8x128xf32, #tpu.memory_space<vmem>>, vector<1x8x128xf32>
    %14 = vector.shape_cast %13 : vector<1x8x128xf32> to vector<8x128xf32>
    %c0_13 = arith.constant 0 : index
    %c0_14 = arith.constant 0 : index
    %c0_15 = arith.constant 0 : index
    %15 = vector.load %arg10[%c0_13, %c0_14, %c0_15] : memref<2x8x128xf32, #tpu.memory_space<vmem>>, vector<1x8x128xf32>
    %16 = vector.shape_cast %15 : vector<1x8x128xf32> to vector<8x128xf32>
    %17 = arith.index_cast %12 : i32 to index
    %c0_16 = arith.constant 0 : index
    %18 = vector.load %arg11[%17, %c0_16] : memref<64x512xf32, #tpu.memory_space<vmem>>, vector<8x512xf32>
    %19 = arith.truncf %14 : vector<8x128xf32> to vector<8x128xbf16>
    %c0_17 = arith.constant 0 : index
    %c0_18 = arith.constant 0 : index
    %c0_19 = arith.constant 0 : index
    %20 = vector.load %arg4[%c0_17, %c0_18, %c0_19] : memref<2x128x512xbf16, #tpu.memory_space<vmem>>, vector<1x128x512xbf16>
    %21 = vector.shape_cast %20 : vector<1x128x512xbf16> to vector<128x512xbf16>
    %cst_20 = arith.constant dense<0.000000e+00> : vector<8x512xf32>
    %22 = tpu.matmul %19, %21, %cst_20 {dimension_numbers = #tpu.dot_dimension_numbers<[1], [0], [0], [1], [0, 0, 1, 1], [], []>} : vector<8x128xbf16>, vector<128x512xbf16>, vector<8x512xf32> -> vector<8x512xf32>
    %23 = arith.addf %18, %22 : vector<8x512xf32>
    %24 = vector.extract_strided_slice %23 {offsets = [0, 0], sizes = [8, 128], strides = [1, 1]} : vector<8x512xf32> to vector<8x128xf32>
    %cst_21 = arith.constant 5.000000e-01 : f32
    %25 = vector.broadcast %cst_21 : f32 to vector<8x128xf32>
    %26 = arith.mulf %25, %24 : vector<8x128xf32>
    %27 = math.tanh %26 : vector<8x128xf32>
    %cst_22 = arith.constant 5.000000e-01 : f32
    %28 = vector.broadcast %cst_22 : f32 to vector<8x128xf32>
    %29 = arith.mulf %28, %27 : vector<8x128xf32>
    %cst_23 = arith.constant 5.000000e-01 : f32
    %30 = vector.broadcast %cst_23 : f32 to vector<8x128xf32>
    %31 = arith.addf %29, %30 : vector<8x128xf32>
    %32 = vector.extract_strided_slice %23 {offsets = [0, 128], sizes = [8, 128], strides = [1, 1]} : vector<8x512xf32> to vector<8x128xf32>
    %cst_24 = arith.constant 5.000000e-01 : f32
    %33 = vector.broadcast %cst_24 : f32 to vector<8x128xf32>
    %34 = arith.mulf %33, %32 : vector<8x128xf32>
    %35 = math.tanh %34 : vector<8x128xf32>
    %cst_25 = arith.constant 5.000000e-01 : f32
    %36 = vector.broadcast %cst_25 : f32 to vector<8x128xf32>
    %37 = arith.mulf %36, %35 : vector<8x128xf32>
    %cst_26 = arith.constant 5.000000e-01 : f32
    %38 = vector.broadcast %cst_26 : f32 to vector<8x128xf32>
    %39 = arith.addf %37, %38 : vector<8x128xf32>
    %40 = vector.extract_strided_slice %23 {offsets = [0, 256], sizes = [8, 128], strides = [1, 1]} : vector<8x512xf32> to vector<8x128xf32>
    %41 = math.tanh %40 : vector<8x128xf32>
    %42 = vector.extract_strided_slice %23 {offsets = [0, 384], sizes = [8, 128], strides = [1, 1]} : vector<8x512xf32> to vector<8x128xf32>
    %cst_27 = arith.constant 5.000000e-01 : f32
    %43 = vector.broadcast %cst_27 : f32 to vector<8x128xf32>
    %44 = arith.mulf %43, %42 : vector<8x128xf32>
    %45 = math.tanh %44 : vector<8x128xf32>
    %cst_28 = arith.constant 5.000000e-01 : f32
    %46 = vector.broadcast %cst_28 : f32 to vector<8x128xf32>
    %47 = arith.mulf %46, %45 : vector<8x128xf32>
    %cst_29 = arith.constant 5.000000e-01 : f32
    %48 = vector.broadcast %cst_29 : f32 to vector<8x128xf32>
    %49 = arith.addf %47, %48 : vector<8x128xf32>
    %50 = arith.mulf %39, %16 : vector<8x128xf32>
    %51 = arith.mulf %31, %41 : vector<8x128xf32>
    %52 = arith.addf %50, %51 : vector<8x128xf32>
    %53 = math.tanh %52 : vector<8x128xf32>
    %54 = arith.mulf %49, %53 : vector<8x128xf32>
    %c0_30 = arith.constant 0 : index
    %c0_31 = arith.constant 0 : index
    %c0_32 = arith.constant 0 : index
    %55 = vector.load %arg9[%c0_30, %c0_31, %c0_32] : memref<2x8x128xf32, #tpu.memory_space<vmem>>, vector<1x8x128xf32>
    %56 = vector.shape_cast %55 : vector<1x8x128xf32> to vector<8x128xf32>
    %57 = vector.shape_cast %54 : vector<8x128xf32> to vector<1x8x128xf32>
    tpu.vector_store %arg9[%c0_30, %c0_31, %c0_32], %57 {strides = array<i32>} : memref<2x8x128xf32, #tpu.memory_space<vmem>>, vector<1x8x128xf32>,
    %c0_33 = arith.constant 0 : index
    %c0_34 = arith.constant 0 : index
    %c0_35 = arith.constant 0 : index
    %58 = vector.load %arg10[%c0_33, %c0_34, %c0_35] : memref<2x8x128xf32, #tpu.memory_space<vmem>>, vector<1x8x128xf32>
    %59 = vector.shape_cast %58 : vector<1x8x128xf32> to vector<8x128xf32>
    %60 = vector.shape_cast %52 : vector<8x128xf32> to vector<1x8x128xf32>
    tpu.vector_store %arg10[%c0_33, %c0_34, %c0_35], %60 {strides = array<i32>} : memref<2x8x128xf32, #tpu.memory_space<vmem>>, vector<1x8x128xf32>,
    %61 = arith.index_cast %12 : i32 to index
    %c0_36 = arith.constant 0 : index
    %62 = vector.load %arg12[%61, %c0_36] : memref<64x128xf32, #tpu.memory_space<vmem>>, vector<8x128xf32>
    tpu.vector_store %arg12[%61, %c0_36], %54 {strides = array<i32>} : memref<64x128xf32, #tpu.memory_space<vmem>>, vector<8x128xf32>,
    %c1_i32 = arith.constant 1 : i32
    %c8_i32_37 = arith.constant 8 : i32
    %63 = arith.muli %c1_i32, %c8_i32_37 : i32
    %64 = tpu.assume_multiple %63, 8 : i32
    %c0_38 = arith.constant 0 : index
    %c0_39 = arith.constant 0 : index
    %c0_40 = arith.constant 0 : index
    %65 = vector.load %arg9[%c0_38, %c0_39, %c0_40] : memref<2x8x128xf32, #tpu.memory_space<vmem>>, vector<1x8x128xf32>
    %66 = vector.shape_cast %65 : vector<1x8x128xf32> to vector<8x128xf32>
    %c0_41 = arith.constant 0 : index
    %c0_42 = arith.constant 0 : index
    %c0_43 = arith.constant 0 : index
    %67 = vector.load %arg10[%c0_41, %c0_42, %c0_43] : memref<2x8x128xf32, #tpu.memory_space<vmem>>, vector<1x8x128xf32>
    %68 = vector.shape_cast %67 : vector<1x8x128xf32> to vector<8x128xf32>
    %69 = arith.index_cast %64 : i32 to index
    %c0_44 = arith.constant 0 : index
    %70 = vector.load %arg11[%69, %c0_44] : memref<64x512xf32, #tpu.memory_space<vmem>>, vector<8x512xf32>
    %71 = arith.truncf %66 : vector<8x128xf32> to vector<8x128xbf16>
    %c0_45 = arith.constant 0 : index
    %c0_46 = arith.constant 0 : index
    %c0_47 = arith.constant 0 : index
    %72 = vector.load %arg4[%c0_45, %c0_46, %c0_47] : memref<2x128x512xbf16, #tpu.memory_space<vmem>>, vector<1x128x512xbf16>
    %73 = vector.shape_cast %72 : vector<1x128x512xbf16> to vector<128x512xbf16>
    %cst_48 = arith.constant dense<0.000000e+00> : vector<8x512xf32>
    %74 = tpu.matmul %71, %73, %cst_48 {dimension_numbers = #tpu.dot_dimension_numbers<[1], [0], [0], [1], [0, 0, 1, 1], [], []>} : vector<8x128xbf16>, vector<128x512xbf16>, vector<8x512xf32> -> vector<8x512xf32>
    %75 = arith.addf %70, %74 : vector<8x512xf32>
    %76 = vector.extract_strided_slice %75 {offsets = [0, 0], sizes = [8, 128], strides = [1, 1]} : vector<8x512xf32> to vector<8x128xf32>
    %cst_49 = arith.constant 5.000000e-01 : f32
    %77 = vector.broadcast %cst_49 : f32 to vector<8x128xf32>
    %78 = arith.mulf %77, %76 : vector<8x128xf32>
    %79 = math.tanh %78 : vector<8x128xf32>
    %cst_50 = arith.constant 5.000000e-01 : f32
    %80 = vector.broadcast %cst_50 : f32 to vector<8x128xf32>
    %81 = arith.mulf %80, %79 : vector<8x128xf32>
    %cst_51 = arith.constant 5.000000e-01 : f32
    %82 = vector.broadcast %cst_51 : f32 to vector<8x128xf32>
    %83 = arith.addf %81, %82 : vector<8x128xf32>
    %84 = vector.extract_strided_slice %75 {offsets = [0, 128], sizes = [8, 128], strides = [1, 1]} : vector<8x512xf32> to vector<8x128xf32>
    %cst_52 = arith.constant 5.000000e-01 : f32
    %85 = vector.broadcast %cst_52 : f32 to vector<8x128xf32>
    %86 = arith.mulf %85, %84 : vector<8x128xf32>
    %87 = math.tanh %86 : vector<8x128xf32>
    %cst_53 = arith.constant 5.000000e-01 : f32
    %88 = vector.broadcast %cst_53 : f32 to vector<8x128xf32>
    %89 = arith.mulf %88, %87 : vector<8x128xf32>
    %cst_54 = arith.constant 5.000000e-01 : f32
    %90 = vector.broadcast %cst_54 : f32 to vector<8x128xf32>
    %91 = arith.addf %89, %90 : vector<8x128xf32>
    %92 = vector.extract_strided_slice %75 {offsets = [0, 256], sizes = [8, 128], strides = [1, 1]} : vector<8x512xf32> to vector<8x128xf32>
    %93 = math.tanh %92 : vector<8x128xf32>
    %94 = vector.extract_strided_slice %75 {offsets = [0, 384], sizes = [8, 128], strides = [1, 1]} : vector<8x512xf32> to vector<8x128xf32>
    %cst_55 = arith.constant 5.000000e-01 : f32
    %95 = vector.broadcast %cst_55 : f32 to vector<8x128xf32>
    %96 = arith.mulf %95, %94 : vector<8x128xf32>
    %97 = math.tanh %96 : vector<8x128xf32>
    %cst_56 = arith.constant 5.000000e-01 : f32
    %98 = vector.broadcast %cst_56 : f32 to vector<8x128xf32>
    %99 = arith.mulf %98, %97 : vector<8x128xf32>
    %cst_57 = arith.constant 5.000000e-01 : f32
    %100 = vector.broadcast %cst_57 : f32 to vector<8x128xf32>
    %101 = arith.addf %99, %100 : vector<8x128xf32>
    %102 = arith.mulf %91, %68 : vector<8x128xf32>
    %103 = arith.mulf %83, %93 : vector<8x128xf32>
    %104 = arith.addf %102, %103 : vector<8x128xf32>
    %105 = math.tanh %104 : vector<8x128xf32>
    %106 = arith.mulf %101, %105 : vector<8x128xf32>
    %c0_58 = arith.constant 0 : index
    %c0_59 = arith.constant 0 : index
    %c0_60 = arith.constant 0 : index
    %107 = vector.load %arg9[%c0_58, %c0_59, %c0_60] : memref<2x8x128xf32, #tpu.memory_space<vmem>>, vector<1x8x128xf32>
    %108 = vector.shape_cast %107 : vector<1x8x128xf32> to vector<8x128xf32>
    %109 = vector.shape_cast %106 : vector<8x128xf32> to vector<1x8x128xf32>
    tpu.vector_store %arg9[%c0_58, %c0_59, %c0_60], %109 {strides = array<i32>} : memref<2x8x128xf32, #tpu.memory_space<vmem>>, vector<1x8x128xf32>,
    %c0_61 = arith.constant 0 : index
    %c0_62 = arith.constant 0 : index
    %c0_63 = arith.constant 0 : index
    %110 = vector.load %arg10[%c0_61, %c0_62, %c0_63] : memref<2x8x128xf32, #tpu.memory_space<vmem>>, vector<1x8x128xf32>
    %111 = vector.shape_cast %110 : vector<1x8x128xf32> to vector<8x128xf32>
    %112 = vector.shape_cast %104 : vector<8x128xf32> to vector<1x8x128xf32>
    tpu.vector_store %arg10[%c0_61, %c0_62, %c0_63], %112 {strides = array<i32>} : memref<2x8x128xf32, #tpu.memory_space<vmem>>, vector<1x8x128xf32>,
    %113 = arith.index_cast %64 : i32 to index
    %c0_64 = arith.constant 0 : index
    %114 = vector.load %arg12[%113, %c0_64] : memref<64x128xf32, #tpu.memory_space<vmem>>, vector<8x128xf32>
    tpu.vector_store %arg12[%113, %c0_64], %106 {strides = array<i32>} : memref<64x128xf32, #tpu.memory_space<vmem>>, vector<8x128xf32>,
    %c2_i32 = arith.constant 2 : i32
    %c8_i32_65 = arith.constant 8 : i32
    %115 = arith.muli %c2_i32, %c8_i32_65 : i32
    %116 = tpu.assume_multiple %115, 8 : i32
    %c0_66 = arith.constant 0 : index
    %c0_67 = arith.constant 0 : index
    %c0_68 = arith.constant 0 : index
    %117 = vector.load %arg9[%c0_66, %c0_67, %c0_68] : memref<2x8x128xf32, #tpu.memory_space<vmem>>, vector<1x8x128xf32>
    %118 = vector.shape_cast %117 : vector<1x8x128xf32> to vector<8x128xf32>
    %c0_69 = arith.constant 0 : index
    %c0_70 = arith.constant 0 : index
    %c0_71 = arith.constant 0 : index
    %119 = vector.load %arg10[%c0_69, %c0_70, %c0_71] : memref<2x8x128xf32, #tpu.memory_space<vmem>>, vector<1x8x128xf32>
    %120 = vector.shape_cast %119 : vector<1x8x128xf32> to vector<8x128xf32>
    %121 = arith.index_cast %116 : i32 to index
    %c0_72 = arith.constant 0 : index
    %122 = vector.load %arg11[%121, %c0_72] : memref<64x512xf32, #tpu.memory_space<vmem>>, vector<8x512xf32>
    %123 = arith.truncf %118 : vector<8x128xf32> to vector<8x128xbf16>
    %c0_73 = arith.constant 0 : index
    %c0_74 = arith.constant 0 : index
    %c0_75 = arith.constant 0 : index
    %124 = vector.load %arg4[%c0_73, %c0_74, %c0_75] : memref<2x128x512xbf16, #tpu.memory_space<vmem>>, vector<1x128x512xbf16>
    %125 = vector.shape_cast %124 : vector<1x128x512xbf16> to vector<128x512xbf16>
    %cst_76 = arith.constant dense<0.000000e+00> : vector<8x512xf32>
    %126 = tpu.matmul %123, %125, %cst_76 {dimension_numbers = #tpu.dot_dimension_numbers<[1], [0], [0], [1], [0, 0, 1, 1], [], []>} : vector<8x128xbf16>, vector<128x512xbf16>, vector<8x512xf32> -> vector<8x512xf32>
    %127 = arith.addf %122, %126 : vector<8x512xf32>
    %128 = vector.extract_strided_slice %127 {offsets = [0, 0], sizes = [8, 128], strides = [1, 1]} : vector<8x512xf32> to vector<8x128xf32>
    %cst_77 = arith.constant 5.000000e-01 : f32
    %129 = vector.broadcast %cst_77 : f32 to vector<8x128xf32>
    %130 = arith.mulf %129, %128 : vector<8x128xf32>
    %131 = math.tanh %130 : vector<8x128xf32>
    %cst_78 = arith.constant 5.000000e-01 : f32
    %132 = vector.broadcast %cst_78 : f32 to vector<8x128xf32>
    %133 = arith.mulf %132, %131 : vector<8x128xf32>
    %cst_79 = arith.constant 5.000000e-01 : f32
    %134 = vector.broadcast %cst_79 : f32 to vector<8x128xf32>
    %135 = arith.addf %133, %134 : vector<8x128xf32>
    %136 = vector.extract_strided_slice %127 {offsets = [0, 128], sizes = [8, 128], strides = [1, 1]} : vector<8x512xf32> to vector<8x128xf32>
    %cst_80 = arith.constant 5.000000e-01 : f32
    %137 = vector.broadcast %cst_80 : f32 to vector<8x128xf32>
    %138 = arith.mulf %137, %136 : vector<8x128xf32>
    %139 = math.tanh %138 : vector<8x128xf32>
    %cst_81 = arith.constant 5.000000e-01 : f32
    %140 = vector.broadcast %cst_81 : f32 to vector<8x128xf32>
    %141 = arith.mulf %140, %139 : vector<8x128xf32>
    %cst_82 = arith.constant 5.000000e-01 : f32
    %142 = vector.broadcast %cst_82 : f32 to vector<8x128xf32>
    %143 = arith.addf %141, %142 : vector<8x128xf32>
    %144 = vector.extract_strided_slice %127 {offsets = [0, 256], sizes = [8, 128], strides = [1, 1]} : vector<8x512xf32> to vector<8x128xf32>
    %145 = math.tanh %144 : vector<8x128xf32>
    %146 = vector.extract_strided_slice %127 {offsets = [0, 384], sizes = [8, 128], strides = [1, 1]} : vector<8x512xf32> to vector<8x128xf32>
    %cst_83 = arith.constant 5.000000e-01 : f32
    %147 = vector.broadcast %cst_83 : f32 to vector<8x128xf32>
    %148 = arith.mulf %147, %146 : vector<8x128xf32>
    %149 = math.tanh %148 : vector<8x128xf32>
    %cst_84 = arith.constant 5.000000e-01 : f32
    %150 = vector.broadcast %cst_84 : f32 to vector<8x128xf32>
    %151 = arith.mulf %150, %149 : vector<8x128xf32>
    %cst_85 = arith.constant 5.000000e-01 : f32
    %152 = vector.broadcast %cst_85 : f32 to vector<8x128xf32>
    %153 = arith.addf %151, %152 : vector<8x128xf32>
    %154 = arith.mulf %143, %120 : vector<8x128xf32>
    %155 = arith.mulf %135, %145 : vector<8x128xf32>
    %156 = arith.addf %154, %155 : vector<8x128xf32>
    %157 = math.tanh %156 : vector<8x128xf32>
    %158 = arith.mulf %153, %157 : vector<8x128xf32>
    %c0_86 = arith.constant 0 : index
    %c0_87 = arith.constant 0 : index
    %c0_88 = arith.constant 0 : index
    %159 = vector.load %arg9[%c0_86, %c0_87, %c0_88] : memref<2x8x128xf32, #tpu.memory_space<vmem>>, vector<1x8x128xf32>
    %160 = vector.shape_cast %159 : vector<1x8x128xf32> to vector<8x128xf32>
    %161 = vector.shape_cast %158 : vector<8x128xf32> to vector<1x8x128xf32>
    tpu.vector_store %arg9[%c0_86, %c0_87, %c0_88], %161 {strides = array<i32>} : memref<2x8x128xf32, #tpu.memory_space<vmem>>, vector<1x8x128xf32>,
    %c0_89 = arith.constant 0 : index
    %c0_90 = arith.constant 0 : index
    %c0_91 = arith.constant 0 : index
    %162 = vector.load %arg10[%c0_89, %c0_90, %c0_91] : memref<2x8x128xf32, #tpu.memory_space<vmem>>, vector<1x8x128xf32>
    %163 = vector.shape_cast %162 : vector<1x8x128xf32> to vector<8x128xf32>
    %164 = vector.shape_cast %156 : vector<8x128xf32> to vector<1x8x128xf32>
    tpu.vector_store %arg10[%c0_89, %c0_90, %c0_91], %164 {strides = array<i32>} : memref<2x8x128xf32, #tpu.memory_space<vmem>>, vector<1x8x128xf32>,
    %165 = arith.index_cast %116 : i32 to index
    %c0_92 = arith.constant 0 : index
    %166 = vector.load %arg12[%165, %c0_92] : memref<64x128xf32, #tpu.memory_space<vmem>>, vector<8x128xf32>
    tpu.vector_store %arg12[%165, %c0_92], %158 {strides = array<i32>} : memref<64x128xf32, #tpu.memory_space<vmem>>, vector<8x128xf32>,
    %c3_i32 = arith.constant 3 : i32
    %c8_i32_93 = arith.constant 8 : i32
    %167 = arith.muli %c3_i32, %c8_i32_93 : i32
    %168 = tpu.assume_multiple %167, 8 : i32
    %c0_94 = arith.constant 0 : index
    %c0_95 = arith.constant 0 : index
    %c0_96 = arith.constant 0 : index
    %169 = vector.load %arg9[%c0_94, %c0_95, %c0_96] : memref<2x8x128xf32, #tpu.memory_space<vmem>>, vector<1x8x128xf32>
    %170 = vector.shape_cast %169 : vector<1x8x128xf32> to vector<8x128xf32>
    %c0_97 = arith.constant 0 : index
    %c0_98 = arith.constant 0 : index
    %c0_99 = arith.constant 0 : index
    %171 = vector.load %arg10[%c0_97, %c0_98, %c0_99] : memref<2x8x128xf32, #tpu.memory_space<vmem>>, vector<1x8x128xf32>
    %172 = vector.shape_cast %171 : vector<1x8x128xf32> to vector<8x128xf32>
    %173 = arith.index_cast %168 : i32 to index
    %c0_100 = arith.constant 0 : index
    %174 = vector.load %arg11[%173, %c0_100] : memref<64x512xf32, #tpu.memory_space<vmem>>, vector<8x512xf32>
    %175 = arith.truncf %170 : vector<8x128xf32> to vector<8x128xbf16>
    %c0_101 = arith.constant 0 : index
    %c0_102 = arith.constant 0 : index
    %c0_103 = arith.constant 0 : index
    %176 = vector.load %arg4[%c0_101, %c0_102, %c0_103] : memref<2x128x512xbf16, #tpu.memory_space<vmem>>, vector<1x128x512xbf16>
    %177 = vector.shape_cast %176 : vector<1x128x512xbf16> to vector<128x512xbf16>
    %cst_104 = arith.constant dense<0.000000e+00> : vector<8x512xf32>
    %178 = tpu.matmul %175, %177, %cst_104 {dimension_numbers = #tpu.dot_dimension_numbers<[1], [0], [0], [1], [0, 0, 1, 1], [], []>} : vector<8x128xbf16>, vector<128x512xbf16>, vector<8x512xf32> -> vector<8x512xf32>
    %179 = arith.addf %174, %178 : vector<8x512xf32>
    %180 = vector.extract_strided_slice %179 {offsets = [0, 0], sizes = [8, 128], strides = [1, 1]} : vector<8x512xf32> to vector<8x128xf32>
    %cst_105 = arith.constant 5.000000e-01 : f32
    %181 = vector.broadcast %cst_105 : f32 to vector<8x128xf32>
    %182 = arith.mulf %181, %180 : vector<8x128xf32>
    %183 = math.tanh %182 : vector<8x128xf32>
    %cst_106 = arith.constant 5.000000e-01 : f32
    %184 = vector.broadcast %cst_106 : f32 to vector<8x128xf32>
    %185 = arith.mulf %184, %183 : vector<8x128xf32>
    %cst_107 = arith.constant 5.000000e-01 : f32
    %186 = vector.broadcast %cst_107 : f32 to vector<8x128xf32>
    %187 = arith.addf %185, %186 : vector<8x128xf32>
    %188 = vector.extract_strided_slice %179 {offsets = [0, 128], sizes = [8, 128], strides = [1, 1]} : vector<8x512xf32> to vector<8x128xf32>
    %cst_108 = arith.constant 5.000000e-01 : f32
    %189 = vector.broadcast %cst_108 : f32 to vector<8x128xf32>
    %190 = arith.mulf %189, %188 : vector<8x128xf32>
    %191 = math.tanh %190 : vector<8x128xf32>
    %cst_109 = arith.constant 5.000000e-01 : f32
    %192 = vector.broadcast %cst_109 : f32 to vector<8x128xf32>
    %193 = arith.mulf %192, %191 : vector<8x128xf32>
    %cst_110 = arith.constant 5.000000e-01 : f32
    %194 = vector.broadcast %cst_110 : f32 to vector<8x128xf32>
    %195 = arith.addf %193, %194 : vector<8x128xf32>
    %196 = vector.extract_strided_slice %179 {offsets = [0, 256], sizes = [8, 128], strides = [1, 1]} : vector<8x512xf32> to vector<8x128xf32>
    %197 = math.tanh %196 : vector<8x128xf32>
    %198 = vector.extract_strided_slice %179 {offsets = [0, 384], sizes = [8, 128], strides = [1, 1]} : vector<8x512xf32> to vector<8x128xf32>
    %cst_111 = arith.constant 5.000000e-01 : f32
    %199 = vector.broadcast %cst_111 : f32 to vector<8x128xf32>
    %200 = arith.mulf %199, %198 : vector<8x128xf32>
    %201 = math.tanh %200 : vector<8x128xf32>
    %cst_112 = arith.constant 5.000000e-01 : f32
    %202 = vector.broadcast %cst_112 : f32 to vector<8x128xf32>
    %203 = arith.mulf %202, %201 : vector<8x128xf32>
    %cst_113 = arith.constant 5.000000e-01 : f32
    %204 = vector.broadcast %cst_113 : f32 to vector<8x128xf32>
    %205 = arith.addf %203, %204 : vector<8x128xf32>
    %206 = arith.mulf %195, %172 : vector<8x128xf32>
    %207 = arith.mulf %187, %197 : vector<8x128xf32>
    %208 = arith.addf %206, %207 : vector<8x128xf32>
    %209 = math.tanh %208 : vector<8x128xf32>
    %210 = arith.mulf %205, %209 : vector<8x128xf32>
    %c0_114 = arith.constant 0 : index
    %c0_115 = arith.constant 0 : index
    %c0_116 = arith.constant 0 : index
    %211 = vector.load %arg9[%c0_114, %c0_115, %c0_116] : memref<2x8x128xf32, #tpu.memory_space<vmem>>, vector<1x8x128xf32>
    %212 = vector.shape_cast %211 : vector<1x8x128xf32> to vector<8x128xf32>
    %213 = vector.shape_cast %210 : vector<8x128xf32> to vector<1x8x128xf32>
    tpu.vector_store %arg9[%c0_114, %c0_115, %c0_116], %213 {strides = array<i32>} : memref<2x8x128xf32, #tpu.memory_space<vmem>>, vector<1x8x128xf32>,
    %c0_117 = arith.constant 0 : index
    %c0_118 = arith.constant 0 : index
    %c0_119 = arith.constant 0 : index
    %214 = vector.load %arg10[%c0_117, %c0_118, %c0_119] : memref<2x8x128xf32, #tpu.memory_space<vmem>>, vector<1x8x128xf32>
    %215 = vector.shape_cast %214 : vector<1x8x128xf32> to vector<8x128xf32>
    %216 = vector.shape_cast %208 : vector<8x128xf32> to vector<1x8x128xf32>
    tpu.vector_store %arg10[%c0_117, %c0_118, %c0_119], %216 {strides = array<i32>} : memref<2x8x128xf32, #tpu.memory_space<vmem>>, vector<1x8x128xf32>,
    %217 = arith.index_cast %168 : i32 to index
    %c0_120 = arith.constant 0 : index
    %218 = vector.load %arg12[%217, %c0_120] : memref<64x128xf32, #tpu.memory_space<vmem>>, vector<8x128xf32>
    tpu.vector_store %arg12[%217, %c0_120], %210 {strides = array<i32>} : memref<64x128xf32, #tpu.memory_space<vmem>>, vector<8x128xf32>,
    %c4_i32 = arith.constant 4 : i32
    %c8_i32_121 = arith.constant 8 : i32
    %219 = arith.muli %c4_i32, %c8_i32_121 : i32
    %220 = tpu.assume_multiple %219, 8 : i32
    %c0_122 = arith.constant 0 : index
    %c0_123 = arith.constant 0 : index
    %c0_124 = arith.constant 0 : index
    %221 = vector.load %arg9[%c0_122, %c0_123, %c0_124] : memref<2x8x128xf32, #tpu.memory_space<vmem>>, vector<1x8x128xf32>
    %222 = vector.shape_cast %221 : vector<1x8x128xf32> to vector<8x128xf32>
    %c0_125 = arith.constant 0 : index
    %c0_126 = arith.constant 0 : index
    %c0_127 = arith.constant 0 : index
    %223 = vector.load %arg10[%c0_125, %c0_126, %c0_127] : memref<2x8x128xf32, #tpu.memory_space<vmem>>, vector<1x8x128xf32>
    %224 = vector.shape_cast %223 : vector<1x8x128xf32> to vector<8x128xf32>
    %225 = arith.index_cast %220 : i32 to index
    %c0_128 = arith.constant 0 : index
    %226 = vector.load %arg11[%225, %c0_128] : memref<64x512xf32, #tpu.memory_space<vmem>>, vector<8x512xf32>
    %227 = arith.truncf %222 : vector<8x128xf32> to vector<8x128xbf16>
    %c0_129 = arith.constant 0 : index
    %c0_130 = arith.constant 0 : index
    %c0_131 = arith.constant 0 : index
    %228 = vector.load %arg4[%c0_129, %c0_130, %c0_131] : memref<2x128x512xbf16, #tpu.memory_space<vmem>>, vector<1x128x512xbf16>
    %229 = vector.shape_cast %228 : vector<1x128x512xbf16> to vector<128x512xbf16>
    %cst_132 = arith.constant dense<0.000000e+00> : vector<8x512xf32>
    %230 = tpu.matmul %227, %229, %cst_132 {dimension_numbers = #tpu.dot_dimension_numbers<[1], [0], [0], [1], [0, 0, 1, 1], [], []>} : vector<8x128xbf16>, vector<128x512xbf16>, vector<8x512xf32> -> vector<8x512xf32>
    %231 = arith.addf %226, %230 : vector<8x512xf32>
    %232 = vector.extract_strided_slice %231 {offsets = [0, 0], sizes = [8, 128], strides = [1, 1]} : vector<8x512xf32> to vector<8x128xf32>
    %cst_133 = arith.constant 5.000000e-01 : f32
    %233 = vector.broadcast %cst_133 : f32 to vector<8x128xf32>
    %234 = arith.mulf %233, %232 : vector<8x128xf32>
    %235 = math.tanh %234 : vector<8x128xf32>
    %cst_134 = arith.constant 5.000000e-01 : f32
    %236 = vector.broadcast %cst_134 : f32 to vector<8x128xf32>
    %237 = arith.mulf %236, %235 : vector<8x128xf32>
    %cst_135 = arith.constant 5.000000e-01 : f32
    %238 = vector.broadcast %cst_135 : f32 to vector<8x128xf32>
    %239 = arith.addf %237, %238 : vector<8x128xf32>
    %240 = vector.extract_strided_slice %231 {offsets = [0, 128], sizes = [8, 128], strides = [1, 1]} : vector<8x512xf32> to vector<8x128xf32>
    %cst_136 = arith.constant 5.000000e-01 : f32
    %241 = vector.broadcast %cst_136 : f32 to vector<8x128xf32>
    %242 = arith.mulf %241, %240 : vector<8x128xf32>
    %243 = math.tanh %242 : vector<8x128xf32>
    %cst_137 = arith.constant 5.000000e-01 : f32
    %244 = vector.broadcast %cst_137 : f32 to vector<8x128xf32>
    %245 = arith.mulf %244, %243 : vector<8x128xf32>
    %cst_138 = arith.constant 5.000000e-01 : f32
    %246 = vector.broadcast %cst_138 : f32 to vector<8x128xf32>
    %247 = arith.addf %245, %246 : vector<8x128xf32>
    %248 = vector.extract_strided_slice %231 {offsets = [0, 256], sizes = [8, 128], strides = [1, 1]} : vector<8x512xf32> to vector<8x128xf32>
    %249 = math.tanh %248 : vector<8x128xf32>
    %250 = vector.extract_strided_slice %231 {offsets = [0, 384], sizes = [8, 128], strides = [1, 1]} : vector<8x512xf32> to vector<8x128xf32>
    %cst_139 = arith.constant 5.000000e-01 : f32
    %251 = vector.broadcast %cst_139 : f32 to vector<8x128xf32>
    %252 = arith.mulf %251, %250 : vector<8x128xf32>
    %253 = math.tanh %252 : vector<8x128xf32>
    %cst_140 = arith.constant 5.000000e-01 : f32
    %254 = vector.broadcast %cst_140 : f32 to vector<8x128xf32>
    %255 = arith.mulf %254, %253 : vector<8x128xf32>
    %cst_141 = arith.constant 5.000000e-01 : f32
    %256 = vector.broadcast %cst_141 : f32 to vector<8x128xf32>
    %257 = arith.addf %255, %256 : vector<8x128xf32>
    %258 = arith.mulf %247, %224 : vector<8x128xf32>
    %259 = arith.mulf %239, %249 : vector<8x128xf32>
    %260 = arith.addf %258, %259 : vector<8x128xf32>
    %261 = math.tanh %260 : vector<8x128xf32>
    %262 = arith.mulf %257, %261 : vector<8x128xf32>
    %c0_142 = arith.constant 0 : index
    %c0_143 = arith.constant 0 : index
    %c0_144 = arith.constant 0 : index
    %263 = vector.load %arg9[%c0_142, %c0_143, %c0_144] : memref<2x8x128xf32, #tpu.memory_space<vmem>>, vector<1x8x128xf32>
    %264 = vector.shape_cast %263 : vector<1x8x128xf32> to vector<8x128xf32>
    %265 = vector.shape_cast %262 : vector<8x128xf32> to vector<1x8x128xf32>
    tpu.vector_store %arg9[%c0_142, %c0_143, %c0_144], %265 {strides = array<i32>} : memref<2x8x128xf32, #tpu.memory_space<vmem>>, vector<1x8x128xf32>,
    %c0_145 = arith.constant 0 : index
    %c0_146 = arith.constant 0 : index
    %c0_147 = arith.constant 0 : index
    %266 = vector.load %arg10[%c0_145, %c0_146, %c0_147] : memref<2x8x128xf32, #tpu.memory_space<vmem>>, vector<1x8x128xf32>
    %267 = vector.shape_cast %266 : vector<1x8x128xf32> to vector<8x128xf32>
    %268 = vector.shape_cast %260 : vector<8x128xf32> to vector<1x8x128xf32>
    tpu.vector_store %arg10[%c0_145, %c0_146, %c0_147], %268 {strides = array<i32>} : memref<2x8x128xf32, #tpu.memory_space<vmem>>, vector<1x8x128xf32>,
    %269 = arith.index_cast %220 : i32 to index
    %c0_148 = arith.constant 0 : index
    %270 = vector.load %arg12[%269, %c0_148] : memref<64x128xf32, #tpu.memory_space<vmem>>, vector<8x128xf32>
    tpu.vector_store %arg12[%269, %c0_148], %262 {strides = array<i32>} : memref<64x128xf32, #tpu.memory_space<vmem>>, vector<8x128xf32>,
    %c5_i32 = arith.constant 5 : i32
    %c8_i32_149 = arith.constant 8 : i32
    %271 = arith.muli %c5_i32, %c8_i32_149 : i32
    %272 = tpu.assume_multiple %271, 8 : i32
    %c0_150 = arith.constant 0 : index
    %c0_151 = arith.constant 0 : index
    %c0_152 = arith.constant 0 : index
    %273 = vector.load %arg9[%c0_150, %c0_151, %c0_152] : memref<2x8x128xf32, #tpu.memory_space<vmem>>, vector<1x8x128xf32>
    %274 = vector.shape_cast %273 : vector<1x8x128xf32> to vector<8x128xf32>
    %c0_153 = arith.constant 0 : index
    %c0_154 = arith.constant 0 : index
    %c0_155 = arith.constant 0 : index
    %275 = vector.load %arg10[%c0_153, %c0_154, %c0_155] : memref<2x8x128xf32, #tpu.memory_space<vmem>>, vector<1x8x128xf32>
    %276 = vector.shape_cast %275 : vector<1x8x128xf32> to vector<8x128xf32>
    %277 = arith.index_cast %272 : i32 to index
    %c0_156 = arith.constant 0 : index
    %278 = vector.load %arg11[%277, %c0_156] : memref<64x512xf32, #tpu.memory_space<vmem>>, vector<8x512xf32>
    %279 = arith.truncf %274 : vector<8x128xf32> to vector<8x128xbf16>
    %c0_157 = arith.constant 0 : index
    %c0_158 = arith.constant 0 : index
    %c0_159 = arith.constant 0 : index
    %280 = vector.load %arg4[%c0_157, %c0_158, %c0_159] : memref<2x128x512xbf16, #tpu.memory_space<vmem>>, vector<1x128x512xbf16>
    %281 = vector.shape_cast %280 : vector<1x128x512xbf16> to vector<128x512xbf16>
    %cst_160 = arith.constant dense<0.000000e+00> : vector<8x512xf32>
    %282 = tpu.matmul %279, %281, %cst_160 {dimension_numbers = #tpu.dot_dimension_numbers<[1], [0], [0], [1], [0, 0, 1, 1], [], []>} : vector<8x128xbf16>, vector<128x512xbf16>, vector<8x512xf32> -> vector<8x512xf32>
    %283 = arith.addf %278, %282 : vector<8x512xf32>
    %284 = vector.extract_strided_slice %283 {offsets = [0, 0], sizes = [8, 128], strides = [1, 1]} : vector<8x512xf32> to vector<8x128xf32>
    %cst_161 = arith.constant 5.000000e-01 : f32
    %285 = vector.broadcast %cst_161 : f32 to vector<8x128xf32>
    %286 = arith.mulf %285, %284 : vector<8x128xf32>
    %287 = math.tanh %286 : vector<8x128xf32>
    %cst_162 = arith.constant 5.000000e-01 : f32
    %288 = vector.broadcast %cst_162 : f32 to vector<8x128xf32>
    %289 = arith.mulf %288, %287 : vector<8x128xf32>
    %cst_163 = arith.constant 5.000000e-01 : f32
    %290 = vector.broadcast %cst_163 : f32 to vector<8x128xf32>
    %291 = arith.addf %289, %290 : vector<8x128xf32>
    %292 = vector.extract_strided_slice %283 {offsets = [0, 128], sizes = [8, 128], strides = [1, 1]} : vector<8x512xf32> to vector<8x128xf32>
    %cst_164 = arith.constant 5.000000e-01 : f32
    %293 = vector.broadcast %cst_164 : f32 to vector<8x128xf32>
    %294 = arith.mulf %293, %292 : vector<8x128xf32>
    %295 = math.tanh %294 : vector<8x128xf32>
    %cst_165 = arith.constant 5.000000e-01 : f32
    %296 = vector.broadcast %cst_165 : f32 to vector<8x128xf32>
    %297 = arith.mulf %296, %295 : vector<8x128xf32>
    %cst_166 = arith.constant 5.000000e-01 : f32
    %298 = vector.broadcast %cst_166 : f32 to vector<8x128xf32>
    %299 = arith.addf %297, %298 : vector<8x128xf32>
    %300 = vector.extract_strided_slice %283 {offsets = [0, 256], sizes = [8, 128], strides = [1, 1]} : vector<8x512xf32> to vector<8x128xf32>
    %301 = math.tanh %300 : vector<8x128xf32>
    %302 = vector.extract_strided_slice %283 {offsets = [0, 384], sizes = [8, 128], strides = [1, 1]} : vector<8x512xf32> to vector<8x128xf32>
    %cst_167 = arith.constant 5.000000e-01 : f32
    %303 = vector.broadcast %cst_167 : f32 to vector<8x128xf32>
    %304 = arith.mulf %303, %302 : vector<8x128xf32>
    %305 = math.tanh %304 : vector<8x128xf32>
    %cst_168 = arith.constant 5.000000e-01 : f32
    %306 = vector.broadcast %cst_168 : f32 to vector<8x128xf32>
    %307 = arith.mulf %306, %305 : vector<8x128xf32>
    %cst_169 = arith.constant 5.000000e-01 : f32
    %308 = vector.broadcast %cst_169 : f32 to vector<8x128xf32>
    %309 = arith.addf %307, %308 : vector<8x128xf32>
    %310 = arith.mulf %299, %276 : vector<8x128xf32>
    %311 = arith.mulf %291, %301 : vector<8x128xf32>
    %312 = arith.addf %310, %311 : vector<8x128xf32>
    %313 = math.tanh %312 : vector<8x128xf32>
    %314 = arith.mulf %309, %313 : vector<8x128xf32>
    %c0_170 = arith.constant 0 : index
    %c0_171 = arith.constant 0 : index
    %c0_172 = arith.constant 0 : index
    %315 = vector.load %arg9[%c0_170, %c0_171, %c0_172] : memref<2x8x128xf32, #tpu.memory_space<vmem>>, vector<1x8x128xf32>
    %316 = vector.shape_cast %315 : vector<1x8x128xf32> to vector<8x128xf32>
    %317 = vector.shape_cast %314 : vector<8x128xf32> to vector<1x8x128xf32>
    tpu.vector_store %arg9[%c0_170, %c0_171, %c0_172], %317 {strides = array<i32>} : memref<2x8x128xf32, #tpu.memory_space<vmem>>, vector<1x8x128xf32>,
    %c0_173 = arith.constant 0 : index
    %c0_174 = arith.constant 0 : index
    %c0_175 = arith.constant 0 : index
    %318 = vector.load %arg10[%c0_173, %c0_174, %c0_175] : memref<2x8x128xf32, #tpu.memory_space<vmem>>, vector<1x8x128xf32>
    %319 = vector.shape_cast %318 : vector<1x8x128xf32> to vector<8x128xf32>
    %320 = vector.shape_cast %312 : vector<8x128xf32> to vector<1x8x128xf32>
    tpu.vector_store %arg10[%c0_173, %c0_174, %c0_175], %320 {strides = array<i32>} : memref<2x8x128xf32, #tpu.memory_space<vmem>>, vector<1x8x128xf32>,
    %321 = arith.index_cast %272 : i32 to index
    %c0_176 = arith.constant 0 : index
    %322 = vector.load %arg12[%321, %c0_176] : memref<64x128xf32, #tpu.memory_space<vmem>>, vector<8x128xf32>
    tpu.vector_store %arg12[%321, %c0_176], %314 {strides = array<i32>} : memref<64x128xf32, #tpu.memory_space<vmem>>, vector<8x128xf32>,
    %c6_i32 = arith.constant 6 : i32
    %c8_i32_177 = arith.constant 8 : i32
    %323 = arith.muli %c6_i32, %c8_i32_177 : i32
    %324 = tpu.assume_multiple %323, 8 : i32
    %c0_178 = arith.constant 0 : index
    %c0_179 = arith.constant 0 : index
    %c0_180 = arith.constant 0 : index
    %325 = vector.load %arg9[%c0_178, %c0_179, %c0_180] : memref<2x8x128xf32, #tpu.memory_space<vmem>>, vector<1x8x128xf32>
    %326 = vector.shape_cast %325 : vector<1x8x128xf32> to vector<8x128xf32>
    %c0_181 = arith.constant 0 : index
    %c0_182 = arith.constant 0 : index
    %c0_183 = arith.constant 0 : index
    %327 = vector.load %arg10[%c0_181, %c0_182, %c0_183] : memref<2x8x128xf32, #tpu.memory_space<vmem>>, vector<1x8x128xf32>
    %328 = vector.shape_cast %327 : vector<1x8x128xf32> to vector<8x128xf32>
    %329 = arith.index_cast %324 : i32 to index
    %c0_184 = arith.constant 0 : index
    %330 = vector.load %arg11[%329, %c0_184] : memref<64x512xf32, #tpu.memory_space<vmem>>, vector<8x512xf32>
    %331 = arith.truncf %326 : vector<8x128xf32> to vector<8x128xbf16>
    %c0_185 = arith.constant 0 : index
    %c0_186 = arith.constant 0 : index
    %c0_187 = arith.constant 0 : index
    %332 = vector.load %arg4[%c0_185, %c0_186, %c0_187] : memref<2x128x512xbf16, #tpu.memory_space<vmem>>, vector<1x128x512xbf16>
    %333 = vector.shape_cast %332 : vector<1x128x512xbf16> to vector<128x512xbf16>
    %cst_188 = arith.constant dense<0.000000e+00> : vector<8x512xf32>
    %334 = tpu.matmul %331, %333, %cst_188 {dimension_numbers = #tpu.dot_dimension_numbers<[1], [0], [0], [1], [0, 0, 1, 1], [], []>} : vector<8x128xbf16>, vector<128x512xbf16>, vector<8x512xf32> -> vector<8x512xf32>
    %335 = arith.addf %330, %334 : vector<8x512xf32>
    %336 = vector.extract_strided_slice %335 {offsets = [0, 0], sizes = [8, 128], strides = [1, 1]} : vector<8x512xf32> to vector<8x128xf32>
    %cst_189 = arith.constant 5.000000e-01 : f32
    %337 = vector.broadcast %cst_189 : f32 to vector<8x128xf32>
    %338 = arith.mulf %337, %336 : vector<8x128xf32>
    %339 = math.tanh %338 : vector<8x128xf32>
    %cst_190 = arith.constant 5.000000e-01 : f32
    %340 = vector.broadcast %cst_190 : f32 to vector<8x128xf32>
    %341 = arith.mulf %340, %339 : vector<8x128xf32>
    %cst_191 = arith.constant 5.000000e-01 : f32
    %342 = vector.broadcast %cst_191 : f32 to vector<8x128xf32>
    %343 = arith.addf %341, %342 : vector<8x128xf32>
    %344 = vector.extract_strided_slice %335 {offsets = [0, 128], sizes = [8, 128], strides = [1, 1]} : vector<8x512xf32> to vector<8x128xf32>
    %cst_192 = arith.constant 5.000000e-01 : f32
    %345 = vector.broadcast %cst_192 : f32 to vector<8x128xf32>
    %346 = arith.mulf %345, %344 : vector<8x128xf32>
    %347 = math.tanh %346 : vector<8x128xf32>
    %cst_193 = arith.constant 5.000000e-01 : f32
    %348 = vector.broadcast %cst_193 : f32 to vector<8x128xf32>
    %349 = arith.mulf %348, %347 : vector<8x128xf32>
    %cst_194 = arith.constant 5.000000e-01 : f32
    %350 = vector.broadcast %cst_194 : f32 to vector<8x128xf32>
    %351 = arith.addf %349, %350 : vector<8x128xf32>
    %352 = vector.extract_strided_slice %335 {offsets = [0, 256], sizes = [8, 128], strides = [1, 1]} : vector<8x512xf32> to vector<8x128xf32>
    %353 = math.tanh %352 : vector<8x128xf32>
    %354 = vector.extract_strided_slice %335 {offsets = [0, 384], sizes = [8, 128], strides = [1, 1]} : vector<8x512xf32> to vector<8x128xf32>
    %cst_195 = arith.constant 5.000000e-01 : f32
    %355 = vector.broadcast %cst_195 : f32 to vector<8x128xf32>
    %356 = arith.mulf %355, %354 : vector<8x128xf32>
    %357 = math.tanh %356 : vector<8x128xf32>
    %cst_196 = arith.constant 5.000000e-01 : f32
    %358 = vector.broadcast %cst_196 : f32 to vector<8x128xf32>
    %359 = arith.mulf %358, %357 : vector<8x128xf32>
    %cst_197 = arith.constant 5.000000e-01 : f32
    %360 = vector.broadcast %cst_197 : f32 to vector<8x128xf32>
    %361 = arith.addf %359, %360 : vector<8x128xf32>
    %362 = arith.mulf %351, %328 : vector<8x128xf32>
    %363 = arith.mulf %343, %353 : vector<8x128xf32>
    %364 = arith.addf %362, %363 : vector<8x128xf32>
    %365 = math.tanh %364 : vector<8x128xf32>
    %366 = arith.mulf %361, %365 : vector<8x128xf32>
    %c0_198 = arith.constant 0 : index
    %c0_199 = arith.constant 0 : index
    %c0_200 = arith.constant 0 : index
    %367 = vector.load %arg9[%c0_198, %c0_199, %c0_200] : memref<2x8x128xf32, #tpu.memory_space<vmem>>, vector<1x8x128xf32>
    %368 = vector.shape_cast %367 : vector<1x8x128xf32> to vector<8x128xf32>
    %369 = vector.shape_cast %366 : vector<8x128xf32> to vector<1x8x128xf32>
    tpu.vector_store %arg9[%c0_198, %c0_199, %c0_200], %369 {strides = array<i32>} : memref<2x8x128xf32, #tpu.memory_space<vmem>>, vector<1x8x128xf32>,
    %c0_201 = arith.constant 0 : index
    %c0_202 = arith.constant 0 : index
    %c0_203 = arith.constant 0 : index
    %370 = vector.load %arg10[%c0_201, %c0_202, %c0_203] : memref<2x8x128xf32, #tpu.memory_space<vmem>>, vector<1x8x128xf32>
    %371 = vector.shape_cast %370 : vector<1x8x128xf32> to vector<8x128xf32>
    %372 = vector.shape_cast %364 : vector<8x128xf32> to vector<1x8x128xf32>
    tpu.vector_store %arg10[%c0_201, %c0_202, %c0_203], %372 {strides = array<i32>} : memref<2x8x128xf32, #tpu.memory_space<vmem>>, vector<1x8x128xf32>,
    %373 = arith.index_cast %324 : i32 to index
    %c0_204 = arith.constant 0 : index
    %374 = vector.load %arg12[%373, %c0_204] : memref<64x128xf32, #tpu.memory_space<vmem>>, vector<8x128xf32>
    tpu.vector_store %arg12[%373, %c0_204], %366 {strides = array<i32>} : memref<64x128xf32, #tpu.memory_space<vmem>>, vector<8x128xf32>,
    %c7_i32 = arith.constant 7 : i32
    %c8_i32_205 = arith.constant 8 : i32
    %375 = arith.muli %c7_i32, %c8_i32_205 : i32
    %376 = tpu.assume_multiple %375, 8 : i32
    %c0_206 = arith.constant 0 : index
    %c0_207 = arith.constant 0 : index
    %c0_208 = arith.constant 0 : index
    %377 = vector.load %arg9[%c0_206, %c0_207, %c0_208] : memref<2x8x128xf32, #tpu.memory_space<vmem>>, vector<1x8x128xf32>
    %378 = vector.shape_cast %377 : vector<1x8x128xf32> to vector<8x128xf32>
    %c0_209 = arith.constant 0 : index
    %c0_210 = arith.constant 0 : index
    %c0_211 = arith.constant 0 : index
    %379 = vector.load %arg10[%c0_209, %c0_210, %c0_211] : memref<2x8x128xf32, #tpu.memory_space<vmem>>, vector<1x8x128xf32>
    %380 = vector.shape_cast %379 : vector<1x8x128xf32> to vector<8x128xf32>
    %381 = arith.index_cast %376 : i32 to index
    %c0_212 = arith.constant 0 : index
    %382 = vector.load %arg11[%381, %c0_212] : memref<64x512xf32, #tpu.memory_space<vmem>>, vector<8x512xf32>
    %383 = arith.truncf %378 : vector<8x128xf32> to vector<8x128xbf16>
    %c0_213 = arith.constant 0 : index
    %c0_214 = arith.constant 0 : index
    %c0_215 = arith.constant 0 : index
    %384 = vector.load %arg4[%c0_213, %c0_214, %c0_215] : memref<2x128x512xbf16, #tpu.memory_space<vmem>>, vector<1x128x512xbf16>
    %385 = vector.shape_cast %384 : vector<1x128x512xbf16> to vector<128x512xbf16>
    %cst_216 = arith.constant dense<0.000000e+00> : vector<8x512xf32>
    %386 = tpu.matmul %383, %385, %cst_216 {dimension_numbers = #tpu.dot_dimension_numbers<[1], [0], [0], [1], [0, 0, 1, 1], [], []>} : vector<8x128xbf16>, vector<128x512xbf16>, vector<8x512xf32> -> vector<8x512xf32>
    %387 = arith.addf %382, %386 : vector<8x512xf32>
    %388 = vector.extract_strided_slice %387 {offsets = [0, 0], sizes = [8, 128], strides = [1, 1]} : vector<8x512xf32> to vector<8x128xf32>
    %cst_217 = arith.constant 5.000000e-01 : f32
    %389 = vector.broadcast %cst_217 : f32 to vector<8x128xf32>
    %390 = arith.mulf %389, %388 : vector<8x128xf32>
    %391 = math.tanh %390 : vector<8x128xf32>
    %cst_218 = arith.constant 5.000000e-01 : f32
    %392 = vector.broadcast %cst_218 : f32 to vector<8x128xf32>
    %393 = arith.mulf %392, %391 : vector<8x128xf32>
    %cst_219 = arith.constant 5.000000e-01 : f32
    %394 = vector.broadcast %cst_219 : f32 to vector<8x128xf32>
    %395 = arith.addf %393, %394 : vector<8x128xf32>
    %396 = vector.extract_strided_slice %387 {offsets = [0, 128], sizes = [8, 128], strides = [1, 1]} : vector<8x512xf32> to vector<8x128xf32>
    %cst_220 = arith.constant 5.000000e-01 : f32
    %397 = vector.broadcast %cst_220 : f32 to vector<8x128xf32>
    %398 = arith.mulf %397, %396 : vector<8x128xf32>
    %399 = math.tanh %398 : vector<8x128xf32>
    %cst_221 = arith.constant 5.000000e-01 : f32
    %400 = vector.broadcast %cst_221 : f32 to vector<8x128xf32>
    %401 = arith.mulf %400, %399 : vector<8x128xf32>
    %cst_222 = arith.constant 5.000000e-01 : f32
    %402 = vector.broadcast %cst_222 : f32 to vector<8x128xf32>
    %403 = arith.addf %401, %402 : vector<8x128xf32>
    %404 = vector.extract_strided_slice %387 {offsets = [0, 256], sizes = [8, 128], strides = [1, 1]} : vector<8x512xf32> to vector<8x128xf32>
    %405 = math.tanh %404 : vector<8x128xf32>
    %406 = vector.extract_strided_slice %387 {offsets = [0, 384], sizes = [8, 128], strides = [1, 1]} : vector<8x512xf32> to vector<8x128xf32>
    %cst_223 = arith.constant 5.000000e-01 : f32
    %407 = vector.broadcast %cst_223 : f32 to vector<8x128xf32>
    %408 = arith.mulf %407, %406 : vector<8x128xf32>
    %409 = math.tanh %408 : vector<8x128xf32>
    %cst_224 = arith.constant 5.000000e-01 : f32
    %410 = vector.broadcast %cst_224 : f32 to vector<8x128xf32>
    %411 = arith.mulf %410, %409 : vector<8x128xf32>
    %cst_225 = arith.constant 5.000000e-01 : f32
    %412 = vector.broadcast %cst_225 : f32 to vector<8x128xf32>
    %413 = arith.addf %411, %412 : vector<8x128xf32>
    %414 = arith.mulf %403, %380 : vector<8x128xf32>
    %415 = arith.mulf %395, %405 : vector<8x128xf32>
    %416 = arith.addf %414, %415 : vector<8x128xf32>
    %417 = math.tanh %416 : vector<8x128xf32>
    %418 = arith.mulf %413, %417 : vector<8x128xf32>
    %c0_226 = arith.constant 0 : index
    %c0_227 = arith.constant 0 : index
    %c0_228 = arith.constant 0 : index
    %419 = vector.load %arg9[%c0_226, %c0_227, %c0_228] : memref<2x8x128xf32, #tpu.memory_space<vmem>>, vector<1x8x128xf32>
    %420 = vector.shape_cast %419 : vector<1x8x128xf32> to vector<8x128xf32>
    %421 = vector.shape_cast %418 : vector<8x128xf32> to vector<1x8x128xf32>
    tpu.vector_store %arg9[%c0_226, %c0_227, %c0_228], %421 {strides = array<i32>} : memref<2x8x128xf32, #tpu.memory_space<vmem>>, vector<1x8x128xf32>,
    %c0_229 = arith.constant 0 : index
    %c0_230 = arith.constant 0 : index
    %c0_231 = arith.constant 0 : index
    %422 = vector.load %arg10[%c0_229, %c0_230, %c0_231] : memref<2x8x128xf32, #tpu.memory_space<vmem>>, vector<1x8x128xf32>
    %423 = vector.shape_cast %422 : vector<1x8x128xf32> to vector<8x128xf32>
    %424 = vector.shape_cast %416 : vector<8x128xf32> to vector<1x8x128xf32>
    tpu.vector_store %arg10[%c0_229, %c0_230, %c0_231], %424 {strides = array<i32>} : memref<2x8x128xf32, #tpu.memory_space<vmem>>, vector<1x8x128xf32>,
    %425 = arith.index_cast %376 : i32 to index
    %c0_232 = arith.constant 0 : index
    %426 = vector.load %arg12[%425, %c0_232] : memref<64x128xf32, #tpu.memory_space<vmem>>, vector<8x128xf32>
    tpu.vector_store %arg12[%425, %c0_232], %418 {strides = array<i32>} : memref<64x128xf32, #tpu.memory_space<vmem>>, vector<8x128xf32>,
    %c8_i32_233 = arith.constant 8 : i32
    %c0_234 = arith.constant 0 : index
    %c0_235 = arith.constant 0 : index
    %427 = vector.load %arg12[%c0_234, %c0_235] : memref<64x128xf32, #tpu.memory_space<vmem>>, vector<64x128xf32>
    %428 = arith.truncf %427 : vector<64x128xf32> to vector<64x128xbf16>
    %c0_236 = arith.constant 0 : index
    %c0_237 = arith.constant 0 : index
    %c0_238 = arith.constant 0 : index
    %429 = vector.load %arg3[%c0_236, %c0_237, %c0_238] : memref<1x128x512xbf16, #tpu.memory_space<vmem>>, vector<1x128x512xbf16>
    %430 = vector.shape_cast %429 : vector<1x128x512xbf16> to vector<128x512xbf16>
    %cst_239 = arith.constant dense<0.000000e+00> : vector<64x512xf32>
    %431 = tpu.matmul %428, %430, %cst_239 {dimension_numbers = #tpu.dot_dimension_numbers<[1], [0], [0], [1], [0, 0, 1, 1], [], []>} : vector<64x128xbf16>, vector<128x512xbf16>, vector<64x512xf32> -> vector<64x512xf32>
    %c1 = arith.constant 1 : index
    %c0_240 = arith.constant 0 : index
    %c0_241 = arith.constant 0 : index
    %432 = vector.load %arg5[%c1, %c0_240, %c0_241] : memref<2x1x512xf32, #tpu.memory_space<vmem>>, vector<1x1x512xf32>
    %433 = vector.shape_cast %432 : vector<1x1x512xf32> to vector<1x512xf32>
    %434 = vector.broadcast %433 : vector<1x512xf32> to vector<64x512xf32>
    %435 = arith.addf %431, %434 : vector<64x512xf32>
    %c0_242 = arith.constant 0 : index
    %c0_243 = arith.constant 0 : index
    %436 = vector.load %arg11[%c0_242, %c0_243] : memref<64x512xf32, #tpu.memory_space<vmem>>, vector<64x512xf32>
    tpu.vector_store %arg11[%c0_242, %c0_243], %435 {strides = array<i32>} : memref<64x512xf32, #tpu.memory_space<vmem>>, vector<64x512xf32>,
    %c0_i32_244 = arith.constant 0 : i32
    %c8_i32_245 = arith.constant 8 : i32
    %437 = arith.muli %c0_i32_244, %c8_i32_245 : i32
    %438 = tpu.assume_multiple %437, 8 : i32
    %c1_246 = arith.constant 1 : index
    %c0_247 = arith.constant 0 : index
    %c0_248 = arith.constant 0 : index
    %439 = vector.load %arg9[%c1_246, %c0_247, %c0_248] : memref<2x8x128xf32, #tpu.memory_space<vmem>>, vector<1x8x128xf32>
    %440 = vector.shape_cast %439 : vector<1x8x128xf32> to vector<8x128xf32>
    %c1_249 = arith.constant 1 : index
    %c0_250 = arith.constant 0 : index
    %c0_251 = arith.constant 0 : index
    %441 = vector.load %arg10[%c1_249, %c0_250, %c0_251] : memref<2x8x128xf32, #tpu.memory_space<vmem>>, vector<1x8x128xf32>
    %442 = vector.shape_cast %441 : vector<1x8x128xf32> to vector<8x128xf32>
    %443 = arith.index_cast %438 : i32 to index
    %c0_252 = arith.constant 0 : index
    %444 = vector.load %arg11[%443, %c0_252] : memref<64x512xf32, #tpu.memory_space<vmem>>, vector<8x512xf32>
    %445 = arith.truncf %440 : vector<8x128xf32> to vector<8x128xbf16>
    %c1_253 = arith.constant 1 : index
    %c0_254 = arith.constant 0 : index
    %c0_255 = arith.constant 0 : index
    %446 = vector.load %arg4[%c1_253, %c0_254, %c0_255] : memref<2x128x512xbf16, #tpu.memory_space<vmem>>, vector<1x128x512xbf16>
    %447 = vector.shape_cast %446 : vector<1x128x512xbf16> to vector<128x512xbf16>
    %cst_256 = arith.constant dense<0.000000e+00> : vector<8x512xf32>
    %448 = tpu.matmul %445, %447, %cst_256 {dimension_numbers = #tpu.dot_dimension_numbers<[1], [0], [0], [1], [0, 0, 1, 1], [], []>} : vector<8x128xbf16>, vector<128x512xbf16>, vector<8x512xf32> -> vector<8x512xf32>
    %449 = arith.addf %444, %448 : vector<8x512xf32>
    %450 = vector.extract_strided_slice %449 {offsets = [0, 0], sizes = [8, 128], strides = [1, 1]} : vector<8x512xf32> to vector<8x128xf32>
    %cst_257 = arith.constant 5.000000e-01 : f32
    %451 = vector.broadcast %cst_257 : f32 to vector<8x128xf32>
    %452 = arith.mulf %451, %450 : vector<8x128xf32>
    %453 = math.tanh %452 : vector<8x128xf32>
    %cst_258 = arith.constant 5.000000e-01 : f32
    %454 = vector.broadcast %cst_258 : f32 to vector<8x128xf32>
    %455 = arith.mulf %454, %453 : vector<8x128xf32>
    %cst_259 = arith.constant 5.000000e-01 : f32
    %456 = vector.broadcast %cst_259 : f32 to vector<8x128xf32>
    %457 = arith.addf %455, %456 : vector<8x128xf32>
    %458 = vector.extract_strided_slice %449 {offsets = [0, 128], sizes = [8, 128], strides = [1, 1]} : vector<8x512xf32> to vector<8x128xf32>
    %cst_260 = arith.constant 5.000000e-01 : f32
    %459 = vector.broadcast %cst_260 : f32 to vector<8x128xf32>
    %460 = arith.mulf %459, %458 : vector<8x128xf32>
    %461 = math.tanh %460 : vector<8x128xf32>
    %cst_261 = arith.constant 5.000000e-01 : f32
    %462 = vector.broadcast %cst_261 : f32 to vector<8x128xf32>
    %463 = arith.mulf %462, %461 : vector<8x128xf32>
    %cst_262 = arith.constant 5.000000e-01 : f32
    %464 = vector.broadcast %cst_262 : f32 to vector<8x128xf32>
    %465 = arith.addf %463, %464 : vector<8x128xf32>
    %466 = vector.extract_strided_slice %449 {offsets = [0, 256], sizes = [8, 128], strides = [1, 1]} : vector<8x512xf32> to vector<8x128xf32>
    %467 = math.tanh %466 : vector<8x128xf32>
    %468 = vector.extract_strided_slice %449 {offsets = [0, 384], sizes = [8, 128], strides = [1, 1]} : vector<8x512xf32> to vector<8x128xf32>
    %cst_263 = arith.constant 5.000000e-01 : f32
    %469 = vector.broadcast %cst_263 : f32 to vector<8x128xf32>
    %470 = arith.mulf %469, %468 : vector<8x128xf32>
    %471 = math.tanh %470 : vector<8x128xf32>
    %cst_264 = arith.constant 5.000000e-01 : f32
    %472 = vector.broadcast %cst_264 : f32 to vector<8x128xf32>
    %473 = arith.mulf %472, %471 : vector<8x128xf32>
    %cst_265 = arith.constant 5.000000e-01 : f32
    %474 = vector.broadcast %cst_265 : f32 to vector<8x128xf32>
    %475 = arith.addf %473, %474 : vector<8x128xf32>
    %476 = arith.mulf %465, %442 : vector<8x128xf32>
    %477 = arith.mulf %457, %467 : vector<8x128xf32>
    %478 = arith.addf %476, %477 : vector<8x128xf32>
    %479 = math.tanh %478 : vector<8x128xf32>
    %480 = arith.mulf %475, %479 : vector<8x128xf32>
    %c1_266 = arith.constant 1 : index
    %c0_267 = arith.constant 0 : index
    %c0_268 = arith.constant 0 : index
    %481 = vector.load %arg9[%c1_266, %c0_267, %c0_268] : memref<2x8x128xf32, #tpu.memory_space<vmem>>, vector<1x8x128xf32>
    %482 = vector.shape_cast %481 : vector<1x8x128xf32> to vector<8x128xf32>
    %483 = vector.shape_cast %480 : vector<8x128xf32> to vector<1x8x128xf32>
    tpu.vector_store %arg9[%c1_266, %c0_267, %c0_268], %483 {strides = array<i32>} : memref<2x8x128xf32, #tpu.memory_space<vmem>>, vector<1x8x128xf32>,
    %c1_269 = arith.constant 1 : index
    %c0_270 = arith.constant 0 : index
    %c0_271 = arith.constant 0 : index
    %484 = vector.load %arg10[%c1_269, %c0_270, %c0_271] : memref<2x8x128xf32, #tpu.memory_space<vmem>>, vector<1x8x128xf32>
    %485 = vector.shape_cast %484 : vector<1x8x128xf32> to vector<8x128xf32>
    %486 = vector.shape_cast %478 : vector<8x128xf32> to vector<1x8x128xf32>
    tpu.vector_store %arg10[%c1_269, %c0_270, %c0_271], %486 {strides = array<i32>} : memref<2x8x128xf32, #tpu.memory_space<vmem>>, vector<1x8x128xf32>,
    %487 = arith.index_cast %438 : i32 to index
    %c0_272 = arith.constant 0 : index
    %488 = vector.load %arg12[%487, %c0_272] : memref<64x128xf32, #tpu.memory_space<vmem>>, vector<8x128xf32>
    tpu.vector_store %arg12[%487, %c0_272], %480 {strides = array<i32>} : memref<64x128xf32, #tpu.memory_space<vmem>>, vector<8x128xf32>,
    %c1_i32_273 = arith.constant 1 : i32
    %c8_i32_274 = arith.constant 8 : i32
    %489 = arith.muli %c1_i32_273, %c8_i32_274 : i32
    %490 = tpu.assume_multiple %489, 8 : i32
    %c1_275 = arith.constant 1 : index
    %c0_276 = arith.constant 0 : index
    %c0_277 = arith.constant 0 : index
    %491 = vector.load %arg9[%c1_275, %c0_276, %c0_277] : memref<2x8x128xf32, #tpu.memory_space<vmem>>, vector<1x8x128xf32>
    %492 = vector.shape_cast %491 : vector<1x8x128xf32> to vector<8x128xf32>
    %c1_278 = arith.constant 1 : index
    %c0_279 = arith.constant 0 : index
    %c0_280 = arith.constant 0 : index
    %493 = vector.load %arg10[%c1_278, %c0_279, %c0_280] : memref<2x8x128xf32, #tpu.memory_space<vmem>>, vector<1x8x128xf32>
    %494 = vector.shape_cast %493 : vector<1x8x128xf32> to vector<8x128xf32>
    %495 = arith.index_cast %490 : i32 to index
    %c0_281 = arith.constant 0 : index
    %496 = vector.load %arg11[%495, %c0_281] : memref<64x512xf32, #tpu.memory_space<vmem>>, vector<8x512xf32>
    %497 = arith.truncf %492 : vector<8x128xf32> to vector<8x128xbf16>
    %c1_282 = arith.constant 1 : index
    %c0_283 = arith.constant 0 : index
    %c0_284 = arith.constant 0 : index
    %498 = vector.load %arg4[%c1_282, %c0_283, %c0_284] : memref<2x128x512xbf16, #tpu.memory_space<vmem>>, vector<1x128x512xbf16>
    %499 = vector.shape_cast %498 : vector<1x128x512xbf16> to vector<128x512xbf16>
    %cst_285 = arith.constant dense<0.000000e+00> : vector<8x512xf32>
    %500 = tpu.matmul %497, %499, %cst_285 {dimension_numbers = #tpu.dot_dimension_numbers<[1], [0], [0], [1], [0, 0, 1, 1], [], []>} : vector<8x128xbf16>, vector<128x512xbf16>, vector<8x512xf32> -> vector<8x512xf32>
    %501 = arith.addf %496, %500 : vector<8x512xf32>
    %502 = vector.extract_strided_slice %501 {offsets = [0, 0], sizes = [8, 128], strides = [1, 1]} : vector<8x512xf32> to vector<8x128xf32>
    %cst_286 = arith.constant 5.000000e-01 : f32
    %503 = vector.broadcast %cst_286 : f32 to vector<8x128xf32>
    %504 = arith.mulf %503, %502 : vector<8x128xf32>
    %505 = math.tanh %504 : vector<8x128xf32>
    %cst_287 = arith.constant 5.000000e-01 : f32
    %506 = vector.broadcast %cst_287 : f32 to vector<8x128xf32>
    %507 = arith.mulf %506, %505 : vector<8x128xf32>
    %cst_288 = arith.constant 5.000000e-01 : f32
    %508 = vector.broadcast %cst_288 : f32 to vector<8x128xf32>
    %509 = arith.addf %507, %508 : vector<8x128xf32>
    %510 = vector.extract_strided_slice %501 {offsets = [0, 128], sizes = [8, 128], strides = [1, 1]} : vector<8x512xf32> to vector<8x128xf32>
    %cst_289 = arith.constant 5.000000e-01 : f32
    %511 = vector.broadcast %cst_289 : f32 to vector<8x128xf32>
    %512 = arith.mulf %511, %510 : vector<8x128xf32>
    %513 = math.tanh %512 : vector<8x128xf32>
    %cst_290 = arith.constant 5.000000e-01 : f32
    %514 = vector.broadcast %cst_290 : f32 to vector<8x128xf32>
    %515 = arith.mulf %514, %513 : vector<8x128xf32>
    %cst_291 = arith.constant 5.000000e-01 : f32
    %516 = vector.broadcast %cst_291 : f32 to vector<8x128xf32>
    %517 = arith.addf %515, %516 : vector<8x128xf32>
    %518 = vector.extract_strided_slice %501 {offsets = [0, 256], sizes = [8, 128], strides = [1, 1]} : vector<8x512xf32> to vector<8x128xf32>
    %519 = math.tanh %518 : vector<8x128xf32>
    %520 = vector.extract_strided_slice %501 {offsets = [0, 384], sizes = [8, 128], strides = [1, 1]} : vector<8x512xf32> to vector<8x128xf32>
    %cst_292 = arith.constant 5.000000e-01 : f32
    %521 = vector.broadcast %cst_292 : f32 to vector<8x128xf32>
    %522 = arith.mulf %521, %520 : vector<8x128xf32>
    %523 = math.tanh %522 : vector<8x128xf32>
    %cst_293 = arith.constant 5.000000e-01 : f32
    %524 = vector.broadcast %cst_293 : f32 to vector<8x128xf32>
    %525 = arith.mulf %524, %523 : vector<8x128xf32>
    %cst_294 = arith.constant 5.000000e-01 : f32
    %526 = vector.broadcast %cst_294 : f32 to vector<8x128xf32>
    %527 = arith.addf %525, %526 : vector<8x128xf32>
    %528 = arith.mulf %517, %494 : vector<8x128xf32>
    %529 = arith.mulf %509, %519 : vector<8x128xf32>
    %530 = arith.addf %528, %529 : vector<8x128xf32>
    %531 = math.tanh %530 : vector<8x128xf32>
    %532 = arith.mulf %527, %531 : vector<8x128xf32>
    %c1_295 = arith.constant 1 : index
    %c0_296 = arith.constant 0 : index
    %c0_297 = arith.constant 0 : index
    %533 = vector.load %arg9[%c1_295, %c0_296, %c0_297] : memref<2x8x128xf32, #tpu.memory_space<vmem>>, vector<1x8x128xf32>
    %534 = vector.shape_cast %533 : vector<1x8x128xf32> to vector<8x128xf32>
    %535 = vector.shape_cast %532 : vector<8x128xf32> to vector<1x8x128xf32>
    tpu.vector_store %arg9[%c1_295, %c0_296, %c0_297], %535 {strides = array<i32>} : memref<2x8x128xf32, #tpu.memory_space<vmem>>, vector<1x8x128xf32>,
    %c1_298 = arith.constant 1 : index
    %c0_299 = arith.constant 0 : index
    %c0_300 = arith.constant 0 : index
    %536 = vector.load %arg10[%c1_298, %c0_299, %c0_300] : memref<2x8x128xf32, #tpu.memory_space<vmem>>, vector<1x8x128xf32>
    %537 = vector.shape_cast %536 : vector<1x8x128xf32> to vector<8x128xf32>
    %538 = vector.shape_cast %530 : vector<8x128xf32> to vector<1x8x128xf32>
    tpu.vector_store %arg10[%c1_298, %c0_299, %c0_300], %538 {strides = array<i32>} : memref<2x8x128xf32, #tpu.memory_space<vmem>>, vector<1x8x128xf32>,
    %539 = arith.index_cast %490 : i32 to index
    %c0_301 = arith.constant 0 : index
    %540 = vector.load %arg12[%539, %c0_301] : memref<64x128xf32, #tpu.memory_space<vmem>>, vector<8x128xf32>
    tpu.vector_store %arg12[%539, %c0_301], %532 {strides = array<i32>} : memref<64x128xf32, #tpu.memory_space<vmem>>, vector<8x128xf32>,
    %c2_i32_302 = arith.constant 2 : i32
    %c8_i32_303 = arith.constant 8 : i32
    %541 = arith.muli %c2_i32_302, %c8_i32_303 : i32
    %542 = tpu.assume_multiple %541, 8 : i32
    %c1_304 = arith.constant 1 : index
    %c0_305 = arith.constant 0 : index
    %c0_306 = arith.constant 0 : index
    %543 = vector.load %arg9[%c1_304, %c0_305, %c0_306] : memref<2x8x128xf32, #tpu.memory_space<vmem>>, vector<1x8x128xf32>
    %544 = vector.shape_cast %543 : vector<1x8x128xf32> to vector<8x128xf32>
    %c1_307 = arith.constant 1 : index
    %c0_308 = arith.constant 0 : index
    %c0_309 = arith.constant 0 : index
    %545 = vector.load %arg10[%c1_307, %c0_308, %c0_309] : memref<2x8x128xf32, #tpu.memory_space<vmem>>, vector<1x8x128xf32>
    %546 = vector.shape_cast %545 : vector<1x8x128xf32> to vector<8x128xf32>
    %547 = arith.index_cast %542 : i32 to index
    %c0_310 = arith.constant 0 : index
    %548 = vector.load %arg11[%547, %c0_310] : memref<64x512xf32, #tpu.memory_space<vmem>>, vector<8x512xf32>
    %549 = arith.truncf %544 : vector<8x128xf32> to vector<8x128xbf16>
    %c1_311 = arith.constant 1 : index
    %c0_312 = arith.constant 0 : index
    %c0_313 = arith.constant 0 : index
    %550 = vector.load %arg4[%c1_311, %c0_312, %c0_313] : memref<2x128x512xbf16, #tpu.memory_space<vmem>>, vector<1x128x512xbf16>
    %551 = vector.shape_cast %550 : vector<1x128x512xbf16> to vector<128x512xbf16>
    %cst_314 = arith.constant dense<0.000000e+00> : vector<8x512xf32>
    %552 = tpu.matmul %549, %551, %cst_314 {dimension_numbers = #tpu.dot_dimension_numbers<[1], [0], [0], [1], [0, 0, 1, 1], [], []>} : vector<8x128xbf16>, vector<128x512xbf16>, vector<8x512xf32> -> vector<8x512xf32>
    %553 = arith.addf %548, %552 : vector<8x512xf32>
    %554 = vector.extract_strided_slice %553 {offsets = [0, 0], sizes = [8, 128], strides = [1, 1]} : vector<8x512xf32> to vector<8x128xf32>
    %cst_315 = arith.constant 5.000000e-01 : f32
    %555 = vector.broadcast %cst_315 : f32 to vector<8x128xf32>
    %556 = arith.mulf %555, %554 : vector<8x128xf32>
    %557 = math.tanh %556 : vector<8x128xf32>
    %cst_316 = arith.constant 5.000000e-01 : f32
    %558 = vector.broadcast %cst_316 : f32 to vector<8x128xf32>
    %559 = arith.mulf %558, %557 : vector<8x128xf32>
    %cst_317 = arith.constant 5.000000e-01 : f32
    %560 = vector.broadcast %cst_317 : f32 to vector<8x128xf32>
    %561 = arith.addf %559, %560 : vector<8x128xf32>
    %562 = vector.extract_strided_slice %553 {offsets = [0, 128], sizes = [8, 128], strides = [1, 1]} : vector<8x512xf32> to vector<8x128xf32>
    %cst_318 = arith.constant 5.000000e-01 : f32
    %563 = vector.broadcast %cst_318 : f32 to vector<8x128xf32>
    %564 = arith.mulf %563, %562 : vector<8x128xf32>
    %565 = math.tanh %564 : vector<8x128xf32>
    %cst_319 = arith.constant 5.000000e-01 : f32
    %566 = vector.broadcast %cst_319 : f32 to vector<8x128xf32>
    %567 = arith.mulf %566, %565 : vector<8x128xf32>
    %cst_320 = arith.constant 5.000000e-01 : f32
    %568 = vector.broadcast %cst_320 : f32 to vector<8x128xf32>
    %569 = arith.addf %567, %568 : vector<8x128xf32>
    %570 = vector.extract_strided_slice %553 {offsets = [0, 256], sizes = [8, 128], strides = [1, 1]} : vector<8x512xf32> to vector<8x128xf32>
    %571 = math.tanh %570 : vector<8x128xf32>
    %572 = vector.extract_strided_slice %553 {offsets = [0, 384], sizes = [8, 128], strides = [1, 1]} : vector<8x512xf32> to vector<8x128xf32>
    %cst_321 = arith.constant 5.000000e-01 : f32
    %573 = vector.broadcast %cst_321 : f32 to vector<8x128xf32>
    %574 = arith.mulf %573, %572 : vector<8x128xf32>
    %575 = math.tanh %574 : vector<8x128xf32>
    %cst_322 = arith.constant 5.000000e-01 : f32
    %576 = vector.broadcast %cst_322 : f32 to vector<8x128xf32>
    %577 = arith.mulf %576, %575 : vector<8x128xf32>
    %cst_323 = arith.constant 5.000000e-01 : f32
    %578 = vector.broadcast %cst_323 : f32 to vector<8x128xf32>
    %579 = arith.addf %577, %578 : vector<8x128xf32>
    %580 = arith.mulf %569, %546 : vector<8x128xf32>
    %581 = arith.mulf %561, %571 : vector<8x128xf32>
    %582 = arith.addf %580, %581 : vector<8x128xf32>
    %583 = math.tanh %582 : vector<8x128xf32>
    %584 = arith.mulf %579, %583 : vector<8x128xf32>
    %c1_324 = arith.constant 1 : index
    %c0_325 = arith.constant 0 : index
    %c0_326 = arith.constant 0 : index
    %585 = vector.load %arg9[%c1_324, %c0_325, %c0_326] : memref<2x8x128xf32, #tpu.memory_space<vmem>>, vector<1x8x128xf32>
    %586 = vector.shape_cast %585 : vector<1x8x128xf32> to vector<8x128xf32>
    %587 = vector.shape_cast %584 : vector<8x128xf32> to vector<1x8x128xf32>
    tpu.vector_store %arg9[%c1_324, %c0_325, %c0_326], %587 {strides = array<i32>} : memref<2x8x128xf32, #tpu.memory_space<vmem>>, vector<1x8x128xf32>,
    %c1_327 = arith.constant 1 : index
    %c0_328 = arith.constant 0 : index
    %c0_329 = arith.constant 0 : index
    %588 = vector.load %arg10[%c1_327, %c0_328, %c0_329] : memref<2x8x128xf32, #tpu.memory_space<vmem>>, vector<1x8x128xf32>
    %589 = vector.shape_cast %588 : vector<1x8x128xf32> to vector<8x128xf32>
    %590 = vector.shape_cast %582 : vector<8x128xf32> to vector<1x8x128xf32>
    tpu.vector_store %arg10[%c1_327, %c0_328, %c0_329], %590 {strides = array<i32>} : memref<2x8x128xf32, #tpu.memory_space<vmem>>, vector<1x8x128xf32>,
    %591 = arith.index_cast %542 : i32 to index
    %c0_330 = arith.constant 0 : index
    %592 = vector.load %arg12[%591, %c0_330] : memref<64x128xf32, #tpu.memory_space<vmem>>, vector<8x128xf32>
    tpu.vector_store %arg12[%591, %c0_330], %584 {strides = array<i32>} : memref<64x128xf32, #tpu.memory_space<vmem>>, vector<8x128xf32>,
    %c3_i32_331 = arith.constant 3 : i32
    %c8_i32_332 = arith.constant 8 : i32
    %593 = arith.muli %c3_i32_331, %c8_i32_332 : i32
    %594 = tpu.assume_multiple %593, 8 : i32
    %c1_333 = arith.constant 1 : index
    %c0_334 = arith.constant 0 : index
    %c0_335 = arith.constant 0 : index
    %595 = vector.load %arg9[%c1_333, %c0_334, %c0_335] : memref<2x8x128xf32, #tpu.memory_space<vmem>>, vector<1x8x128xf32>
    %596 = vector.shape_cast %595 : vector<1x8x128xf32> to vector<8x128xf32>
    %c1_336 = arith.constant 1 : index
    %c0_337 = arith.constant 0 : index
    %c0_338 = arith.constant 0 : index
    %597 = vector.load %arg10[%c1_336, %c0_337, %c0_338] : memref<2x8x128xf32, #tpu.memory_space<vmem>>, vector<1x8x128xf32>
    %598 = vector.shape_cast %597 : vector<1x8x128xf32> to vector<8x128xf32>
    %599 = arith.index_cast %594 : i32 to index
    %c0_339 = arith.constant 0 : index
    %600 = vector.load %arg11[%599, %c0_339] : memref<64x512xf32, #tpu.memory_space<vmem>>, vector<8x512xf32>
    %601 = arith.truncf %596 : vector<8x128xf32> to vector<8x128xbf16>
    %c1_340 = arith.constant 1 : index
    %c0_341 = arith.constant 0 : index
    %c0_342 = arith.constant 0 : index
    %602 = vector.load %arg4[%c1_340, %c0_341, %c0_342] : memref<2x128x512xbf16, #tpu.memory_space<vmem>>, vector<1x128x512xbf16>
    %603 = vector.shape_cast %602 : vector<1x128x512xbf16> to vector<128x512xbf16>
    %cst_343 = arith.constant dense<0.000000e+00> : vector<8x512xf32>
    %604 = tpu.matmul %601, %603, %cst_343 {dimension_numbers = #tpu.dot_dimension_numbers<[1], [0], [0], [1], [0, 0, 1, 1], [], []>} : vector<8x128xbf16>, vector<128x512xbf16>, vector<8x512xf32> -> vector<8x512xf32>
    %605 = arith.addf %600, %604 : vector<8x512xf32>
    %606 = vector.extract_strided_slice %605 {offsets = [0, 0], sizes = [8, 128], strides = [1, 1]} : vector<8x512xf32> to vector<8x128xf32>
    %cst_344 = arith.constant 5.000000e-01 : f32
    %607 = vector.broadcast %cst_344 : f32 to vector<8x128xf32>
    %608 = arith.mulf %607, %606 : vector<8x128xf32>
    %609 = math.tanh %608 : vector<8x128xf32>
    %cst_345 = arith.constant 5.000000e-01 : f32
    %610 = vector.broadcast %cst_345 : f32 to vector<8x128xf32>
    %611 = arith.mulf %610, %609 : vector<8x128xf32>
    %cst_346 = arith.constant 5.000000e-01 : f32
    %612 = vector.broadcast %cst_346 : f32 to vector<8x128xf32>
    %613 = arith.addf %611, %612 : vector<8x128xf32>
    %614 = vector.extract_strided_slice %605 {offsets = [0, 128], sizes = [8, 128], strides = [1, 1]} : vector<8x512xf32> to vector<8x128xf32>
    %cst_347 = arith.constant 5.000000e-01 : f32
    %615 = vector.broadcast %cst_347 : f32 to vector<8x128xf32>
    %616 = arith.mulf %615, %614 : vector<8x128xf32>
    %617 = math.tanh %616 : vector<8x128xf32>
    %cst_348 = arith.constant 5.000000e-01 : f32
    %618 = vector.broadcast %cst_348 : f32 to vector<8x128xf32>
    %619 = arith.mulf %618, %617 : vector<8x128xf32>
    %cst_349 = arith.constant 5.000000e-01 : f32
    %620 = vector.broadcast %cst_349 : f32 to vector<8x128xf32>
    %621 = arith.addf %619, %620 : vector<8x128xf32>
    %622 = vector.extract_strided_slice %605 {offsets = [0, 256], sizes = [8, 128], strides = [1, 1]} : vector<8x512xf32> to vector<8x128xf32>
    %623 = math.tanh %622 : vector<8x128xf32>
    %624 = vector.extract_strided_slice %605 {offsets = [0, 384], sizes = [8, 128], strides = [1, 1]} : vector<8x512xf32> to vector<8x128xf32>
    %cst_350 = arith.constant 5.000000e-01 : f32
    %625 = vector.broadcast %cst_350 : f32 to vector<8x128xf32>
    %626 = arith.mulf %625, %624 : vector<8x128xf32>
    %627 = math.tanh %626 : vector<8x128xf32>
    %cst_351 = arith.constant 5.000000e-01 : f32
    %628 = vector.broadcast %cst_351 : f32 to vector<8x128xf32>
    %629 = arith.mulf %628, %627 : vector<8x128xf32>
    %cst_352 = arith.constant 5.000000e-01 : f32
    %630 = vector.broadcast %cst_352 : f32 to vector<8x128xf32>
    %631 = arith.addf %629, %630 : vector<8x128xf32>
    %632 = arith.mulf %621, %598 : vector<8x128xf32>
    %633 = arith.mulf %613, %623 : vector<8x128xf32>
    %634 = arith.addf %632, %633 : vector<8x128xf32>
    %635 = math.tanh %634 : vector<8x128xf32>
    %636 = arith.mulf %631, %635 : vector<8x128xf32>
    %c1_353 = arith.constant 1 : index
    %c0_354 = arith.constant 0 : index
    %c0_355 = arith.constant 0 : index
    %637 = vector.load %arg9[%c1_353, %c0_354, %c0_355] : memref<2x8x128xf32, #tpu.memory_space<vmem>>, vector<1x8x128xf32>
    %638 = vector.shape_cast %637 : vector<1x8x128xf32> to vector<8x128xf32>
    %639 = vector.shape_cast %636 : vector<8x128xf32> to vector<1x8x128xf32>
    tpu.vector_store %arg9[%c1_353, %c0_354, %c0_355], %639 {strides = array<i32>} : memref<2x8x128xf32, #tpu.memory_space<vmem>>, vector<1x8x128xf32>,
    %c1_356 = arith.constant 1 : index
    %c0_357 = arith.constant 0 : index
    %c0_358 = arith.constant 0 : index
    %640 = vector.load %arg10[%c1_356, %c0_357, %c0_358] : memref<2x8x128xf32, #tpu.memory_space<vmem>>, vector<1x8x128xf32>
    %641 = vector.shape_cast %640 : vector<1x8x128xf32> to vector<8x128xf32>
    %642 = vector.shape_cast %634 : vector<8x128xf32> to vector<1x8x128xf32>
    tpu.vector_store %arg10[%c1_356, %c0_357, %c0_358], %642 {strides = array<i32>} : memref<2x8x128xf32, #tpu.memory_space<vmem>>, vector<1x8x128xf32>,
    %643 = arith.index_cast %594 : i32 to index
    %c0_359 = arith.constant 0 : index
    %644 = vector.load %arg12[%643, %c0_359] : memref<64x128xf32, #tpu.memory_space<vmem>>, vector<8x128xf32>
    tpu.vector_store %arg12[%643, %c0_359], %636 {strides = array<i32>} : memref<64x128xf32, #tpu.memory_space<vmem>>, vector<8x128xf32>,
    %c4_i32_360 = arith.constant 4 : i32
    %c8_i32_361 = arith.constant 8 : i32
    %645 = arith.muli %c4_i32_360, %c8_i32_361 : i32
    %646 = tpu.assume_multiple %645, 8 : i32
    %c1_362 = arith.constant 1 : index
    %c0_363 = arith.constant 0 : index
    %c0_364 = arith.constant 0 : index
    %647 = vector.load %arg9[%c1_362, %c0_363, %c0_364] : memref<2x8x128xf32, #tpu.memory_space<vmem>>, vector<1x8x128xf32>
    %648 = vector.shape_cast %647 : vector<1x8x128xf32> to vector<8x128xf32>
    %c1_365 = arith.constant 1 : index
    %c0_366 = arith.constant 0 : index
    %c0_367 = arith.constant 0 : index
    %649 = vector.load %arg10[%c1_365, %c0_366, %c0_367] : memref<2x8x128xf32, #tpu.memory_space<vmem>>, vector<1x8x128xf32>
    %650 = vector.shape_cast %649 : vector<1x8x128xf32> to vector<8x128xf32>
    %651 = arith.index_cast %646 : i32 to index
    %c0_368 = arith.constant 0 : index
    %652 = vector.load %arg11[%651, %c0_368] : memref<64x512xf32, #tpu.memory_space<vmem>>, vector<8x512xf32>
    %653 = arith.truncf %648 : vector<8x128xf32> to vector<8x128xbf16>
    %c1_369 = arith.constant 1 : index
    %c0_370 = arith.constant 0 : index
    %c0_371 = arith.constant 0 : index
    %654 = vector.load %arg4[%c1_369, %c0_370, %c0_371] : memref<2x128x512xbf16, #tpu.memory_space<vmem>>, vector<1x128x512xbf16>
    %655 = vector.shape_cast %654 : vector<1x128x512xbf16> to vector<128x512xbf16>
    %cst_372 = arith.constant dense<0.000000e+00> : vector<8x512xf32>
    %656 = tpu.matmul %653, %655, %cst_372 {dimension_numbers = #tpu.dot_dimension_numbers<[1], [0], [0], [1], [0, 0, 1, 1], [], []>} : vector<8x128xbf16>, vector<128x512xbf16>, vector<8x512xf32> -> vector<8x512xf32>
    %657 = arith.addf %652, %656 : vector<8x512xf32>
    %658 = vector.extract_strided_slice %657 {offsets = [0, 0], sizes = [8, 128], strides = [1, 1]} : vector<8x512xf32> to vector<8x128xf32>
    %cst_373 = arith.constant 5.000000e-01 : f32
    %659 = vector.broadcast %cst_373 : f32 to vector<8x128xf32>
    %660 = arith.mulf %659, %658 : vector<8x128xf32>
    %661 = math.tanh %660 : vector<8x128xf32>
    %cst_374 = arith.constant 5.000000e-01 : f32
    %662 = vector.broadcast %cst_374 : f32 to vector<8x128xf32>
    %663 = arith.mulf %662, %661 : vector<8x128xf32>
    %cst_375 = arith.constant 5.000000e-01 : f32
    %664 = vector.broadcast %cst_375 : f32 to vector<8x128xf32>
    %665 = arith.addf %663, %664 : vector<8x128xf32>
    %666 = vector.extract_strided_slice %657 {offsets = [0, 128], sizes = [8, 128], strides = [1, 1]} : vector<8x512xf32> to vector<8x128xf32>
    %cst_376 = arith.constant 5.000000e-01 : f32
    %667 = vector.broadcast %cst_376 : f32 to vector<8x128xf32>
    %668 = arith.mulf %667, %666 : vector<8x128xf32>
    %669 = math.tanh %668 : vector<8x128xf32>
    %cst_377 = arith.constant 5.000000e-01 : f32
    %670 = vector.broadcast %cst_377 : f32 to vector<8x128xf32>
    %671 = arith.mulf %670, %669 : vector<8x128xf32>
    %cst_378 = arith.constant 5.000000e-01 : f32
    %672 = vector.broadcast %cst_378 : f32 to vector<8x128xf32>
    %673 = arith.addf %671, %672 : vector<8x128xf32>
    %674 = vector.extract_strided_slice %657 {offsets = [0, 256], sizes = [8, 128], strides = [1, 1]} : vector<8x512xf32> to vector<8x128xf32>
    %675 = math.tanh %674 : vector<8x128xf32>
    %676 = vector.extract_strided_slice %657 {offsets = [0, 384], sizes = [8, 128], strides = [1, 1]} : vector<8x512xf32> to vector<8x128xf32>
    %cst_379 = arith.constant 5.000000e-01 : f32
    %677 = vector.broadcast %cst_379 : f32 to vector<8x128xf32>
    %678 = arith.mulf %677, %676 : vector<8x128xf32>
    %679 = math.tanh %678 : vector<8x128xf32>
    %cst_380 = arith.constant 5.000000e-01 : f32
    %680 = vector.broadcast %cst_380 : f32 to vector<8x128xf32>
    %681 = arith.mulf %680, %679 : vector<8x128xf32>
    %cst_381 = arith.constant 5.000000e-01 : f32
    %682 = vector.broadcast %cst_381 : f32 to vector<8x128xf32>
    %683 = arith.addf %681, %682 : vector<8x128xf32>
    %684 = arith.mulf %673, %650 : vector<8x128xf32>
    %685 = arith.mulf %665, %675 : vector<8x128xf32>
    %686 = arith.addf %684, %685 : vector<8x128xf32>
    %687 = math.tanh %686 : vector<8x128xf32>
    %688 = arith.mulf %683, %687 : vector<8x128xf32>
    %c1_382 = arith.constant 1 : index
    %c0_383 = arith.constant 0 : index
    %c0_384 = arith.constant 0 : index
    %689 = vector.load %arg9[%c1_382, %c0_383, %c0_384] : memref<2x8x128xf32, #tpu.memory_space<vmem>>, vector<1x8x128xf32>
    %690 = vector.shape_cast %689 : vector<1x8x128xf32> to vector<8x128xf32>
    %691 = vector.shape_cast %688 : vector<8x128xf32> to vector<1x8x128xf32>
    tpu.vector_store %arg9[%c1_382, %c0_383, %c0_384], %691 {strides = array<i32>} : memref<2x8x128xf32, #tpu.memory_space<vmem>>, vector<1x8x128xf32>,
    %c1_385 = arith.constant 1 : index
    %c0_386 = arith.constant 0 : index
    %c0_387 = arith.constant 0 : index
    %692 = vector.load %arg10[%c1_385, %c0_386, %c0_387] : memref<2x8x128xf32, #tpu.memory_space<vmem>>, vector<1x8x128xf32>
    %693 = vector.shape_cast %692 : vector<1x8x128xf32> to vector<8x128xf32>
    %694 = vector.shape_cast %686 : vector<8x128xf32> to vector<1x8x128xf32>
    tpu.vector_store %arg10[%c1_385, %c0_386, %c0_387], %694 {strides = array<i32>} : memref<2x8x128xf32, #tpu.memory_space<vmem>>, vector<1x8x128xf32>,
    %695 = arith.index_cast %646 : i32 to index
    %c0_388 = arith.constant 0 : index
    %696 = vector.load %arg12[%695, %c0_388] : memref<64x128xf32, #tpu.memory_space<vmem>>, vector<8x128xf32>
    tpu.vector_store %arg12[%695, %c0_388], %688 {strides = array<i32>} : memref<64x128xf32, #tpu.memory_space<vmem>>, vector<8x128xf32>,
    %c5_i32_389 = arith.constant 5 : i32
    %c8_i32_390 = arith.constant 8 : i32
    %697 = arith.muli %c5_i32_389, %c8_i32_390 : i32
    %698 = tpu.assume_multiple %697, 8 : i32
    %c1_391 = arith.constant 1 : index
    %c0_392 = arith.constant 0 : index
    %c0_393 = arith.constant 0 : index
    %699 = vector.load %arg9[%c1_391, %c0_392, %c0_393] : memref<2x8x128xf32, #tpu.memory_space<vmem>>, vector<1x8x128xf32>
    %700 = vector.shape_cast %699 : vector<1x8x128xf32> to vector<8x128xf32>
    %c1_394 = arith.constant 1 : index
    %c0_395 = arith.constant 0 : index
    %c0_396 = arith.constant 0 : index
    %701 = vector.load %arg10[%c1_394, %c0_395, %c0_396] : memref<2x8x128xf32, #tpu.memory_space<vmem>>, vector<1x8x128xf32>
    %702 = vector.shape_cast %701 : vector<1x8x128xf32> to vector<8x128xf32>
    %703 = arith.index_cast %698 : i32 to index
    %c0_397 = arith.constant 0 : index
    %704 = vector.load %arg11[%703, %c0_397] : memref<64x512xf32, #tpu.memory_space<vmem>>, vector<8x512xf32>
    %705 = arith.truncf %700 : vector<8x128xf32> to vector<8x128xbf16>
    %c1_398 = arith.constant 1 : index
    %c0_399 = arith.constant 0 : index
    %c0_400 = arith.constant 0 : index
    %706 = vector.load %arg4[%c1_398, %c0_399, %c0_400] : memref<2x128x512xbf16, #tpu.memory_space<vmem>>, vector<1x128x512xbf16>
    %707 = vector.shape_cast %706 : vector<1x128x512xbf16> to vector<128x512xbf16>
    %cst_401 = arith.constant dense<0.000000e+00> : vector<8x512xf32>
    %708 = tpu.matmul %705, %707, %cst_401 {dimension_numbers = #tpu.dot_dimension_numbers<[1], [0], [0], [1], [0, 0, 1, 1], [], []>} : vector<8x128xbf16>, vector<128x512xbf16>, vector<8x512xf32> -> vector<8x512xf32>
    %709 = arith.addf %704, %708 : vector<8x512xf32>
    %710 = vector.extract_strided_slice %709 {offsets = [0, 0], sizes = [8, 128], strides = [1, 1]} : vector<8x512xf32> to vector<8x128xf32>
    %cst_402 = arith.constant 5.000000e-01 : f32
    %711 = vector.broadcast %cst_402 : f32 to vector<8x128xf32>
    %712 = arith.mulf %711, %710 : vector<8x128xf32>
    %713 = math.tanh %712 : vector<8x128xf32>
    %cst_403 = arith.constant 5.000000e-01 : f32
    %714 = vector.broadcast %cst_403 : f32 to vector<8x128xf32>
    %715 = arith.mulf %714, %713 : vector<8x128xf32>
    %cst_404 = arith.constant 5.000000e-01 : f32
    %716 = vector.broadcast %cst_404 : f32 to vector<8x128xf32>
    %717 = arith.addf %715, %716 : vector<8x128xf32>
    %718 = vector.extract_strided_slice %709 {offsets = [0, 128], sizes = [8, 128], strides = [1, 1]} : vector<8x512xf32> to vector<8x128xf32>
    %cst_405 = arith.constant 5.000000e-01 : f32
    %719 = vector.broadcast %cst_405 : f32 to vector<8x128xf32>
    %720 = arith.mulf %719, %718 : vector<8x128xf32>
    %721 = math.tanh %720 : vector<8x128xf32>
    %cst_406 = arith.constant 5.000000e-01 : f32
    %722 = vector.broadcast %cst_406 : f32 to vector<8x128xf32>
    %723 = arith.mulf %722, %721 : vector<8x128xf32>
    %cst_407 = arith.constant 5.000000e-01 : f32
    %724 = vector.broadcast %cst_407 : f32 to vector<8x128xf32>
    %725 = arith.addf %723, %724 : vector<8x128xf32>
    %726 = vector.extract_strided_slice %709 {offsets = [0, 256], sizes = [8, 128], strides = [1, 1]} : vector<8x512xf32> to vector<8x128xf32>
    %727 = math.tanh %726 : vector<8x128xf32>
    %728 = vector.extract_strided_slice %709 {offsets = [0, 384], sizes = [8, 128], strides = [1, 1]} : vector<8x512xf32> to vector<8x128xf32>
    %cst_408 = arith.constant 5.000000e-01 : f32
    %729 = vector.broadcast %cst_408 : f32 to vector<8x128xf32>
    %730 = arith.mulf %729, %728 : vector<8x128xf32>
    %731 = math.tanh %730 : vector<8x128xf32>
    %cst_409 = arith.constant 5.000000e-01 : f32
    %732 = vector.broadcast %cst_409 : f32 to vector<8x128xf32>
    %733 = arith.mulf %732, %731 : vector<8x128xf32>
    %cst_410 = arith.constant 5.000000e-01 : f32
    %734 = vector.broadcast %cst_410 : f32 to vector<8x128xf32>
    %735 = arith.addf %733, %734 : vector<8x128xf32>
    %736 = arith.mulf %725, %702 : vector<8x128xf32>
    %737 = arith.mulf %717, %727 : vector<8x128xf32>
    %738 = arith.addf %736, %737 : vector<8x128xf32>
    %739 = math.tanh %738 : vector<8x128xf32>
    %740 = arith.mulf %735, %739 : vector<8x128xf32>
    %c1_411 = arith.constant 1 : index
    %c0_412 = arith.constant 0 : index
    %c0_413 = arith.constant 0 : index
    %741 = vector.load %arg9[%c1_411, %c0_412, %c0_413] : memref<2x8x128xf32, #tpu.memory_space<vmem>>, vector<1x8x128xf32>
    %742 = vector.shape_cast %741 : vector<1x8x128xf32> to vector<8x128xf32>
    %743 = vector.shape_cast %740 : vector<8x128xf32> to vector<1x8x128xf32>
    tpu.vector_store %arg9[%c1_411, %c0_412, %c0_413], %743 {strides = array<i32>} : memref<2x8x128xf32, #tpu.memory_space<vmem>>, vector<1x8x128xf32>,
    %c1_414 = arith.constant 1 : index
    %c0_415 = arith.constant 0 : index
    %c0_416 = arith.constant 0 : index
    %744 = vector.load %arg10[%c1_414, %c0_415, %c0_416] : memref<2x8x128xf32, #tpu.memory_space<vmem>>, vector<1x8x128xf32>
    %745 = vector.shape_cast %744 : vector<1x8x128xf32> to vector<8x128xf32>
    %746 = vector.shape_cast %738 : vector<8x128xf32> to vector<1x8x128xf32>
    tpu.vector_store %arg10[%c1_414, %c0_415, %c0_416], %746 {strides = array<i32>} : memref<2x8x128xf32, #tpu.memory_space<vmem>>, vector<1x8x128xf32>,
    %747 = arith.index_cast %698 : i32 to index
    %c0_417 = arith.constant 0 : index
    %748 = vector.load %arg12[%747, %c0_417] : memref<64x128xf32, #tpu.memory_space<vmem>>, vector<8x128xf32>
    tpu.vector_store %arg12[%747, %c0_417], %740 {strides = array<i32>} : memref<64x128xf32, #tpu.memory_space<vmem>>, vector<8x128xf32>,
    %c6_i32_418 = arith.constant 6 : i32
    %c8_i32_419 = arith.constant 8 : i32
    %749 = arith.muli %c6_i32_418, %c8_i32_419 : i32
    %750 = tpu.assume_multiple %749, 8 : i32
    %c1_420 = arith.constant 1 : index
    %c0_421 = arith.constant 0 : index
    %c0_422 = arith.constant 0 : index
    %751 = vector.load %arg9[%c1_420, %c0_421, %c0_422] : memref<2x8x128xf32, #tpu.memory_space<vmem>>, vector<1x8x128xf32>
    %752 = vector.shape_cast %751 : vector<1x8x128xf32> to vector<8x128xf32>
    %c1_423 = arith.constant 1 : index
    %c0_424 = arith.constant 0 : index
    %c0_425 = arith.constant 0 : index
    %753 = vector.load %arg10[%c1_423, %c0_424, %c0_425] : memref<2x8x128xf32, #tpu.memory_space<vmem>>, vector<1x8x128xf32>
    %754 = vector.shape_cast %753 : vector<1x8x128xf32> to vector<8x128xf32>
    %755 = arith.index_cast %750 : i32 to index
    %c0_426 = arith.constant 0 : index
    %756 = vector.load %arg11[%755, %c0_426] : memref<64x512xf32, #tpu.memory_space<vmem>>, vector<8x512xf32>
    %757 = arith.truncf %752 : vector<8x128xf32> to vector<8x128xbf16>
    %c1_427 = arith.constant 1 : index
    %c0_428 = arith.constant 0 : index
    %c0_429 = arith.constant 0 : index
    %758 = vector.load %arg4[%c1_427, %c0_428, %c0_429] : memref<2x128x512xbf16, #tpu.memory_space<vmem>>, vector<1x128x512xbf16>
    %759 = vector.shape_cast %758 : vector<1x128x512xbf16> to vector<128x512xbf16>
    %cst_430 = arith.constant dense<0.000000e+00> : vector<8x512xf32>
    %760 = tpu.matmul %757, %759, %cst_430 {dimension_numbers = #tpu.dot_dimension_numbers<[1], [0], [0], [1], [0, 0, 1, 1], [], []>} : vector<8x128xbf16>, vector<128x512xbf16>, vector<8x512xf32> -> vector<8x512xf32>
    %761 = arith.addf %756, %760 : vector<8x512xf32>
    %762 = vector.extract_strided_slice %761 {offsets = [0, 0], sizes = [8, 128], strides = [1, 1]} : vector<8x512xf32> to vector<8x128xf32>
    %cst_431 = arith.constant 5.000000e-01 : f32
    %763 = vector.broadcast %cst_431 : f32 to vector<8x128xf32>
    %764 = arith.mulf %763, %762 : vector<8x128xf32>
    %765 = math.tanh %764 : vector<8x128xf32>
    %cst_432 = arith.constant 5.000000e-01 : f32
    %766 = vector.broadcast %cst_432 : f32 to vector<8x128xf32>
    %767 = arith.mulf %766, %765 : vector<8x128xf32>
    %cst_433 = arith.constant 5.000000e-01 : f32
    %768 = vector.broadcast %cst_433 : f32 to vector<8x128xf32>
    %769 = arith.addf %767, %768 : vector<8x128xf32>
    %770 = vector.extract_strided_slice %761 {offsets = [0, 128], sizes = [8, 128], strides = [1, 1]} : vector<8x512xf32> to vector<8x128xf32>
    %cst_434 = arith.constant 5.000000e-01 : f32
    %771 = vector.broadcast %cst_434 : f32 to vector<8x128xf32>
    %772 = arith.mulf %771, %770 : vector<8x128xf32>
    %773 = math.tanh %772 : vector<8x128xf32>
    %cst_435 = arith.constant 5.000000e-01 : f32
    %774 = vector.broadcast %cst_435 : f32 to vector<8x128xf32>
    %775 = arith.mulf %774, %773 : vector<8x128xf32>
    %cst_436 = arith.constant 5.000000e-01 : f32
    %776 = vector.broadcast %cst_436 : f32 to vector<8x128xf32>
    %777 = arith.addf %775, %776 : vector<8x128xf32>
    %778 = vector.extract_strided_slice %761 {offsets = [0, 256], sizes = [8, 128], strides = [1, 1]} : vector<8x512xf32> to vector<8x128xf32>
    %779 = math.tanh %778 : vector<8x128xf32>
    %780 = vector.extract_strided_slice %761 {offsets = [0, 384], sizes = [8, 128], strides = [1, 1]} : vector<8x512xf32> to vector<8x128xf32>
    %cst_437 = arith.constant 5.000000e-01 : f32
    %781 = vector.broadcast %cst_437 : f32 to vector<8x128xf32>
    %782 = arith.mulf %781, %780 : vector<8x128xf32>
    %783 = math.tanh %782 : vector<8x128xf32>
    %cst_438 = arith.constant 5.000000e-01 : f32
    %784 = vector.broadcast %cst_438 : f32 to vector<8x128xf32>
    %785 = arith.mulf %784, %783 : vector<8x128xf32>
    %cst_439 = arith.constant 5.000000e-01 : f32
    %786 = vector.broadcast %cst_439 : f32 to vector<8x128xf32>
    %787 = arith.addf %785, %786 : vector<8x128xf32>
    %788 = arith.mulf %777, %754 : vector<8x128xf32>
    %789 = arith.mulf %769, %779 : vector<8x128xf32>
    %790 = arith.addf %788, %789 : vector<8x128xf32>
    %791 = math.tanh %790 : vector<8x128xf32>
    %792 = arith.mulf %787, %791 : vector<8x128xf32>
    %c1_440 = arith.constant 1 : index
    %c0_441 = arith.constant 0 : index
    %c0_442 = arith.constant 0 : index
    %793 = vector.load %arg9[%c1_440, %c0_441, %c0_442] : memref<2x8x128xf32, #tpu.memory_space<vmem>>, vector<1x8x128xf32>
    %794 = vector.shape_cast %793 : vector<1x8x128xf32> to vector<8x128xf32>
    %795 = vector.shape_cast %792 : vector<8x128xf32> to vector<1x8x128xf32>
    tpu.vector_store %arg9[%c1_440, %c0_441, %c0_442], %795 {strides = array<i32>} : memref<2x8x128xf32, #tpu.memory_space<vmem>>, vector<1x8x128xf32>,
    %c1_443 = arith.constant 1 : index
    %c0_444 = arith.constant 0 : index
    %c0_445 = arith.constant 0 : index
    %796 = vector.load %arg10[%c1_443, %c0_444, %c0_445] : memref<2x8x128xf32, #tpu.memory_space<vmem>>, vector<1x8x128xf32>
    %797 = vector.shape_cast %796 : vector<1x8x128xf32> to vector<8x128xf32>
    %798 = vector.shape_cast %790 : vector<8x128xf32> to vector<1x8x128xf32>
    tpu.vector_store %arg10[%c1_443, %c0_444, %c0_445], %798 {strides = array<i32>} : memref<2x8x128xf32, #tpu.memory_space<vmem>>, vector<1x8x128xf32>,
    %799 = arith.index_cast %750 : i32 to index
    %c0_446 = arith.constant 0 : index
    %800 = vector.load %arg12[%799, %c0_446] : memref<64x128xf32, #tpu.memory_space<vmem>>, vector<8x128xf32>
    tpu.vector_store %arg12[%799, %c0_446], %792 {strides = array<i32>} : memref<64x128xf32, #tpu.memory_space<vmem>>, vector<8x128xf32>,
    %c7_i32_447 = arith.constant 7 : i32
    %c8_i32_448 = arith.constant 8 : i32
    %801 = arith.muli %c7_i32_447, %c8_i32_448 : i32
    %802 = tpu.assume_multiple %801, 8 : i32
    %c1_449 = arith.constant 1 : index
    %c0_450 = arith.constant 0 : index
    %c0_451 = arith.constant 0 : index
    %803 = vector.load %arg9[%c1_449, %c0_450, %c0_451] : memref<2x8x128xf32, #tpu.memory_space<vmem>>, vector<1x8x128xf32>
    %804 = vector.shape_cast %803 : vector<1x8x128xf32> to vector<8x128xf32>
    %c1_452 = arith.constant 1 : index
    %c0_453 = arith.constant 0 : index
    %c0_454 = arith.constant 0 : index
    %805 = vector.load %arg10[%c1_452, %c0_453, %c0_454] : memref<2x8x128xf32, #tpu.memory_space<vmem>>, vector<1x8x128xf32>
    %806 = vector.shape_cast %805 : vector<1x8x128xf32> to vector<8x128xf32>
    %807 = arith.index_cast %802 : i32 to index
    %c0_455 = arith.constant 0 : index
    %808 = vector.load %arg11[%807, %c0_455] : memref<64x512xf32, #tpu.memory_space<vmem>>, vector<8x512xf32>
    %809 = arith.truncf %804 : vector<8x128xf32> to vector<8x128xbf16>
    %c1_456 = arith.constant 1 : index
    %c0_457 = arith.constant 0 : index
    %c0_458 = arith.constant 0 : index
    %810 = vector.load %arg4[%c1_456, %c0_457, %c0_458] : memref<2x128x512xbf16, #tpu.memory_space<vmem>>, vector<1x128x512xbf16>
    %811 = vector.shape_cast %810 : vector<1x128x512xbf16> to vector<128x512xbf16>
    %cst_459 = arith.constant dense<0.000000e+00> : vector<8x512xf32>
    %812 = tpu.matmul %809, %811, %cst_459 {dimension_numbers = #tpu.dot_dimension_numbers<[1], [0], [0], [1], [0, 0, 1, 1], [], []>} : vector<8x128xbf16>, vector<128x512xbf16>, vector<8x512xf32> -> vector<8x512xf32>
    %813 = arith.addf %808, %812 : vector<8x512xf32>
    %814 = vector.extract_strided_slice %813 {offsets = [0, 0], sizes = [8, 128], strides = [1, 1]} : vector<8x512xf32> to vector<8x128xf32>
    %cst_460 = arith.constant 5.000000e-01 : f32
    %815 = vector.broadcast %cst_460 : f32 to vector<8x128xf32>
    %816 = arith.mulf %815, %814 : vector<8x128xf32>
    %817 = math.tanh %816 : vector<8x128xf32>
    %cst_461 = arith.constant 5.000000e-01 : f32
    %818 = vector.broadcast %cst_461 : f32 to vector<8x128xf32>
    %819 = arith.mulf %818, %817 : vector<8x128xf32>
    %cst_462 = arith.constant 5.000000e-01 : f32
    %820 = vector.broadcast %cst_462 : f32 to vector<8x128xf32>
    %821 = arith.addf %819, %820 : vector<8x128xf32>
    %822 = vector.extract_strided_slice %813 {offsets = [0, 128], sizes = [8, 128], strides = [1, 1]} : vector<8x512xf32> to vector<8x128xf32>
    %cst_463 = arith.constant 5.000000e-01 : f32
    %823 = vector.broadcast %cst_463 : f32 to vector<8x128xf32>
    %824 = arith.mulf %823, %822 : vector<8x128xf32>
    %825 = math.tanh %824 : vector<8x128xf32>
    %cst_464 = arith.constant 5.000000e-01 : f32
    %826 = vector.broadcast %cst_464 : f32 to vector<8x128xf32>
    %827 = arith.mulf %826, %825 : vector<8x128xf32>
    %cst_465 = arith.constant 5.000000e-01 : f32
    %828 = vector.broadcast %cst_465 : f32 to vector<8x128xf32>
    %829 = arith.addf %827, %828 : vector<8x128xf32>
    %830 = vector.extract_strided_slice %813 {offsets = [0, 256], sizes = [8, 128], strides = [1, 1]} : vector<8x512xf32> to vector<8x128xf32>
    %831 = math.tanh %830 : vector<8x128xf32>
    %832 = vector.extract_strided_slice %813 {offsets = [0, 384], sizes = [8, 128], strides = [1, 1]} : vector<8x512xf32> to vector<8x128xf32>
    %cst_466 = arith.constant 5.000000e-01 : f32
    %833 = vector.broadcast %cst_466 : f32 to vector<8x128xf32>
    %834 = arith.mulf %833, %832 : vector<8x128xf32>
    %835 = math.tanh %834 : vector<8x128xf32>
    %cst_467 = arith.constant 5.000000e-01 : f32
    %836 = vector.broadcast %cst_467 : f32 to vector<8x128xf32>
    %837 = arith.mulf %836, %835 : vector<8x128xf32>
    %cst_468 = arith.constant 5.000000e-01 : f32
    %838 = vector.broadcast %cst_468 : f32 to vector<8x128xf32>
    %839 = arith.addf %837, %838 : vector<8x128xf32>
    %840 = arith.mulf %829, %806 : vector<8x128xf32>
    %841 = arith.mulf %821, %831 : vector<8x128xf32>
    %842 = arith.addf %840, %841 : vector<8x128xf32>
    %843 = math.tanh %842 : vector<8x128xf32>
    %844 = arith.mulf %839, %843 : vector<8x128xf32>
    %c1_469 = arith.constant 1 : index
    %c0_470 = arith.constant 0 : index
    %c0_471 = arith.constant 0 : index
    %845 = vector.load %arg9[%c1_469, %c0_470, %c0_471] : memref<2x8x128xf32, #tpu.memory_space<vmem>>, vector<1x8x128xf32>
    %846 = vector.shape_cast %845 : vector<1x8x128xf32> to vector<8x128xf32>
    %847 = vector.shape_cast %844 : vector<8x128xf32> to vector<1x8x128xf32>
    tpu.vector_store %arg9[%c1_469, %c0_470, %c0_471], %847 {strides = array<i32>} : memref<2x8x128xf32, #tpu.memory_space<vmem>>, vector<1x8x128xf32>,
    %c1_472 = arith.constant 1 : index
    %c0_473 = arith.constant 0 : index
    %c0_474 = arith.constant 0 : index
    %848 = vector.load %arg10[%c1_472, %c0_473, %c0_474] : memref<2x8x128xf32, #tpu.memory_space<vmem>>, vector<1x8x128xf32>
    %849 = vector.shape_cast %848 : vector<1x8x128xf32> to vector<8x128xf32>
    %850 = vector.shape_cast %842 : vector<8x128xf32> to vector<1x8x128xf32>
    tpu.vector_store %arg10[%c1_472, %c0_473, %c0_474], %850 {strides = array<i32>} : memref<2x8x128xf32, #tpu.memory_space<vmem>>, vector<1x8x128xf32>,
    %851 = arith.index_cast %802 : i32 to index
    %c0_475 = arith.constant 0 : index
    %852 = vector.load %arg12[%851, %c0_475] : memref<64x128xf32, #tpu.memory_space<vmem>>, vector<8x128xf32>
    tpu.vector_store %arg12[%851, %c0_475], %844 {strides = array<i32>} : memref<64x128xf32, #tpu.memory_space<vmem>>, vector<8x128xf32>,
    %c8_i32_476 = arith.constant 8 : i32
    %c0_477 = arith.constant 0 : index
    %c0_478 = arith.constant 0 : index
    %853 = vector.load %arg12[%c0_477, %c0_478] : memref<64x128xf32, #tpu.memory_space<vmem>>, vector<64x128xf32>
    %854 = arith.truncf %853 : vector<64x128xf32> to vector<64x128xbf16>
    %c0_479 = arith.constant 0 : index
    %c0_480 = arith.constant 0 : index
    %855 = vector.load %arg6[%c0_479, %c0_480] : memref<128x128xbf16, #tpu.memory_space<vmem>>, vector<128x128xbf16>
    %cst_481 = arith.constant dense<0.000000e+00> : vector<64x128xf32>
    %856 = tpu.matmul %854, %855, %cst_481 {dimension_numbers = #tpu.dot_dimension_numbers<[1], [0], [0], [1], [0, 0, 1, 1], [], []>} : vector<64x128xbf16>, vector<128x128xbf16>, vector<64x128xf32> -> vector<64x128xf32>
    %c0_482 = arith.constant 0 : index
    %c0_483 = arith.constant 0 : index
    %857 = vector.load %arg7[%c0_482, %c0_483] : memref<1x128xf32, #tpu.memory_space<vmem>>, vector<1x128xf32>
    %858 = vector.broadcast %857 : vector<1x128xf32> to vector<64x128xf32>
    %859 = arith.addf %856, %858 : vector<64x128xf32>
    %c0_484 = arith.constant 0 : index
    %c0_485 = arith.constant 0 : index
    %860 = vector.load %arg8[%c0_484, %c0_485] : memref<64x128xf32, #tpu.memory_space<vmem>>, vector<64x128xf32>
    tpu.vector_store %arg8[%c0_484, %c0_485], %859 {strides = array<i32>} : memref<64x128xf32, #tpu.memory_space<vmem>>, vector<64x128xf32>,
    return
  }
  func.func @transform_0(%arg0: i32) -> (i32, i32) {
    %c0_i32 = arith.constant 0 : i32
    %c0_i32_0 = arith.constant 0 : i32
    return %arg0, %c0_i32 : i32, i32
  }
  func.func @transform_1(%arg0: i32) -> (i32, i32) {
    %c0_i32 = arith.constant 0 : i32
    %c0_i32_0 = arith.constant 0 : i32
    %c0_i32_1 = arith.constant 0 : i32
    return %c0_i32, %c0_i32_0 : i32, i32
  }
  func.func @transform_2(%arg0: i32) -> (i32, i32, i32) {
    %c0_i32 = arith.constant 0 : i32
    %c0_i32_0 = arith.constant 0 : i32
    %c0_i32_1 = arith.constant 0 : i32
    %c0_i32_2 = arith.constant 0 : i32
    return %c0_i32, %c0_i32_0, %c0_i32_1 : i32, i32, i32
  }
  func.func @transform_3(%arg0: i32) -> (i32, i32, i32) {
    %c0_i32 = arith.constant 0 : i32
    %c0_i32_0 = arith.constant 0 : i32
    %c0_i32_1 = arith.constant 0 : i32
    %c0_i32_2 = arith.constant 0 : i32
    return %c0_i32, %c0_i32_0, %c0_i32_1 : i32, i32, i32
  }
  func.func @transform_4(%arg0: i32) -> (i32, i32, i32) {
    %c0_i32 = arith.constant 0 : i32
    %c0_i32_0 = arith.constant 0 : i32
    %c0_i32_1 = arith.constant 0 : i32
    %c0_i32_2 = arith.constant 0 : i32
    return %c0_i32, %c0_i32_0, %c0_i32_1 : i32, i32, i32
  }
  func.func @transform_5(%arg0: i32) -> (i32, i32) {
    %c0_i32 = arith.constant 0 : i32
    %c0_i32_0 = arith.constant 0 : i32
    %c0_i32_1 = arith.constant 0 : i32
    return %c0_i32, %c0_i32_0 : i32, i32
  }
  func.func @transform_6(%arg0: i32) -> (i32, i32) {
    %c0_i32 = arith.constant 0 : i32
    %c0_i32_0 = arith.constant 0 : i32
    %c0_i32_1 = arith.constant 0 : i32
    return %c0_i32, %c0_i32_0 : i32, i32
  }
  func.func @transform_7(%arg0: i32) -> (i32, i32) {
    %c0_i32 = arith.constant 0 : i32
    %c0_i32_0 = arith.constant 0 : i32
    return %arg0, %c0_i32 : i32, i32
  }
}

</mosaic_0001>

<bundles_post_ra>
// kernel: lstm_module_forward.1
= control target key start
LH: loop header
LB: loop body
LE: loop exit
PB: predicated region body
PF: predicated region fallthrough
CT: control target
= control target key end

     0   :  { %v8990_v1 = vmov 0   ;;  %vm133_vm0 = vcmask 261120   ;;  %v8988_v30 = vmov 0.0|0.0   ;;  %v53_v46 = vlaneseq  ;;  %s8978_s1 = inlined_call_operand.vmem [shape: bf16[32,512], index: 1, kind: input, shape index: {}]   ;;  %s8979_s3 = inlined_call_operand.vmem [shape: bf16[2,128,512], index: 3, kind: input, shape index: {}]   ;;  %s8980_s0 = inlined_call_operand.vmem [shape: bf16[64,32], index: 0, kind: input, shape index: {}]   ;;  %s8981_s4 = inlined_call_operand.vmem [shape: f32[2,1,512], index: 4, kind: input, shape index: {}]   ;;  %s8982_s2 = inlined_call_operand.vmem [shape: bf16[1,128,512], index: 2, kind: input, shape index: {}]   ;;  %s8983_s5 = inlined_call_operand.vmem [shape: bf16[128,128], index: 5, kind: input, shape index: {}]   ;;  %s8984_s6 = inlined_call_operand.vmem [shape: f32[1,128], index: 6, kind: input, shape index: {}]   ;;  %s8985_s7 = inlined_call_operand.vmem [shape: f32[64,128], index: 7, kind: output, shape index: {}]  }
   0x1   :  { %v6694_v0 = vld [vmem:[%s8978_s1 + $0x4] ss:$16 sps:$4 sm:$0xff]   ;;  %178 = vmatprep.mubr.bf16.mxu1 %v8990_v1  ;;  %558 = vmatprep.mubr.bf16.mxu0 %v8990_v1  ;;  %v6698_v3 = vld [vmem:[%s8978_s1] ss:$16 sps:$4 sm:$0xff]   ;;  %v6707_v10 = vld [vmem:[%s8978_s1 + $0x8] ss:$16 sps:$4 sm:$0xff]  }
   0x2   :  { %v7189_v2 = vld [vmem:[%s8979_s3 + $0x4] ss:$16 sps:$4 sm:$0xff]   ;;  %146 = vmatprep.subr.bf16.mxu1 %v6694_v0  ;;  %v7197_v4 = vld [vmem:[%s8979_s3] ss:$16 sps:$4 sm:$0xff]   ;;  %v6709_v11 = vld [vmem:[%s8978_s1 + $0xc] ss:$16 sps:$4 sm:$0xff]  }
   0x3   :  { %526 = vmatprep.subr.bf16.mxu0 %v7189_v2  ;;  %v6700_v5 = vld [vmem:[%s8978_s1 + $0x24] ss:$16 sps:$4 sm:$0xff]   ;;  %147 = vmatpush1.bf16.msra.mxu1 %v6698_v3  ;;  %v6704_v7 = vld [vmem:[%s8978_s1 + $0x20] ss:$16 sps:$4 sm:$0xff]   ;;  %v6716_v17 = vld [vmem:[%s8980_s0 + $0x8] sm:$0xff]   ;;  %v7465_v47 = vshrl.u32 %v53_v46, 7 }
   0x4   :  { %527 = vmatpush1.bf16.msra.mxu0 %v7197_v4  ;;  %v7207_v6 = vld [vmem:[%s8979_s3 + $0x24] ss:$16 sps:$4 sm:$0xff]   ;;  %148 = vmatprep.subr.bf16.mxu1 %v6700_v5  ;;  %v7215_v8 = vld [vmem:[%s8979_s3 + $0x20] ss:$16 sps:$4 sm:$0xff]   ;;  %v6726_v19 = vld [vmem:[%s8978_s1 + $0x2c] ss:$16 sps:$4 sm:$0xff]  }
   0x5   :  { %528 = vmatprep.subr.bf16.mxu0 %v7207_v6  ;;  %v6706_v9 = vld [vmem:[%s8980_s0] sm:$0xff]   ;;  %v6724_v21 = vld [vmem:[%s8978_s1 + $0x28] ss:$16 sps:$4 sm:$0xff]   ;;  %v7296_v24 = vld [vmem:[%s8979_s3 + $0xc] ss:$16 sps:$4 sm:$0xff]   ;;  %8997 = vst [vmem:[#allocation6_spill] sm:$0xff] %v7465_v47 }
   0x6   :  { %v7231_v12 = vld [vmem:[%s8979_s3 + $0x44] ss:$16 sps:$4 sm:$0xff]   ;;  %v7236_v13 = vld [vmem:[%s8979_s3 + $0x40] ss:$16 sps:$4 sm:$0xff]   ;;  %v6733_v29 = vld [vmem:[%s8980_s0 + $0x18] sm:$0xff]   ;;  %v8987_v48 = vsub.s32 0, %v7465_v47 }
   0x7   :  { %149 = vmatpush1.bf16.msra.mxu1 %v6704_v7  ;;  %v7241_v14 = vld [vmem:[%s8979_s3 + $0x64] ss:$16 sps:$4 sm:$0xff]   ;;  %v7249_v15 = vld [vmem:[%s8979_s3 + $0x60] ss:$16 sps:$4 sm:$0xff]   ;;  %v7337_v31 = vld [vmem:[%s8979_s3 + $0x8] ss:$16 sps:$4 sm:$0xff]  }
   0x8   :  { %529 = vmatpush1.bf16.msra.mxu0 %v7215_v8  ;;  %219 = vmatprep.subr.bf16.mxu1 %v6709_v11  ;;  %v7256_v16 = vld [vmem:[%s8979_s3 + $0x84] ss:$16 sps:$4 sm:$0xff]   ;;  %v7264_v18 = vld [vmem:[%s8979_s3 + $0x80] ss:$16 sps:$4 sm:$0xff]   ;;  %v7342_v32 = vld [vmem:[%s8979_s3 + $0x2c] ss:$16 sps:$4 sm:$0xff]  }
   0x9   :  { %530 = vmatprep.subr.bf16.mxu0 %v7231_v12  ;;  %v7274_v20 = vld [vmem:[%s8979_s3 + $0xa4] ss:$16 sps:$4 sm:$0xff]   ;;  %v7283_v22 = vld [vmem:[%s8979_s3 + $0xa0] ss:$16 sps:$4 sm:$0xff]   ;;  %v7349_v33 = vld [vmem:[%s8979_s3 + $0x28] ss:$16 sps:$4 sm:$0xff]  }
   0xa   :  { %5838 = vmatmul.mubr.msk.bf16.vlgmr.msra.gmra.mrb[0].mxu1 %vm133_vm0, %v6706_v9  ;;  %v7290_v23 = vld [vmem:[%s8979_s3 + $0xc4] ss:$16 sps:$4 sm:$0xff]   ;;  %v7306_v26 = vld [vmem:[%s8979_s3 + $0xc0] ss:$16 sps:$4 sm:$0xff]   ;;  %v7355_v34 = vld [vmem:[%s8979_s3 + $0x4c] ss:$16 sps:$4 sm:$0xff]  }
   0xb   :  { %220 = vmatpush1.bf16.msra.mxu1 %v6707_v10  ;;  %188 = vmatprep.mubr.bf16.mxu1 %v8990_v1  ;;  %v6723_v25 = vld [vmem:[%s8980_s0 + $0x10] sm:$0xff]   ;;  %v7364_v35 = vld [vmem:[%s8979_s3 + $0x48] ss:$16 sps:$4 sm:$0xff]   ;;  %v7370_v36 = vld [vmem:[%s8979_s3 + $0x6c] ss:$16 sps:$4 sm:$0xff]   ;;  %v8986_v50 = vsub.s32 1, %v7465_v47 }
   0xc   :  { %531 = vmatpush1.bf16.msra.mxu0 %v7236_v13  ;;  %221 = vmatprep.subr.bf16.mxu1 %v6726_v19  ;;  %v7312_v27 = vld [vmem:[%s8979_s3 + $0xe4] ss:$16 sps:$4 sm:$0xff]   ;;  %v7319_v28 = vld [vmem:[%s8979_s3 + $0xe0] ss:$16 sps:$4 sm:$0xff]   ;;  %v7378_v37 = vld [vmem:[%s8979_s3 + $0x68] ss:$16 sps:$4 sm:$0xff]  }
   0xd   :  { %532 = vmatprep.subr.bf16.mxu0 %v7241_v14  ;;  %v7385_v38 = vld [vmem:[%s8979_s3 + $0x8c] ss:$16 sps:$4 sm:$0xff]   ;;  %v7394_v39 = vld [vmem:[%s8979_s3 + $0x88] ss:$16 sps:$4 sm:$0xff]   ;;  %v51_v49 = vld [vmem:[%s8981_s4] sm:$0xf] }
   0xe   :  { %v7400_v40 = vld [vmem:[%s8979_s3 + $0xac] ss:$16 sps:$4 sm:$0xff]   ;;  %v7408_v41 = vld [vmem:[%s8979_s3 + $0xa8] ss:$16 sps:$4 sm:$0xff]   ;;  %v56_v52 = vrot.slane %v51_v49, %v8987_v48  ;;  %v60_v54 = vrot.slane %v51_v49, %v8986_v50 }
   0xf   :  { %222 = vmatpush1.bf16.msra.mxu1 %v6724_v21  ;;  %v7415_v42 = vld [vmem:[%s8979_s3 + $0xcc] ss:$16 sps:$4 sm:$0xff]   ;;  %v7424_v43 = vld [vmem:[%s8979_s3 + $0xc8] ss:$16 sps:$4 sm:$0xff]  }
  0x10   :  { %533 = vmatpush1.bf16.msra.mxu0 %v7249_v15  ;;  %567 = vmatprep.subr.bf16.mxu1 %v7296_v24  ;;  %v7430_v44 = vld [vmem:[%s8979_s3 + $0xec] ss:$16 sps:$4 sm:$0xff]   ;;  %v7441_v45 = vld [vmem:[%s8979_s3 + $0xe8] ss:$16 sps:$4 sm:$0xff]  }
  0x11   :  { %534 = vmatprep.subr.bf16.mxu0 %v7256_v16 }
  0x12   :  { %5839 = vmatmul.mubr.msk.bf16.gmra.mrb[4].mxu1 %vm133_vm0, %v6716_v17 }
  0x13   :  { %198 = vmatprep.mubr.bf16.mxu1 %v8990_v1 }
  0x14   :  { %535 = vmatpush1.bf16.msra.mxu0 %v7264_v18 }
  0x15   :  { %536 = vmatprep.subr.bf16.mxu0 %v7274_v20 }
  0x18   :  { %537 = vmatpush1.bf16.msra.mxu0 %v7283_v22 }
  0x19   :  { %538 = vmatprep.subr.bf16.mxu0 %v7290_v23 }
  0x1a   :  { %5840 = vmatmul.mubr.msk.bf16.gmra.mrb[8].mxu1 %vm133_vm0, %v6723_v25 }
  0x1b   :  { %208 = vmatprep.mubr.bf16.mxu1 %v8990_v1 }
  0x1c   :  { %539 = vmatpush1.bf16.msra.mxu0 %v7306_v26 }
  0x1d   :  { %540 = vmatprep.subr.bf16.mxu0 %v7312_v27 }
  0x20   :  { %541 = vmatpush1.bf16.msra.mxu0 %v7319_v28 }
  0x21   :  { %835 = vmatprep.subr.bf16.mxu0 %v7189_v2 }
  0x22   :  { %5841 = vmatmul.mubr.msk.bf16.gmra.mrb[12].mxu1 %vm133_vm0, %v6733_v29 }
  0x23   :  { %559 = vmatmul.mubr.bf16.vlgmr.msra.gmra.mrb[0].mxu0 %v8988_v30  ;;  %251 = vmatprep.mubr.bf16.mxu1 %v8990_v1 }
  0x24   :  { %836 = vmatpush1.bf16.msra.mxu0 %v7197_v4  ;;  %867 = vmatprep.mubr.bf16.mxu0 %v8990_v1 }
  0x25   :  { %837 = vmatprep.subr.bf16.mxu0 %v7207_v6 }
  0x28   :  { %838 = vmatpush1.bf16.msra.mxu0 %v7215_v8 }
  0x29   :  { %839 = vmatprep.subr.bf16.mxu0 %v7231_v12 }
  0x2a   :  { %5842 = vmatmul.mubr.msk.bf16.vlgmr.msra.gmra.mrb[16].mxu1 %vm133_vm0, %v6706_v9 }
  0x2b   :  { %568 = vmatpush1.bf16.msra.mxu1 %v7337_v31  ;;  %261 = vmatprep.mubr.bf16.mxu1 %v8990_v1 }
  0x2c   :  { %569 = vmatprep.subr.bf16.mxu1 %v7342_v32  ;;  %840 = vmatpush1.bf16.msra.mxu0 %v7236_v13 }
  0x2d   :  { %841 = vmatprep.subr.bf16.mxu0 %v7241_v14 }
  0x2f   :  { %570 = vmatpush1.bf16.msra.mxu1 %v7349_v33 }
  0x30   :  { %571 = vmatprep.subr.bf16.mxu1 %v7355_v34  ;;  %842 = vmatpush1.bf16.msra.mxu0 %v7249_v15 }
  0x31   :  { %843 = vmatprep.subr.bf16.mxu0 %v7256_v16 }
  0x32   :  { %5843 = vmatmul.mubr.msk.bf16.gmra.mrb[20].mxu1 %vm133_vm0, %v6716_v17 }
  0x33   :  { %572 = vmatpush1.bf16.msra.mxu1 %v7364_v35  ;;  %271 = vmatprep.mubr.bf16.mxu1 %v8990_v1 }
  0x34   :  { %573 = vmatprep.subr.bf16.mxu1 %v7370_v36  ;;  %844 = vmatpush1.bf16.msra.mxu0 %v7264_v18 }
  0x35   :  { %845 = vmatprep.subr.bf16.mxu0 %v7274_v20 }
  0x37   :  { %574 = vmatpush1.bf16.msra.mxu1 %v7378_v37 }
  0x38   :  { %575 = vmatprep.subr.bf16.mxu1 %v7385_v38  ;;  %846 = vmatpush1.bf16.msra.mxu0 %v7283_v22 }
  0x39   :  { %847 = vmatprep.subr.bf16.mxu0 %v7290_v23 }
  0x3a   :  { %5844 = vmatmul.mubr.msk.bf16.gmra.mrb[24].mxu1 %vm133_vm0, %v6723_v25 }
  0x3b   :  { %576 = vmatpush1.bf16.msra.mxu1 %v7394_v39  ;;  %281 = vmatprep.mubr.bf16.mxu1 %v8990_v1 }
  0x3c   :  { %577 = vmatprep.subr.bf16.mxu1 %v7400_v40  ;;  %848 = vmatpush1.bf16.msra.mxu0 %v7306_v26 }
  0x3d   :  { %849 = vmatprep.subr.bf16.mxu0 %v7312_v27 }
  0x3f   :  { %578 = vmatpush1.bf16.msra.mxu1 %v7408_v41 }
  0x40   :  { %579 = vmatprep.subr.bf16.mxu1 %v7415_v42  ;;  %850 = vmatpush1.bf16.msra.mxu0 %v7319_v28 }
  0x41   :  { %1145 = vmatprep.subr.bf16.mxu0 %v7189_v2 }
  0x42   :  { %5845 = vmatmul.mubr.msk.bf16.gmra.mrb[28].mxu1 %vm133_vm0, %v6733_v29 }
  0x43   :  { %580 = vmatpush1.bf16.msra.mxu1 %v7424_v43  ;;  %599 = vmatprep.mubr.bf16.mxu1 %v8990_v1 }
  0x44   :  { %581 = vmatprep.subr.bf16.mxu1 %v7430_v44 }
  0x47   :  { %582 = vmatpush1.bf16.msra.mxu1 %v7441_v45 }
  0x48   :  { %876 = vmatprep.subr.bf16.mxu1 %v7296_v24 }
  0x4a   :  { %600 = vmatmul.mubr.bf16.vlgmr.msra.gmra.mrb[32].mxu1 %v8988_v30 }
  0x4b   :  { %877 = vmatpush1.bf16.msra.mxu1 %v7337_v31  ;;  %908 = vmatprep.mubr.bf16.mxu1 %v8990_v1 }
  0x4c   :  { %878 = vmatprep.subr.bf16.mxu1 %v7342_v32 }
  0x4f   :  { %879 = vmatpush1.bf16.msra.mxu1 %v7349_v33 }
  0x50   :  { %880 = vmatprep.subr.bf16.mxu1 %v7355_v34 }
  0x53   :  { %881 = vmatpush1.bf16.msra.mxu1 %v7364_v35 }
  0x54   :  { %882 = vmatprep.subr.bf16.mxu1 %v7370_v36 }
  0x57   :  { %883 = vmatpush1.bf16.msra.mxu1 %v7378_v37 }
  0x58   :  { %884 = vmatprep.subr.bf16.mxu1 %v7385_v38 }
  0x5b   :  { %885 = vmatpush1.bf16.msra.mxu1 %v7394_v39 }
  0x5c   :  { %886 = vmatprep.subr.bf16.mxu1 %v7400_v40 }
  0x5f   :  { %887 = vmatpush1.bf16.msra.mxu1 %v7408_v41 }
  0x60   :  { %888 = vmatprep.subr.bf16.mxu1 %v7415_v42 }
  0x63   :  { %889 = vmatpush1.bf16.msra.mxu1 %v7424_v43 }
  0x64   :  { %890 = vmatprep.subr.bf16.mxu1 %v7430_v44 }
  0x67   :  { %891 = vmatpush1.bf16.msra.mxu1 %v7441_v45 }
  0x68   :  { %1186 = vmatprep.subr.bf16.mxu1 %v7296_v24 }
  0xdd   :  { %v180_v51 = vpop.f32.mrb[0].mxu1 }
  0xde   :  { %v182_v53 = vpop.f32.mrb[1].mxu1  ;;  %v181_v25 = vadd.f32 %v180_v51, %v56_v52  ;;  %v8992_v51 = vsub.s32 2, %v7465_v47 }
  0xdf   :  { %v184_v55 = vpop.f32.mrb[2].mxu1  ;;  %v183_v29 = vadd.f32 %v182_v53, %v60_v54  ;;  %v8995_v53 = vsub.s32 3, %v7465_v47 }
  0xe0   :  { %v7476_v56 = vadd.f32 %v184_v55, %v56_v52  ;;  %v186_v57 = vpop.f32.mrb[3].mxu1 }
  0xe1   :  { %v7478_v58 = vadd.f32 %v186_v57, %v60_v54 }
  0xe5   :  { %v190_v59 = vpop.f32.mrb[4].mxu1 }
  0xe6   :  { %v7480_v60 = vadd.f32 %v190_v59, %v56_v52  ;;  %v192_v61 = vpop.f32.mrb[5].mxu1 }
  0xe7   :  { %v7482_v62 = vadd.f32 %v192_v61, %v60_v54  ;;  %v194_v63 = vpop.f32.mrb[6].mxu1 }
  0xe8   :  { %v7484_v0 = vadd.f32 %v194_v63, %v56_v52  ;;  %v196_v2 = vpop.f32.mrb[7].mxu1 }
  0xe9   :  { %v7486_v3 = vadd.f32 %v196_v2, %v60_v54 }
  0xed   :  { %v200_v5 = vpop.f32.mrb[8].mxu1 }
  0xee   :  { %v7488_v7 = vadd.f32 %v200_v5, %v56_v52  ;;  %v202_v9 = vpop.f32.mrb[9].mxu1 }
  0xef   :  { %v7490_v10 = vadd.f32 %v202_v9, %v60_v54  ;;  %v204_v11 = vpop.f32.mrb[10].mxu1 }
  0xf0   :  { %8998 = vst [vmem:[#allocation7_spill] sm:$0xff] %v7488_v7  ;;  %v7492_v17 = vadd.f32 %v204_v11, %v56_v52  ;;  %v206_v19 = vpop.f32.mrb[11].mxu1 }
  0xf1   :  { %8999 = vst [vmem:[#allocation8_spill] sm:$0xff] %v7490_v10  ;;  %v7494_v21 = vadd.f32 %v206_v19, %v60_v54 }
  0xf2   :  { %9000 = vst [vmem:[#allocation9_spill] sm:$0xff] %v7492_v17 }
  0xf3   :  { %9001 = vst [vmem:[#allocation10_spill] sm:$0xff] %v7494_v21 }
  0xf5   :  { %v210_v46 = vpop.f32.mrb[12].mxu1 }
  0xf6   :  { %v560_v55 = vpop.f32.mrb[0].mxu0  ;;  %v7496_v57 = vadd.f32 %v210_v46, %v56_v52  ;;  %v212_v61 = vpop.f32.mrb[13].mxu1 }
  0xf7   :  { %v608_v59 = vadd.f32 %v560_v55, %v181_v25  ;;  %v562_v63 = vpop.f32.mrb[1].mxu0  ;;  %v7498_v2 = vadd.f32 %v212_v61, %v60_v54  ;;  %v214_v9 = vpop.f32.mrb[14].mxu1  ;;  %v64_v25 = vrot.slane %v51_v49, %v8992_v51 }
  0xf8   :  { %9002 = vst [vmem:[#allocation11_spill] sm:$0xff] %v7496_v57  ;;  %v609_v5 = vadd.f32 %v562_v63, %v183_v29  ;;  %v564_v50 = vpop.f32.mrb[2].mxu0  ;;  %v7500_v48 = vadd.f32 %v214_v9, %v56_v52  ;;  %v216_v11 = vpop.f32.mrb[15].mxu1  ;;  %v68_v29 = vrot.slane %v51_v49, %v8995_v53 }
  0xf9   :  { %9003 = vst [vmem:[#allocation12_spill] sm:$0xff] %v7498_v2  ;;  %v565_v30 = vpop.f32.mrb[3].mxu0  ;;  %v7502_v19 = vadd.f32 %v216_v11, %v60_v54  ;;  %v612_v21 = vmul.f32 0.5, %v608_v59 }
  0xfa   :  { %9004 = vst [vmem:[#allocation13_spill] sm:$0xff] %v7500_v48 }
  0xfb   :  { %9005 = vst [vmem:[#allocation14_spill] sm:$0xff] %v7502_v19 }
  0xfd   :  { %v253_v46 = vpop.f32.mrb[16].mxu1 }
  0xfe   :  { %v255_v55 = vpop.f32.mrb[17].mxu1 }
  0xff   :  { %v257_v61 = vpop.f32.mrb[18].mxu1 }
 0x100   :  { %v7510_v50 = vadd.f32 %v257_v61, %v64_v25  ;;  %v259_v52 = vpop.f32.mrb[19].mxu1 }
 0x101   :  { %v7512_v63 = vadd.f32 %v259_v52, %v68_v29 }
 0x105   :  { %v263_v30 = vpop.f32.mrb[20].mxu1 }
 0x106   :  { %v7514_v54 = vadd.f32 %v263_v30, %v64_v25  ;;  %v265_v9 = vpop.f32.mrb[21].mxu1 }
 0x107   :  { %v7516_v11 = vadd.f32 %v265_v9, %v68_v29  ;;  %v267_v1 = vpop.f32.mrb[22].mxu1  ;;  %v616_v9 = vmul.f32 0.5, %v609_v5 }
 0x108   :  { %v7518_v19 = vadd.f32 %v267_v1, %v64_v25  ;;  %v269_v51 = vpop.f32.mrb[23].mxu1 }
 0x109   :  { %v7520_v48 = vadd.f32 %v269_v51, %v68_v29  ;;  %6979 = vtanh.f32 %v616_v9 }
 0x10a   :  { %6981 = vtanh.f32 %v612_v21 }
 0x10b   :  { %9006 = vst [vmem:[#allocation15_spill] sm:$0xff] %v7520_v48 }
 0x10d   :  { %v273_v47 = vpop.f32.mrb[24].mxu1 }
 0x10e   :  { %v7522_v49 = vadd.f32 %v273_v47, %v64_v25  ;;  %v275_v61 = vpop.f32.mrb[25].mxu1 }
 0x10f   :  { %v7524_v53 = vadd.f32 %v275_v61, %v68_v29  ;;  %v277_v52 = vpop.f32.mrb[26].mxu1 }
 0x110   :  { %9007 = vst [vmem:[#allocation16_spill] sm:$0xff] %v7522_v49  ;;  %v7526_v2 = vadd.f32 %v277_v52, %v64_v25  ;;  %v279_v30 = vpop.f32.mrb[27].mxu1  ;;  %v254_v52 = vadd.f32 %v253_v46, %v64_v25 }
 0x111   :  { %9008 = vst [vmem:[#allocation17_spill] sm:$0xff] %v7524_v53  ;;  %v7528_v57 = vadd.f32 %v279_v30, %v68_v29 }
 0x112   :  { %9009 = vst [vmem:[#allocation18_spill] sm:$0xff] %v7526_v2  ;;  %v256_v2 = vadd.f32 %v255_v55, %v68_v29 }
 0x113   :  { %9010 = vst [vmem:[#allocation19_spill] sm:$0xff] %v7528_v57  ;;  %v6980_v9 = vpop.eup %6979 }
 0x115   :  { %v283_v17 = vpop.f32.mrb[28].mxu1 }
 0x116   :  { %v7530_v1 = vadd.f32 %v283_v17, %v64_v25  ;;  %v285_v51 = vpop.f32.mrb[29].mxu1 }
 0x117   :  { %v7532_v10 = vadd.f32 %v285_v51, %v68_v29  ;;  %v287_v47 = vpop.f32.mrb[30].mxu1  ;;  %v618_v51 = vmul.f32 0.5, %v6980_v9 }
 0x118   :  { %9011 = vst [vmem:[#allocation20_spill] sm:$0xff] %v7530_v1  ;;  %v7534_v49 = vadd.f32 %v287_v47, %v64_v25  ;;  %v289_v61 = vpop.f32.mrb[31].mxu1  ;;  %v6982_v1 = vpop.eup %6981 }
 0x119   :  { %9012 = vst [vmem:[#allocation21_spill] sm:$0xff] %v7532_v10  ;;  %v7536_v53 = vadd.f32 %v289_v61, %v68_v29  ;;  %v614_v48 = vmul.f32 0.5, %v6982_v1  ;;  %v619_v21 = vadd.f32 0.5, %v618_v51 }
 0x11a   :  { %9013 = vst [vmem:[#allocation22_spill] sm:$0xff] %v7534_v49 }
 0x11b   :  { %9014 = vst [vmem:[#allocation23_spill] sm:$0xff] %v7536_v53  ;;  %v615_v47 = vadd.f32 0.5, %v614_v48  ;;  %v625_v61 = vmul.f32 0.0, %v619_v21  ;;  %v9015_v48 = vmov 0  }
 0x11d   :  { %v601_v30 = vpop.f32.mrb[32].mxu1 }
 0x11e   :  { %v610_v57 = vadd.f32 %v601_v30, %v254_v52  ;;  %v603_v5 = vpop.f32.mrb[33].mxu1 }
 0x11f   :  { %v611_v59 = vadd.f32 %v603_v5, %v256_v2  ;;  %v605_v7 = vpop.f32.mrb[34].mxu1 }
 0x120   :  { %6983 = vtanh.f32 %v610_v57  ;;  %v606_v17 = vpop.f32.mrb[35].mxu1 }
 0x121   :  { %v621_v10 = vmul.f32 0.5, %v611_v59 }
 0x123   :  { %6985 = vtanh.f32 %v621_v10 }
 0x12a   :  { %v6984_v49 = vpop.eup %6983 }
 0x12b   :  { %v626_v53 = vmul.f32 %v6984_v49, %v615_v47 }
 0x12d   :  { %v7538_v46 = vadd.f32 %v626_v53, %v625_v61  ;;  %v6986_v25 = vpop.eup %6985 }
 0x12e   :  { %v623_v2 = vmul.f32 0.5, %v6986_v25 }
 0x12f   :  { %6987 = vtanh.f32 %v7538_v46 }
 0x130   :  { %v624_v7 = vadd.f32 0.5, %v623_v2 }
 0x139   :  { %v6988_v55 = vpop.eup %6987 }
 0x13a   :  { %v7541_v57 = vmul.f32 %v6988_v55, %v624_v7 }
 0x13c   :  { %v642_v29 = vpack.c.bf16 %v7541_v57, %v7541_v57 }
 0x13e   :  { %868 = vmatmul.mubr.bf16.vlgmr.msra.gmra.mrb[4].mxu0 %v642_v29  ;;  %909 = vmatmul.mubr.bf16.vlgmr.msra.gmra.mrb[36].mxu1 %v642_v29 }
 0x13f   :  { %1146 = vmatpush1.bf16.msra.mxu0 %v7197_v4  ;;  %1187 = vmatpush1.bf16.msra.mxu1 %v7337_v31 }
 0x140   :  { %1147 = vmatprep.subr.bf16.mxu0 %v7207_v6  ;;  %1188 = vmatprep.subr.bf16.mxu1 %v7342_v32 }
 0x141   :  { %1177 = vmatprep.mubr.bf16.mxu0 %v9015_v48  ;;  %1218 = vmatprep.mubr.bf16.mxu1 %v9015_v48 }
 0x143   :  { %1148 = vmatpush1.bf16.msra.mxu0 %v7215_v8  ;;  %1189 = vmatpush1.bf16.msra.mxu1 %v7349_v33 }
 0x144   :  { %1149 = vmatprep.subr.bf16.mxu0 %v7231_v12  ;;  %1190 = vmatprep.subr.bf16.mxu1 %v7355_v34 }
 0x147   :  { %1150 = vmatpush1.bf16.msra.mxu0 %v7236_v13  ;;  %1191 = vmatpush1.bf16.msra.mxu1 %v7364_v35 }
 0x148   :  { %1151 = vmatprep.subr.bf16.mxu0 %v7241_v14  ;;  %1192 = vmatprep.subr.bf16.mxu1 %v7370_v36 }
 0x14b   :  { %1152 = vmatpush1.bf16.msra.mxu0 %v7249_v15  ;;  %1193 = vmatpush1.bf16.msra.mxu1 %v7378_v37 }
 0x14c   :  { %1153 = vmatprep.subr.bf16.mxu0 %v7256_v16  ;;  %1194 = vmatprep.subr.bf16.mxu1 %v7385_v38 }
 0x14f   :  { %1154 = vmatpush1.bf16.msra.mxu0 %v7264_v18  ;;  %1195 = vmatpush1.bf16.msra.mxu1 %v7394_v39 }
 0x150   :  { %1155 = vmatprep.subr.bf16.mxu0 %v7274_v20  ;;  %1196 = vmatprep.subr.bf16.mxu1 %v7400_v40 }
 0x153   :  { %1156 = vmatpush1.bf16.msra.mxu0 %v7283_v22  ;;  %1197 = vmatpush1.bf16.msra.mxu1 %v7408_v41 }
 0x154   :  { %1157 = vmatprep.subr.bf16.mxu0 %v7290_v23  ;;  %1198 = vmatprep.subr.bf16.mxu1 %v7415_v42 }
 0x157   :  { %1158 = vmatpush1.bf16.msra.mxu0 %v7306_v26  ;;  %1199 = vmatpush1.bf16.msra.mxu1 %v7424_v43 }
 0x158   :  { %1159 = vmatprep.subr.bf16.mxu0 %v7312_v27  ;;  %1200 = vmatprep.subr.bf16.mxu1 %v7430_v44 }
 0x15b   :  { %1160 = vmatpush1.bf16.msra.mxu0 %v7319_v28  ;;  %1201 = vmatpush1.bf16.msra.mxu1 %v7441_v45 }
 0x15c   :  { %1496 = vmatprep.subr.bf16.mxu1 %v7296_v24 }
 0x211   :  { %v869_v4 = vpop.f32.mrb[4].mxu0  ;;  %v910_v6 = vpop.f32.mrb[36].mxu1 }
 0x212   :  { %v917_v8 = vadd.f32 %v869_v4, %v7476_v56  ;;  %v919_v14 = vadd.f32 %v910_v6, %v7510_v50  ;;  %v871_v15 = vpop.f32.mrb[5].mxu0  ;;  %v912_v16 = vpop.f32.mrb[37].mxu1 }
 0x213   :  { %v918_v18 = vadd.f32 %v871_v15, %v7478_v58  ;;  %v920_v20 = vadd.f32 %v912_v16, %v7512_v63  ;;  %v873_v22 = vpop.f32.mrb[6].mxu0  ;;  %v914_v23 = vpop.f32.mrb[38].mxu1 }
 0x214   :  { %v921_v26 = vmul.f32 0.5, %v917_v8  ;;  %v874_v27 = vpop.f32.mrb[7].mxu0  ;;  %v915_v28 = vpop.f32.mrb[39].mxu1 }
 0x215   :  { %v925_v10 = vmul.f32 0.5, %v918_v18  ;;  %v930_v24 = vmul.f32 0.5, %v920_v20 }
 0x216   :  { %6989 = vtanh.f32 %v921_v26 }
 0x217   :  { %6991 = vtanh.f32 %v925_v10 }
 0x218   :  { %6993 = vtanh.f32 %v919_v14 }
 0x219   :  { %6995 = vtanh.f32 %v930_v24 }
 0x220   :  { %v6990_v53 = vpop.eup %6989 }
 0x221   :  { %v6992_v56 = vpop.eup %6991  ;;  %v923_v49 = vmul.f32 0.5, %v6990_v53 }
 0x222   :  { %v927_v50 = vmul.f32 0.5, %v6992_v56  ;;  %v6994_v52 = vpop.eup %6993 }
 0x223   :  { %v924_v1 = vadd.f32 0.5, %v923_v49  ;;  %v6996_v59 = vpop.eup %6995  ;;  %v7714_v49 = vld [vmem:[%s8979_s3 + $0xc] ss:$16 sps:$4 sm:$0xff]  }
 0x224   :  { %v928_v58 = vadd.f32 0.5, %v927_v50  ;;  %v932_v9 = vmul.f32 0.5, %v6996_v59  ;;  %v7719_v50 = vld [vmem:[%s8979_s3 + $0x8] ss:$16 sps:$4 sm:$0xff]   ;;  %v7763_v59 = vld [vmem:[%s8979_s3 + $0x6c] ss:$16 sps:$4 sm:$0xff]  }
 0x225   :  { %v935_v30 = vmul.f32 %v6994_v52, %v924_v1  ;;  %v7726_v1 = vld [vmem:[%s8979_s3 + $0x2c] ss:$16 sps:$4 sm:$0xff]   ;;  %v7731_v52 = vld [vmem:[%s8979_s3 + $0x28] ss:$16 sps:$4 sm:$0xff]  }
 0x226   :  { %v934_v63 = vmul.f32 %v928_v58, %v7538_v46  ;;  %v933_v17 = vadd.f32 0.5, %v932_v9  ;;  %v7738_v58 = vld [vmem:[%s8979_s3 + $0x44] ss:$16 sps:$4 sm:$0xff]   ;;  %v7768_v9 = vld [vmem:[%s8979_s3 + $0x68] ss:$16 sps:$4 sm:$0xff]  }
 0x228   :  { %v7583_v5 = vadd.f32 %v935_v30, %v934_v63  ;;  %v7743_v30 = vld [vmem:[%s8979_s3 + $0x4c] ss:$16 sps:$4 sm:$0xff]   ;;  %v7748_v63 = vld [vmem:[%s8979_s3 + $0x40] ss:$16 sps:$4 sm:$0xff]  }
 0x22a   :  { %6997 = vtanh.f32 %v7583_v5 }
 0x234   :  { %v6998_v51 = vpop.eup %6997 }
 0x235   :  { %v7586_v21 = vmul.f32 %v6998_v51, %v933_v17  ;;  %v7777_v17 = vld [vmem:[%s8979_s3 + $0x8c] ss:$16 sps:$4 sm:$0xff]   ;;  %v7782_v51 = vld [vmem:[%s8979_s3 + $0x88] ss:$16 sps:$4 sm:$0xff]  }
 0x237   :  { %v952_v47 = vpack.c.bf16 %v7586_v21, %v7586_v21 }
 0x239   :  { %1178 = vmatmul.mubr.bf16.vlgmr.msra.gmra.mrb[8].mxu0 %v952_v47  ;;  %1219 = vmatmul.mubr.bf16.vlgmr.msra.gmra.mrb[40].mxu1 %v952_v47  ;;  %v7791_v47 = vld [vmem:[%s8979_s3 + $0xac] ss:$16 sps:$4 sm:$0xff]  }
 0x23a   :  { %1497 = vmatpush1.bf16.msra.mxu1 %v7337_v31  ;;  %1487 = vmatprep.mubr.bf16.mxu0 %v9015_v48  ;;  %v7610_v31 = vld [vmem:[%s8979_s3 + $0x4] ss:$16 sps:$4 sm:$0xff]  }
 0x23b   :  { %1498 = vmatprep.subr.bf16.mxu1 %v7342_v32  ;;  %1528 = vmatprep.mubr.bf16.mxu1 %v9015_v48  ;;  %v7615_v32 = vld [vmem:[%s8979_s3] ss:$16 sps:$4 sm:$0xff]  }
 0x23c   :  { %1455 = vmatprep.subr.bf16.mxu0 %v7610_v31 }
 0x23d   :  { %1456 = vmatpush1.bf16.msra.mxu0 %v7615_v32 }
 0x23e   :  { %1499 = vmatpush1.bf16.msra.mxu1 %v7349_v33  ;;  %v7622_v33 = vld [vmem:[%s8979_s3 + $0x24] ss:$16 sps:$4 sm:$0xff]  }
 0x23f   :  { %1500 = vmatprep.subr.bf16.mxu1 %v7355_v34  ;;  %v7627_v34 = vld [vmem:[%s8979_s3 + $0x20] ss:$16 sps:$4 sm:$0xff]   ;;  %1457 = vmatprep.subr.bf16.mxu0 %v7622_v33 }
 0x241   :  { %1458 = vmatpush1.bf16.msra.mxu0 %v7627_v34 }
 0x242   :  { %1501 = vmatpush1.bf16.msra.mxu1 %v7364_v35  ;;  %1459 = vmatprep.subr.bf16.mxu0 %v7231_v12  ;;  %v7636_v35 = vld [vmem:[%s8979_s3 + $0x64] ss:$16 sps:$4 sm:$0xff]  }
 0x243   :  { %1502 = vmatprep.subr.bf16.mxu1 %v7370_v36  ;;  %v7641_v36 = vld [vmem:[%s8979_s3 + $0x60] ss:$16 sps:$4 sm:$0xff]   ;;  %v7648_v12 = vld [vmem:[%s8979_s3 + $0x84] ss:$16 sps:$4 sm:$0xff]  }
 0x245   :  { %1460 = vmatpush1.bf16.msra.mxu0 %v7236_v13  ;;  %v7653_v13 = vld [vmem:[%s8979_s3 + $0x80] ss:$16 sps:$4 sm:$0xff]  }
 0x246   :  { %1503 = vmatpush1.bf16.msra.mxu1 %v7378_v37  ;;  %1461 = vmatprep.subr.bf16.mxu0 %v7636_v35  ;;  %v7660_v37 = vld [vmem:[%s8979_s3 + $0xa4] ss:$16 sps:$4 sm:$0xff]  }
 0x247   :  { %1504 = vmatprep.subr.bf16.mxu1 %v7385_v38  ;;  %v7665_v38 = vld [vmem:[%s8979_s3 + $0xa0] ss:$16 sps:$4 sm:$0xff]  }
 0x249   :  { %1462 = vmatpush1.bf16.msra.mxu0 %v7641_v36 }
 0x24a   :  { %1505 = vmatpush1.bf16.msra.mxu1 %v7394_v39  ;;  %1463 = vmatprep.subr.bf16.mxu0 %v7648_v12  ;;  %v7672_v39 = vld [vmem:[%s8979_s3 + $0xc4] ss:$16 sps:$4 sm:$0xff]  }
 0x24b   :  { %1506 = vmatprep.subr.bf16.mxu1 %v7400_v40  ;;  %v7677_v40 = vld [vmem:[%s8979_s3 + $0xc0] ss:$16 sps:$4 sm:$0xff]  }
 0x24d   :  { %1464 = vmatpush1.bf16.msra.mxu0 %v7653_v13 }
 0x24e   :  { %1507 = vmatpush1.bf16.msra.mxu1 %v7408_v41  ;;  %1465 = vmatprep.subr.bf16.mxu0 %v7660_v37  ;;  %v7684_v41 = vld [vmem:[%s8979_s3 + $0xe4] ss:$16 sps:$4 sm:$0xff]  }
 0x24f   :  { %1508 = vmatprep.subr.bf16.mxu1 %v7415_v42  ;;  %v7689_v42 = vld [vmem:[%s8979_s3 + $0xe0] ss:$16 sps:$4 sm:$0xff]  }
 0x251   :  { %1466 = vmatpush1.bf16.msra.mxu0 %v7665_v38 }
 0x252   :  { %1509 = vmatpush1.bf16.msra.mxu1 %v7424_v43  ;;  %1467 = vmatprep.subr.bf16.mxu0 %v7672_v39 }
 0x253   :  { %1510 = vmatprep.subr.bf16.mxu1 %v7430_v44 }
 0x255   :  { %1468 = vmatpush1.bf16.msra.mxu0 %v7677_v40 }
 0x256   :  { %1511 = vmatpush1.bf16.msra.mxu1 %v7441_v45  ;;  %1469 = vmatprep.subr.bf16.mxu0 %v7684_v41 }
 0x257   :  { %1806 = vmatprep.subr.bf16.mxu1 %v7714_v49 }
 0x259   :  { %1470 = vmatpush1.bf16.msra.mxu0 %v7689_v42 }
 0x25a   :  { %1765 = vmatprep.subr.bf16.mxu0 %v7610_v31 }
 0x30c   :  { %v1179_v43 = vpop.f32.mrb[8].mxu0  ;;  %v1220_v44 = vpop.f32.mrb[40].mxu1 }
 0x30d   :  { %v1227_v45 = vadd.f32 %v1179_v43, %v7480_v60  ;;  %v1229_v61 = vadd.f32 %v1220_v44, %v7514_v54  ;;  %v1181_v46 = vpop.f32.mrb[9].mxu0  ;;  %v1222_v25 = vpop.f32.mrb[41].mxu1  ;;  %v7796_v43 = vld [vmem:[%s8979_s3 + $0xa8] ss:$16 sps:$4 sm:$0xff]   ;;  %v7805_v44 = vld [vmem:[%s8979_s3 + $0xcc] ss:$16 sps:$4 sm:$0xff]  }
 0x30e   :  { %v1228_v2 = vadd.f32 %v1181_v46, %v7482_v62  ;;  %v1230_v7 = vadd.f32 %v1222_v25, %v7516_v11  ;;  %v1183_v55 = vpop.f32.mrb[10].mxu0  ;;  %v1224_v29 = vpop.f32.mrb[42].mxu1  ;;  %v7824_v46 = vld [vmem:[%s8979_s3 + $0xe8] ss:$16 sps:$4 sm:$0xff]  }
 0x30f   :  { %v1231_v4 = vmul.f32 0.5, %v1227_v45  ;;  %v1184_v6 = vpop.f32.mrb[11].mxu0  ;;  %v1225_v8 = vpop.f32.mrb[43].mxu1  ;;  %v7810_v45 = vld [vmem:[%s8979_s3 + $0xc8] ss:$16 sps:$4 sm:$0xff]  }
 0x310   :  { %v1235_v14 = vmul.f32 0.5, %v1228_v2  ;;  %v1240_v15 = vmul.f32 0.5, %v1230_v7  ;;  %v9016_v8 = vld [vmem:[#allocation15_spill] sm:$0xff] }
 0x311   :  { %6999 = vtanh.f32 %v1231_v4 }
 0x312   :  { %7001 = vtanh.f32 %v1235_v14 }
 0x313   :  { %7003 = vtanh.f32 %v1229_v61  ;;  %v7819_v61 = vld [vmem:[%s8979_s3 + $0xec] ss:$16 sps:$4 sm:$0xff]  }
 0x314   :  { %7005 = vtanh.f32 %v1240_v15 }
 0x31b   :  { %v7000_v16 = vpop.eup %6999 }
 0x31c   :  { %v7002_v60 = vpop.eup %7001  ;;  %v1233_v18 = vmul.f32 0.5, %v7000_v16 }
 0x31d   :  { %v1237_v54 = vmul.f32 0.5, %v7002_v60  ;;  %v7004_v22 = vpop.eup %7003 }
 0x31e   :  { %v1234_v20 = vadd.f32 0.5, %v1233_v18  ;;  %v7006_v27 = vpop.eup %7005 }
 0x31f   :  { %v1238_v62 = vadd.f32 0.5, %v1237_v54  ;;  %v1242_v28 = vmul.f32 0.5, %v7006_v27 }
 0x320   :  { %v1245_v23 = vmul.f32 %v7004_v22, %v1234_v20 }
 0x321   :  { %v1244_v11 = vmul.f32 %v1238_v62, %v7583_v5  ;;  %v1243_v10 = vadd.f32 0.5, %v1242_v28  ;;  %v7753_v5 = vld [vmem:[%s8979_s3 + $0x48] ss:$16 sps:$4 sm:$0xff]  }
 0x323   :  { %v7699_v26 = vadd.f32 %v1245_v23, %v1244_v11 }
 0x325   :  { %7007 = vtanh.f32 %v7699_v26 }
 0x32f   :  { %v7008_v24 = vpop.eup %7007 }
 0x330   :  { %v7702_v53 = vmul.f32 %v7008_v24, %v1243_v10 }
 0x332   :  { %v1262_v56 = vpack.c.bf16 %v7702_v53, %v7702_v53 }
 0x334   :  { %1488 = vmatmul.mubr.bf16.vlgmr.msra.gmra.mrb[12].mxu0 %v1262_v56  ;;  %1529 = vmatmul.mubr.bf16.vlgmr.msra.gmra.mrb[44].mxu1 %v1262_v56 }
 0x335   :  { %1766 = vmatpush1.bf16.msra.mxu0 %v7615_v32  ;;  %1797 = vmatprep.mubr.bf16.mxu0 %v9015_v48 }
 0x336   :  { %1767 = vmatprep.subr.bf16.mxu0 %v7622_v33  ;;  %1838 = vmatprep.mubr.bf16.mxu1 %v9015_v48 }
 0x337   :  { %1807 = vmatpush1.bf16.msra.mxu1 %v7719_v50 }
 0x338   :  { %1808 = vmatprep.subr.bf16.mxu1 %v7726_v1 }
 0x339   :  { %1768 = vmatpush1.bf16.msra.mxu0 %v7627_v34 }
 0x33a   :  { %1769 = vmatprep.subr.bf16.mxu0 %v7738_v58 }
 0x33b   :  { %1809 = vmatpush1.bf16.msra.mxu1 %v7731_v52 }
 0x33c   :  { %1810 = vmatprep.subr.bf16.mxu1 %v7743_v30 }
 0x33d   :  { %1770 = vmatpush1.bf16.msra.mxu0 %v7748_v63 }
 0x33e   :  { %1771 = vmatprep.subr.bf16.mxu0 %v7636_v35 }
 0x33f   :  { %1811 = vmatpush1.bf16.msra.mxu1 %v7753_v5 }
 0x340   :  { %1812 = vmatprep.subr.bf16.mxu1 %v7763_v59 }
 0x341   :  { %1772 = vmatpush1.bf16.msra.mxu0 %v7641_v36 }
 0x342   :  { %1773 = vmatprep.subr.bf16.mxu0 %v7648_v12 }
 0x343   :  { %1813 = vmatpush1.bf16.msra.mxu1 %v7768_v9 }
 0x344   :  { %1814 = vmatprep.subr.bf16.mxu1 %v7777_v17 }
 0x345   :  { %1774 = vmatpush1.bf16.msra.mxu0 %v7653_v13 }
 0x346   :  { %1775 = vmatprep.subr.bf16.mxu0 %v7660_v37 }
 0x347   :  { %1815 = vmatpush1.bf16.msra.mxu1 %v7782_v51 }
 0x348   :  { %1816 = vmatprep.subr.bf16.mxu1 %v7791_v47 }
 0x349   :  { %1776 = vmatpush1.bf16.msra.mxu0 %v7665_v38 }
 0x34a   :  { %1777 = vmatprep.subr.bf16.mxu0 %v7672_v39 }
 0x34b   :  { %1817 = vmatpush1.bf16.msra.mxu1 %v7796_v43 }
 0x34c   :  { %1818 = vmatprep.subr.bf16.mxu1 %v7805_v44 }
 0x34d   :  { %1778 = vmatpush1.bf16.msra.mxu0 %v7677_v40 }
 0x34e   :  { %1779 = vmatprep.subr.bf16.mxu0 %v7684_v41 }
 0x34f   :  { %1819 = vmatpush1.bf16.msra.mxu1 %v7810_v45 }
 0x350   :  { %1820 = vmatprep.subr.bf16.mxu1 %v7819_v61 }
 0x351   :  { %1780 = vmatpush1.bf16.msra.mxu0 %v7689_v42 }
 0x352   :  { %2075 = vmatprep.subr.bf16.mxu0 %v7610_v31 }
 0x353   :  { %1821 = vmatpush1.bf16.msra.mxu1 %v7824_v46 }
 0x354   :  { %2116 = vmatprep.subr.bf16.mxu1 %v7714_v49 }
 0x407   :  { %v1489_v25 = vpop.f32.mrb[12].mxu0  ;;  %v1530_v2 = vpop.f32.mrb[44].mxu1 }
 0x408   :  { %v1537_v7 = vadd.f32 %v1489_v25, %v7484_v0  ;;  %v1539_v55 = vadd.f32 %v1530_v2, %v7518_v19  ;;  %v1491_v29 = vpop.f32.mrb[13].mxu0  ;;  %v1532_v4 = vpop.f32.mrb[45].mxu1 }
 0x409   :  { %v1538_v6 = vadd.f32 %v1491_v29, %v7486_v3  ;;  %v1540_v14 = vadd.f32 %v1532_v4, %v9016_v8  ;;  %v1493_v15 = vpop.f32.mrb[14].mxu0  ;;  %v1534_v16 = vpop.f32.mrb[46].mxu1 }
 0x40a   :  { %v1541_v60 = vmul.f32 0.5, %v1537_v7  ;;  %v1494_v18 = vpop.f32.mrb[15].mxu0  ;;  %v1535_v54 = vpop.f32.mrb[47].mxu1 }
 0x40b   :  { %v1545_v20 = vmul.f32 0.5, %v1538_v6  ;;  %v1550_v22 = vmul.f32 0.5, %v1540_v14  ;;  %v9017_v6 = vld [vmem:[#allocation7_spill] sm:$0xff]  ;;  %v9018_v14 = vld [vmem:[#allocation16_spill] sm:$0xff] }
 0x40c   :  { %7009 = vtanh.f32 %v1541_v60  ;;  %v9019_v18 = vld [vmem:[#allocation8_spill] sm:$0xff] }
 0x40d   :  { %7011 = vtanh.f32 %v1545_v20  ;;  %v9020_v20 = vld [vmem:[#allocation17_spill] sm:$0xff] }
 0x40e   :  { %7013 = vtanh.f32 %v1539_v55 }
 0x40f   :  { %7015 = vtanh.f32 %v1550_v22 }
 0x416   :  { %v7010_v62 = vpop.eup %7009 }
 0x417   :  { %v7012_v0 = vpop.eup %7011  ;;  %v1543_v23 = vmul.f32 0.5, %v7010_v62 }
 0x418   :  { %v1547_v19 = vmul.f32 0.5, %v7012_v0  ;;  %v7014_v27 = vpop.eup %7013 }
 0x419   :  { %v1544_v11 = vadd.f32 0.5, %v1543_v23  ;;  %v7016_v56 = vpop.eup %7015 }
 0x41a   :  { %v1548_v3 = vadd.f32 0.5, %v1547_v19  ;;  %v1552_v25 = vmul.f32 0.5, %v7016_v56 }
 0x41b   :  { %v1555_v28 = vmul.f32 %v7014_v27, %v1544_v11 }
 0x41c   :  { %v1554_v10 = vmul.f32 %v1548_v3, %v7699_v26  ;;  %v1553_v2 = vadd.f32 0.5, %v1552_v25 }
 0x41e   :  { %v7836_v24 = vadd.f32 %v1555_v28, %v1554_v10 }
 0x420   :  { %7017 = vtanh.f32 %v7836_v24 }
 0x42a   :  { %v7018_v7 = vpop.eup %7017 }
 0x42b   :  { %v7839_v55 = vmul.f32 %v7018_v7, %v1553_v2 }
 0x42d   :  { %v1572_v29 = vpack.c.bf16 %v7839_v55, %v7839_v55 }
 0x42f   :  { %1798 = vmatmul.mubr.bf16.vlgmr.msra.gmra.mrb[16].mxu0 %v1572_v29  ;;  %1839 = vmatmul.mubr.bf16.vlgmr.msra.gmra.mrb[48].mxu1 %v1572_v29 }
 0x430   :  { %2076 = vmatpush1.bf16.msra.mxu0 %v7615_v32  ;;  %2117 = vmatpush1.bf16.msra.mxu1 %v7719_v50 }
 0x431   :  { %2077 = vmatprep.subr.bf16.mxu0 %v7622_v33  ;;  %2118 = vmatprep.subr.bf16.mxu1 %v7726_v1 }
 0x432   :  { %2107 = vmatprep.mubr.bf16.mxu0 %v9015_v48  ;;  %2148 = vmatprep.mubr.bf16.mxu1 %v9015_v48 }
 0x434   :  { %2078 = vmatpush1.bf16.msra.mxu0 %v7627_v34  ;;  %2119 = vmatpush1.bf16.msra.mxu1 %v7731_v52 }
 0x435   :  { %2079 = vmatprep.subr.bf16.mxu0 %v7738_v58  ;;  %2120 = vmatprep.subr.bf16.mxu1 %v7743_v30 }
 0x438   :  { %2080 = vmatpush1.bf16.msra.mxu0 %v7748_v63  ;;  %2121 = vmatpush1.bf16.msra.mxu1 %v7753_v5 }
 0x439   :  { %2081 = vmatprep.subr.bf16.mxu0 %v7636_v35  ;;  %2122 = vmatprep.subr.bf16.mxu1 %v7763_v59 }
 0x43c   :  { %2082 = vmatpush1.bf16.msra.mxu0 %v7641_v36  ;;  %2123 = vmatpush1.bf16.msra.mxu1 %v7768_v9 }
 0x43d   :  { %2083 = vmatprep.subr.bf16.mxu0 %v7648_v12  ;;  %2124 = vmatprep.subr.bf16.mxu1 %v7777_v17 }
 0x440   :  { %2084 = vmatpush1.bf16.msra.mxu0 %v7653_v13  ;;  %2125 = vmatpush1.bf16.msra.mxu1 %v7782_v51 }
 0x441   :  { %2085 = vmatprep.subr.bf16.mxu0 %v7660_v37  ;;  %2126 = vmatprep.subr.bf16.mxu1 %v7791_v47 }
 0x444   :  { %2086 = vmatpush1.bf16.msra.mxu0 %v7665_v38  ;;  %2127 = vmatpush1.bf16.msra.mxu1 %v7796_v43 }
 0x445   :  { %2087 = vmatprep.subr.bf16.mxu0 %v7672_v39  ;;  %2128 = vmatprep.subr.bf16.mxu1 %v7805_v44 }
 0x448   :  { %2088 = vmatpush1.bf16.msra.mxu0 %v7677_v40  ;;  %2129 = vmatpush1.bf16.msra.mxu1 %v7810_v45 }
 0x449   :  { %2089 = vmatprep.subr.bf16.mxu0 %v7684_v41  ;;  %2130 = vmatprep.subr.bf16.mxu1 %v7819_v61 }
 0x44c   :  { %2090 = vmatpush1.bf16.msra.mxu0 %v7689_v42  ;;  %2131 = vmatpush1.bf16.msra.mxu1 %v7824_v46 }
 0x44d   :  { %2385 = vmatprep.subr.bf16.mxu0 %v7610_v31  ;;  %2426 = vmatprep.subr.bf16.mxu1 %v7714_v49 }
 0x502   :  { %v1799_v26 = vpop.f32.mrb[16].mxu0  ;;  %v1840_v4 = vpop.f32.mrb[48].mxu1 }
 0x503   :  { %v1847_v8 = vadd.f32 %v1799_v26, %v9017_v6  ;;  %v1849_v15 = vadd.f32 %v1840_v4, %v9018_v14  ;;  %v1801_v16 = vpop.f32.mrb[17].mxu0  ;;  %v1842_v60 = vpop.f32.mrb[49].mxu1 }
 0x504   :  { %v1848_v54 = vadd.f32 %v1801_v16, %v9019_v18  ;;  %v1850_v22 = vadd.f32 %v1842_v60, %v9020_v20  ;;  %v1803_v62 = vpop.f32.mrb[18].mxu0  ;;  %v1844_v0 = vpop.f32.mrb[50].mxu1 }
 0x505   :  { %v1851_v23 = vmul.f32 0.5, %v1847_v8  ;;  %v1804_v19 = vpop.f32.mrb[19].mxu0  ;;  %v1845_v11 = vpop.f32.mrb[51].mxu1 }
 0x506   :  { %v1855_v31 = vmul.f32 0.5, %v1848_v54  ;;  %v1860_v27 = vmul.f32 0.5, %v1850_v22 }
 0x507   :  { %7019 = vtanh.f32 %v1851_v23 }
 0x508   :  { %7021 = vtanh.f32 %v1855_v31 }
 0x509   :  { %7023 = vtanh.f32 %v1849_v15 }
 0x50a   :  { %7025 = vtanh.f32 %v1860_v27 }
 0x511   :  { %v7020_v3 = vpop.eup %7019 }
 0x512   :  { %v7022_v28 = vpop.eup %7021  ;;  %v1853_v10 = vmul.f32 0.5, %v7020_v3 }
 0x513   :  { %v1857_v56 = vmul.f32 0.5, %v7022_v28  ;;  %v7024_v2 = vpop.eup %7023 }
 0x514   :  { %v1854_v25 = vadd.f32 0.5, %v1853_v10  ;;  %v7026_v6 = vpop.eup %7025 }
 0x515   :  { %v1858_v7 = vadd.f32 0.5, %v1857_v56  ;;  %v1862_v8 = vmul.f32 0.5, %v7026_v6  ;;  %v9025_v6 = vld [vmem:[#allocation11_spill] sm:$0xff] }
 0x516   :  { %v1865_v29 = vmul.f32 %v7024_v2, %v1854_v25 }
 0x517   :  { %v1864_v26 = vmul.f32 %v1858_v7, %v7836_v24  ;;  %v1863_v14 = vadd.f32 0.5, %v1862_v8 }
 0x519   :  { %v7882_v4 = vadd.f32 %v1865_v29, %v1864_v26 }
 0x51b   :  { %7027 = vtanh.f32 %v7882_v4 }
 0x525   :  { %v7028_v15 = vpop.eup %7027 }
 0x526   :  { %v7885_v16 = vmul.f32 %v7028_v15, %v1863_v14  ;;  %v9026_v14 = vld [vmem:[#allocation20_spill] sm:$0xff] }
 0x528   :  { %v1882_v60 = vpack.c.bf16 %v7885_v16, %v7885_v16 }
 0x52a   :  { %2108 = vmatmul.mubr.bf16.vlgmr.msra.gmra.mrb[20].mxu0 %v1882_v60  ;;  %2149 = vmatmul.mubr.bf16.vlgmr.msra.gmra.mrb[52].mxu1 %v1882_v60 }
 0x52b   :  { %2386 = vmatpush1.bf16.msra.mxu0 %v7615_v32  ;;  %2427 = vmatpush1.bf16.msra.mxu1 %v7719_v50 }
 0x52c   :  { %2387 = vmatprep.subr.bf16.mxu0 %v7622_v33  ;;  %2428 = vmatprep.subr.bf16.mxu1 %v7726_v1 }
 0x52d   :  { %2417 = vmatprep.mubr.bf16.mxu0 %v9015_v48  ;;  %2458 = vmatprep.mubr.bf16.mxu1 %v9015_v48 }
 0x52f   :  { %2388 = vmatpush1.bf16.msra.mxu0 %v7627_v34  ;;  %2429 = vmatpush1.bf16.msra.mxu1 %v7731_v52  ;;  %v9021_v34 = vld [vmem:[#allocation9_spill] sm:$0xff] }
 0x530   :  { %2389 = vmatprep.subr.bf16.mxu0 %v7738_v58  ;;  %2430 = vmatprep.subr.bf16.mxu1 %v7743_v30 }
 0x533   :  { %2390 = vmatpush1.bf16.msra.mxu0 %v7748_v63  ;;  %2431 = vmatpush1.bf16.msra.mxu1 %v7753_v5 }
 0x534   :  { %2391 = vmatprep.subr.bf16.mxu0 %v7636_v35  ;;  %2432 = vmatprep.subr.bf16.mxu1 %v7763_v59 }
 0x537   :  { %2392 = vmatpush1.bf16.msra.mxu0 %v7641_v36  ;;  %2433 = vmatpush1.bf16.msra.mxu1 %v7768_v9  ;;  %v9022_v36 = vld [vmem:[#allocation18_spill] sm:$0xff] }
 0x538   :  { %2393 = vmatprep.subr.bf16.mxu0 %v7648_v12  ;;  %2434 = vmatprep.subr.bf16.mxu1 %v7777_v17 }
 0x53b   :  { %2394 = vmatpush1.bf16.msra.mxu0 %v7653_v13  ;;  %2435 = vmatpush1.bf16.msra.mxu1 %v7782_v51 }
 0x53c   :  { %2395 = vmatprep.subr.bf16.mxu0 %v7660_v37  ;;  %2436 = vmatprep.subr.bf16.mxu1 %v7791_v47 }
 0x53f   :  { %2396 = vmatpush1.bf16.msra.mxu0 %v7665_v38  ;;  %2437 = vmatpush1.bf16.msra.mxu1 %v7796_v43  ;;  %v9023_v38 = vld [vmem:[#allocation10_spill] sm:$0xff] }
 0x540   :  { %2397 = vmatprep.subr.bf16.mxu0 %v7672_v39  ;;  %2438 = vmatprep.subr.bf16.mxu1 %v7805_v44 }
 0x543   :  { %2398 = vmatpush1.bf16.msra.mxu0 %v7677_v40  ;;  %2439 = vmatpush1.bf16.msra.mxu1 %v7810_v45  ;;  %v9024_v40 = vld [vmem:[#allocation19_spill] sm:$0xff] }
 0x544   :  { %2399 = vmatprep.subr.bf16.mxu0 %v7684_v41  ;;  %2440 = vmatprep.subr.bf16.mxu1 %v7819_v61 }
 0x547   :  { %2400 = vmatpush1.bf16.msra.mxu0 %v7689_v42  ;;  %2441 = vmatpush1.bf16.msra.mxu1 %v7824_v46 }
 0x548   :  { %2736 = vmatprep.subr.bf16.mxu1 %v7714_v49 }
 0x5fd   :  { %v2109_v32 = vpop.f32.mrb[20].mxu0  ;;  %v2150_v33 = vpop.f32.mrb[52].mxu1 }
 0x5fe   :  { %v2157_v35 = vadd.f32 %v2109_v32, %v9021_v34  ;;  %v2159_v12 = vadd.f32 %v2150_v33, %v9022_v36  ;;  %v2111_v13 = vpop.f32.mrb[21].mxu0  ;;  %v2152_v37 = vpop.f32.mrb[53].mxu1  ;;  %v9027_v33 = vld [vmem:[#allocation12_spill] sm:$0xff] }
 0x5ff   :  { %v2158_v39 = vadd.f32 %v2111_v13, %v9023_v38  ;;  %v2160_v41 = vadd.f32 %v2152_v37, %v9024_v40  ;;  %v2113_v24 = vpop.f32.mrb[22].mxu0  ;;  %v2154_v18 = vpop.f32.mrb[54].mxu1 }
 0x600   :  { %v2161_v54 = vmul.f32 0.5, %v2157_v35  ;;  %v2114_v42 = vpop.f32.mrb[23].mxu0  ;;  %v2155_v20 = vpop.f32.mrb[55].mxu1  ;;  %v9028_v35 = vld [vmem:[#allocation21_spill] sm:$0xff] }
 0x601   :  { %v2165_v22 = vmul.f32 0.5, %v2158_v39  ;;  %v2170_v49 = vmul.f32 0.5, %v2160_v41 }
 0x602   :  { %7029 = vtanh.f32 %v2161_v54 }
 0x603   :  { %7031 = vtanh.f32 %v2165_v22 }
 0x604   :  { %7033 = vtanh.f32 %v2159_v12 }
 0x605   :  { %7035 = vtanh.f32 %v2170_v49 }
 0x60c   :  { %v7030_v62 = vpop.eup %7029 }
 0x60d   :  { %v7032_v0 = vpop.eup %7031  ;;  %v2163_v23 = vmul.f32 0.5, %v7030_v62 }
 0x60e   :  { %v2167_v19 = vmul.f32 0.5, %v7032_v0  ;;  %v7034_v31 = vpop.eup %7033 }
 0x60f   :  { %v2164_v11 = vadd.f32 0.5, %v2163_v23  ;;  %v7036_v56 = vpop.eup %7035 }
 0x610   :  { %v2168_v27 = vadd.f32 0.5, %v2167_v19  ;;  %v2172_v25 = vmul.f32 0.5, %v7036_v56  ;;  %v6830_v56 = vld [vmem:[%s8982_s2 + $0x8] ss:$16 sps:$4 sm:$0xff]  }
 0x611   :  { %v2175_v3 = vmul.f32 %v7034_v31, %v2164_v11 }
 0x612   :  { %v2174_v28 = vmul.f32 %v2168_v27, %v7882_v4  ;;  %v2173_v2 = vadd.f32 0.5, %v2172_v25  ;;  %v6835_v25 = vld [vmem:[%s8982_s2 + $0x24] ss:$16 sps:$4 sm:$0xff]  }
 0x614   :  { %v7927_v10 = vadd.f32 %v2175_v3, %v2174_v28  ;;  %v6827_v28 = vld [vmem:[%s8982_s2] ss:$16 sps:$4 sm:$0xff]  }
 0x616   :  { %7037 = vtanh.f32 %v7927_v10 }
 0x620   :  { %v7038_v7 = vpop.eup %7037 }
 0x621   :  { %v7930_v29 = vmul.f32 %v7038_v7, %v2173_v2  ;;  %v6838_v2 = vld [vmem:[%s8982_s2 + $0x2c] ss:$16 sps:$4 sm:$0xff]   ;;  %v6833_v7 = vld [vmem:[%s8982_s2 + $0x20] ss:$16 sps:$4 sm:$0xff]  }
 0x623   :  { %v2192_v26 = vpack.c.bf16 %v7930_v29, %v7930_v29 }
 0x625   :  { %2418 = vmatmul.mubr.bf16.vlgmr.msra.gmra.mrb[24].mxu0 %v2192_v26  ;;  %2459 = vmatmul.mubr.bf16.vlgmr.msra.gmra.mrb[56].mxu1 %v2192_v26  ;;  %v6836_v26 = vld [vmem:[%s8982_s2 + $0x28] ss:$16 sps:$4 sm:$0xff]  }
 0x626   :  { %2737 = vmatpush1.bf16.msra.mxu1 %v7719_v50  ;;  %2727 = vmatprep.mubr.bf16.mxu0 %v9015_v48  ;;  %v6808_v50 = vld [vmem:[%s8979_s3 + $0x4] ss:$16 sps:$4 sm:$0xff]  }
 0x627   :  { %2738 = vmatprep.subr.bf16.mxu1 %v7726_v1  ;;  %2768 = vmatprep.mubr.bf16.mxu1 %v9015_v48  ;;  %v6806_v1 = vld [vmem:[%s8979_s3] ss:$16 sps:$4 sm:$0xff]  }
 0x628   :  { %2695 = vmatprep.subr.bf16.mxu0 %v6808_v50  ;;  %v6841_v50 = vld [vmem:[%s8982_s2 + $0x44] ss:$16 sps:$4 sm:$0xff]  }
 0x629   :  { %2696 = vmatpush1.bf16.msra.mxu0 %v6806_v1  ;;  %v6844_v1 = vld [vmem:[%s8982_s2 + $0x4c] ss:$16 sps:$4 sm:$0xff]  }
 0x62a   :  { %2739 = vmatpush1.bf16.msra.mxu1 %v7731_v52  ;;  %v6811_v52 = vld [vmem:[%s8979_s3 + $0x24] ss:$16 sps:$4 sm:$0xff]  }
 0x62b   :  { %2740 = vmatprep.subr.bf16.mxu1 %v7743_v30  ;;  %v6809_v30 = vld [vmem:[%s8979_s3 + $0x20] ss:$16 sps:$4 sm:$0xff]   ;;  %2697 = vmatprep.subr.bf16.mxu0 %v6811_v52 }
 0x62c   :  { %v6839_v52 = vld [vmem:[%s8982_s2 + $0x40] ss:$16 sps:$4 sm:$0xff]  }
 0x62d   :  { %2698 = vmatpush1.bf16.msra.mxu0 %v6809_v30  ;;  %v6842_v30 = vld [vmem:[%s8982_s2 + $0x48] ss:$16 sps:$4 sm:$0xff]  }
 0x62e   :  { %2741 = vmatpush1.bf16.msra.mxu1 %v7753_v5  ;;  %2699 = vmatprep.subr.bf16.mxu0 %v7738_v58  ;;  %v6814_v5 = vld [vmem:[%s8979_s3 + $0x64] ss:$16 sps:$4 sm:$0xff]   ;;  %v6815_v58 = vld [vmem:[%s8979_s3 + $0x80] ss:$16 sps:$4 sm:$0xff]  }
 0x62f   :  { %2742 = vmatprep.subr.bf16.mxu1 %v7763_v59  ;;  %v6812_v59 = vld [vmem:[%s8979_s3 + $0x60] ss:$16 sps:$4 sm:$0xff]  }
 0x631   :  { %2700 = vmatpush1.bf16.msra.mxu0 %v7748_v63  ;;  %v6820_v63 = vld [vmem:[%s8979_s3 + $0xa4] ss:$16 sps:$4 sm:$0xff]  }
 0x632   :  { %2743 = vmatpush1.bf16.msra.mxu1 %v7768_v9  ;;  %2701 = vmatprep.subr.bf16.mxu0 %v6814_v5  ;;  %v6817_v9 = vld [vmem:[%s8979_s3 + $0x84] ss:$16 sps:$4 sm:$0xff]  }
 0x633   :  { %2744 = vmatprep.subr.bf16.mxu1 %v7777_v17  ;;  %v6818_v17 = vld [vmem:[%s8979_s3 + $0xa0] ss:$16 sps:$4 sm:$0xff]   ;;  %v6847_v5 = vld [vmem:[%s8982_s2 + $0x64] ss:$16 sps:$4 sm:$0xff]  }
 0x635   :  { %2702 = vmatpush1.bf16.msra.mxu0 %v6812_v59  ;;  %v6850_v59 = vld [vmem:[%s8982_s2 + $0x6c] ss:$16 sps:$4 sm:$0xff]  }
 0x636   :  { %2745 = vmatpush1.bf16.msra.mxu1 %v7782_v51  ;;  %2703 = vmatprep.subr.bf16.mxu0 %v6817_v9  ;;  %v6823_v51 = vld [vmem:[%s8979_s3 + $0xc4] ss:$16 sps:$4 sm:$0xff]   ;;  %v6845_v9 = vld [vmem:[%s8982_s2 + $0x60] ss:$16 sps:$4 sm:$0xff]  }
 0x637   :  { %2746 = vmatprep.subr.bf16.mxu1 %v7791_v47  ;;  %v6821_v47 = vld [vmem:[%s8979_s3 + $0xc0] ss:$16 sps:$4 sm:$0xff]  }
 0x639   :  { %2704 = vmatpush1.bf16.msra.mxu0 %v6815_v58  ;;  %v6848_v58 = vld [vmem:[%s8982_s2 + $0x68] ss:$16 sps:$4 sm:$0xff]  }
 0x63a   :  { %2747 = vmatpush1.bf16.msra.mxu1 %v7796_v43  ;;  %2705 = vmatprep.subr.bf16.mxu0 %v6820_v63  ;;  %v6826_v43 = vld [vmem:[%s8979_s3 + $0xe4] ss:$16 sps:$4 sm:$0xff]  }
 0x63b   :  { %2748 = vmatprep.subr.bf16.mxu1 %v7805_v44  ;;  %v6824_v44 = vld [vmem:[%s8979_s3 + $0xe0] ss:$16 sps:$4 sm:$0xff]   ;;  %v6853_v63 = vld [vmem:[%s8982_s2 + $0x84] ss:$16 sps:$4 sm:$0xff]  }
 0x63d   :  { %2706 = vmatpush1.bf16.msra.mxu0 %v6818_v17  ;;  %v6856_v17 = vld [vmem:[%s8982_s2 + $0x8c] ss:$16 sps:$4 sm:$0xff]  }
 0x63e   :  { %2749 = vmatpush1.bf16.msra.mxu1 %v7810_v45  ;;  %2707 = vmatprep.subr.bf16.mxu0 %v6823_v51  ;;  %v6829_v45 = vld [vmem:[%s8982_s2 + $0x4] ss:$16 sps:$4 sm:$0xff]   ;;  %v6851_v51 = vld [vmem:[%s8982_s2 + $0x80] ss:$16 sps:$4 sm:$0xff]  }
 0x63f   :  { %2750 = vmatprep.subr.bf16.mxu1 %v7819_v61  ;;  %v6832_v61 = vld [vmem:[%s8982_s2 + $0xc] ss:$16 sps:$4 sm:$0xff]  }
 0x641   :  { %2708 = vmatpush1.bf16.msra.mxu0 %v6821_v47  ;;  %v6854_v47 = vld [vmem:[%s8982_s2 + $0x88] ss:$16 sps:$4 sm:$0xff]  }
 0x642   :  { %2751 = vmatpush1.bf16.msra.mxu1 %v7824_v46  ;;  %2709 = vmatprep.subr.bf16.mxu0 %v6826_v43  ;;  %v6859_v43 = vld [vmem:[%s8982_s2 + $0xa4] ss:$16 sps:$4 sm:$0xff]  }
 0x643   :  { %3103 = vmatprep.subr.bf16.mxu1 %v6832_v61  ;;  %v6860_v61 = vld [vmem:[%s8982_s2 + $0xa8] ss:$16 sps:$4 sm:$0xff]  }
 0x645   :  { %2710 = vmatpush1.bf16.msra.mxu0 %v6824_v44  ;;  %v6862_v44 = vld [vmem:[%s8982_s2 + $0xac] ss:$16 sps:$4 sm:$0xff]  }
 0x646   :  { %3030 = vmatprep.subr.bf16.mxu0 %v6829_v45  ;;  %v6857_v45 = vld [vmem:[%s8982_s2 + $0xa0] ss:$16 sps:$4 sm:$0xff]  }
 0x6f8   :  { %v2419_v46 = vpop.f32.mrb[24].mxu0  ;;  %v2460_v4 = vpop.f32.mrb[56].mxu1 }
 0x6f9   :  { %v2467_v8 = vadd.f32 %v2419_v46, %v9025_v6  ;;  %v2469_v15 = vadd.f32 %v2460_v4, %v9026_v14  ;;  %v2421_v60 = vpop.f32.mrb[25].mxu0  ;;  %v2462_v32 = vpop.f32.mrb[57].mxu1  ;;  %v6865_v46 = vld [vmem:[%s8982_s2 + $0xc4] ss:$16 sps:$4 sm:$0xff]   ;;  %v6868_v4 = vld [vmem:[%s8982_s2 + $0xcc] ss:$16 sps:$4 sm:$0xff]  }
 0x6fa   :  { %v2468_v34 = vadd.f32 %v2421_v60, %v9027_v33  ;;  %v2470_v36 = vadd.f32 %v2462_v32, %v9028_v35  ;;  %v2423_v12 = vpop.f32.mrb[26].mxu0  ;;  %v2464_v13 = vpop.f32.mrb[58].mxu1  ;;  %v6863_v6 = vld [vmem:[%s8982_s2 + $0xc0] ss:$16 sps:$4 sm:$0xff]   ;;  %v6871_v14 = vld [vmem:[%s8982_s2 + $0xe4] ss:$16 sps:$4 sm:$0xff]   ;;  %v2811_v33 = vpack.c.bf16 %v7586_v21, %v7541_v57  ;;  %v2813_v35 = vpack.c.bf16 %v7930_v29, %v7885_v16 }
 0x6fb   :  { %v2471_v37 = vmul.f32 0.5, %v2467_v8  ;;  %v2424_v38 = vpop.f32.mrb[27].mxu0  ;;  %v2465_v39 = vpop.f32.mrb[59].mxu1  ;;  %v6866_v8 = vld [vmem:[%s8982_s2 + $0xc8] ss:$16 sps:$4 sm:$0xff]  }
 0x6fc   :  { %v2475_v40 = vmul.f32 0.5, %v2468_v34  ;;  %v2480_v41 = vmul.f32 0.5, %v2470_v36  ;;  %v6869_v60 = vld [vmem:[%s8982_s2 + $0xe0] ss:$16 sps:$4 sm:$0xff]   ;;  %v6872_v32 = vld [vmem:[%s8982_s2 + $0xe8] ss:$16 sps:$4 sm:$0xff]   ;;  %v2812_v34 = vpack.c.bf16 %v7839_v55, %v7702_v53 }
 0x6fd   :  { %7039 = vtanh.f32 %v2471_v37  ;;  %v8120_v57 = vld [vmem:[%s8979_s3 + $0x104] ss:$16 sps:$4 sm:$0xff]   ;;  %v8125_v21 = vld [vmem:[%s8979_s3 + $0x10c] ss:$16 sps:$4 sm:$0xff]   ;;  %v8130_v53 = vld [vmem:[%s8979_s3 + $0x100] ss:$16 sps:$4 sm:$0xff]  }
 0x6fe   :  { %7041 = vtanh.f32 %v2475_v40  ;;  %v8135_v55 = vld [vmem:[%s8979_s3 + $0x108] ss:$16 sps:$4 sm:$0xff]   ;;  %v8144_v16 = vld [vmem:[%s8979_s3 + $0x124] ss:$16 sps:$4 sm:$0xff]   ;;  %v8149_v29 = vld [vmem:[%s8979_s3 + $0x12c] ss:$16 sps:$4 sm:$0xff]  }
 0x6ff   :  { %7043 = vtanh.f32 %v2469_v15  ;;  %v6874_v15 = vld [vmem:[%s8982_s2 + $0xec] ss:$16 sps:$4 sm:$0xff]   ;;  %v8154_v36 = vld [vmem:[%s8979_s3 + $0x120] ss:$16 sps:$4 sm:$0xff]   ;;  %v8159_v12 = vld [vmem:[%s8979_s3 + $0x128] ss:$16 sps:$4 sm:$0xff]  }
 0x700   :  { %7045 = vtanh.f32 %v2480_v41  ;;  %v8168_v13 = vld [vmem:[%s8979_s3 + $0x144] ss:$16 sps:$4 sm:$0xff]   ;;  %v8173_v37 = vld [vmem:[%s8979_s3 + $0x14c] ss:$16 sps:$4 sm:$0xff]   ;;  %v8178_v38 = vld [vmem:[%s8979_s3 + $0x140] ss:$16 sps:$4 sm:$0xff]  }
 0x701   :  { %v8183_v39 = vld [vmem:[%s8979_s3 + $0x148] ss:$16 sps:$4 sm:$0xff]   ;;  %v8190_v40 = vld [vmem:[%s8979_s3 + $0x164] ss:$16 sps:$4 sm:$0xff]   ;;  %v8197_v41 = vld [vmem:[%s8979_s3 + $0x160] ss:$16 sps:$4 sm:$0xff]  }
 0x707   :  { %v7040_v24 = vpop.eup %7039 }
 0x708   :  { %v7042_v18 = vpop.eup %7041  ;;  %v2473_v54 = vmul.f32 0.5, %v7040_v24  ;;  %v8202_v24 = vld [vmem:[%s8979_s3 + $0x168] ss:$16 sps:$4 sm:$0xff]  }
 0x709   :  { %v2477_v42 = vmul.f32 0.5, %v7042_v18  ;;  %v7044_v22 = vpop.eup %7043  ;;  %v8207_v18 = vld [vmem:[%s8979_s3 + $0x16c] ss:$16 sps:$4 sm:$0xff]  }
 0x70a   :  { %v2474_v20 = vadd.f32 0.5, %v2473_v54  ;;  %v7046_v19 = vpop.eup %7045  ;;  %v8216_v54 = vld [vmem:[%s8979_s3 + $0x184] ss:$16 sps:$4 sm:$0xff]  }
 0x70b   :  { %v2478_v49 = vadd.f32 0.5, %v2477_v42  ;;  %v2482_v11 = vmul.f32 0.5, %v7046_v19  ;;  %v8221_v42 = vld [vmem:[%s8979_s3 + $0x18c] ss:$16 sps:$4 sm:$0xff]   ;;  %v8255_v19 = vld [vmem:[%s8979_s3 + $0x1a8] ss:$16 sps:$4 sm:$0xff]  }
 0x70c   :  { %v2485_v62 = vmul.f32 %v7044_v22, %v2474_v20  ;;  %v8226_v20 = vld [vmem:[%s8979_s3 + $0x180] ss:$16 sps:$4 sm:$0xff]   ;;  %v8231_v22 = vld [vmem:[%s8979_s3 + $0x188] ss:$16 sps:$4 sm:$0xff]  }
 0x70d   :  { %v2484_v0 = vmul.f32 %v2478_v49, %v7927_v10  ;;  %v2483_v31 = vadd.f32 0.5, %v2482_v11  ;;  %v8240_v49 = vld [vmem:[%s8979_s3 + $0x1a4] ss:$16 sps:$4 sm:$0xff]  }
 0x70e   :  { %v8264_v11 = vld [vmem:[%s8979_s3 + $0x1c4] ss:$16 sps:$4 sm:$0xff]  }
 0x70f   :  { %v8006_v23 = vadd.f32 %v2485_v62, %v2484_v0  ;;  %v8245_v62 = vld [vmem:[%s8979_s3 + $0x1ac] ss:$16 sps:$4 sm:$0xff]   ;;  %v8250_v0 = vld [vmem:[%s8979_s3 + $0x1a0] ss:$16 sps:$4 sm:$0xff]  }
 0x711   :  { %7047 = vtanh.f32 %v8006_v23 }
 0x71b   :  { %v7048_v27 = vpop.eup %7047 }
 0x71c   :  { %v8009_v3 = vmul.f32 %v7048_v27, %v2483_v31  ;;  %v8269_v31 = vld [vmem:[%s8979_s3 + $0x1cc] ss:$16 sps:$4 sm:$0xff]   ;;  %v8274_v27 = vld [vmem:[%s8979_s3 + $0x1c0] ss:$16 sps:$4 sm:$0xff]  }
 0x71e   :  { %v2502_v10 = vpack.c.bf16 %v8009_v3, %v8009_v3 }
 0x720   :  { %2728 = vmatmul.mubr.bf16.vlgmr.msra.gmra.mrb[28].mxu0 %v2502_v10  ;;  %2769 = vmatmul.mubr.bf16.vlgmr.msra.gmra.mrb[60].mxu1 %v2502_v10  ;;  %v8293_v10 = vld [vmem:[%s8979_s3 + $0x1ec] ss:$16 sps:$4 sm:$0xff]  }
 0x721   :  { %3031 = vmatpush1.bf16.msra.mxu0 %v6827_v28  ;;  %3104 = vmatpush1.bf16.msra.mxu1 %v6830_v56  ;;  %v8279_v28 = vld [vmem:[%s8979_s3 + $0x1c8] ss:$16 sps:$4 sm:$0xff]   ;;  %v8288_v56 = vld [vmem:[%s8979_s3 + $0x1e4] ss:$16 sps:$4 sm:$0xff]  }
 0x722   :  { %3032 = vmatprep.subr.bf16.mxu0 %v6835_v25  ;;  %3105 = vmatprep.subr.bf16.mxu1 %v6838_v2  ;;  %v8298_v25 = vld [vmem:[%s8979_s3 + $0x1e0] ss:$16 sps:$4 sm:$0xff]   ;;  %v8303_v2 = vld [vmem:[%s8979_s3 + $0x1e8] ss:$16 sps:$4 sm:$0xff]  }
 0x723   :  { %3062 = vmatprep.mubr.bf16.mxu0 %v9015_v48  ;;  %3135 = vmatprep.mubr.bf16.mxu1 %v9015_v48 }
 0x725   :  { %3033 = vmatpush1.bf16.msra.mxu0 %v6833_v7  ;;  %3106 = vmatpush1.bf16.msra.mxu1 %v6836_v26 }
 0x726   :  { %3034 = vmatprep.subr.bf16.mxu0 %v6841_v50  ;;  %3107 = vmatprep.subr.bf16.mxu1 %v6844_v1  ;;  %v9029_v50 = vld [vmem:[#allocation13_spill] sm:$0xff] }
 0x729   :  { %3035 = vmatpush1.bf16.msra.mxu0 %v6839_v52  ;;  %3108 = vmatpush1.bf16.msra.mxu1 %v6842_v30  ;;  %v9030_v52 = vld [vmem:[#allocation22_spill] sm:$0xff] }
 0x72a   :  { %3036 = vmatprep.subr.bf16.mxu0 %v6847_v5  ;;  %3109 = vmatprep.subr.bf16.mxu1 %v6850_v59 }
 0x72d   :  { %3037 = vmatpush1.bf16.msra.mxu0 %v6845_v9  ;;  %3110 = vmatpush1.bf16.msra.mxu1 %v6848_v58  ;;  %v9031_v9 = vld [vmem:[#allocation14_spill] sm:$0xff] }
 0x72e   :  { %3038 = vmatprep.subr.bf16.mxu0 %v6853_v63  ;;  %3111 = vmatprep.subr.bf16.mxu1 %v6856_v17  ;;  %v9032_v63 = vld [vmem:[#allocation23_spill] sm:$0xff] }
 0x731   :  { %3039 = vmatpush1.bf16.msra.mxu0 %v6851_v51  ;;  %3112 = vmatpush1.bf16.msra.mxu1 %v6854_v47 }
 0x732   :  { %3040 = vmatprep.subr.bf16.mxu0 %v6859_v43  ;;  %3113 = vmatprep.subr.bf16.mxu1 %v6862_v44 }
 0x735   :  { %3041 = vmatpush1.bf16.msra.mxu0 %v6857_v45  ;;  %3114 = vmatpush1.bf16.msra.mxu1 %v6860_v61 }
 0x736   :  { %3042 = vmatprep.subr.bf16.mxu0 %v6865_v46  ;;  %3115 = vmatprep.subr.bf16.mxu1 %v6868_v4 }
 0x739   :  { %3043 = vmatpush1.bf16.msra.mxu0 %v6863_v6  ;;  %3116 = vmatpush1.bf16.msra.mxu1 %v6866_v8 }
 0x73a   :  { %3044 = vmatprep.subr.bf16.mxu0 %v6871_v14  ;;  %3117 = vmatprep.subr.bf16.mxu1 %v6874_v15 }
 0x73d   :  { %3045 = vmatpush1.bf16.msra.mxu0 %v6869_v60  ;;  %3118 = vmatpush1.bf16.msra.mxu1 %v6872_v32 }
 0x73e   :  { %3410 = vmatprep.subr.bf16.mxu0 %v8120_v57  ;;  %3451 = vmatprep.subr.bf16.mxu1 %v8125_v21 }
 0x740   :  { %3063 = vmatmul.mubr.bf16.vlgmr.msra.gmra.mrb[32].mxu0 %v2811_v33  ;;  %3136 = vmatmul.mubr.bf16.vlgmr.msra.gmra.mrb[64].mxu1 %v2811_v33 }
 0x741   :  { %3072 = vmatprep.mubr.bf16.mxu0 %v9015_v48  ;;  %3145 = vmatprep.mubr.bf16.mxu1 %v9015_v48 }
 0x742   :  { %3411 = vmatpush1.bf16.msra.mxu0 %v8130_v53  ;;  %3452 = vmatpush1.bf16.msra.mxu1 %v8135_v55 }
 0x743   :  { %3412 = vmatprep.subr.bf16.mxu0 %v8144_v16  ;;  %3453 = vmatprep.subr.bf16.mxu1 %v8149_v29 }
 0x746   :  { %3413 = vmatpush1.bf16.msra.mxu0 %v8154_v36  ;;  %3454 = vmatpush1.bf16.msra.mxu1 %v8159_v12 }
 0x747   :  { %3414 = vmatprep.subr.bf16.mxu0 %v8168_v13  ;;  %3455 = vmatprep.subr.bf16.mxu1 %v8173_v37 }
 0x748   :  { %3073 = vmatmul.mubr.bf16.gmra.mrb[36].mxu0 %v2812_v34  ;;  %3146 = vmatmul.mubr.bf16.gmra.mrb[68].mxu1 %v2812_v34 }
 0x749   :  { %3082 = vmatprep.mubr.bf16.mxu0 %v9015_v48  ;;  %3155 = vmatprep.mubr.bf16.mxu1 %v9015_v48 }
 0x74a   :  { %3415 = vmatpush1.bf16.msra.mxu0 %v8178_v38  ;;  %3456 = vmatpush1.bf16.msra.mxu1 %v8183_v39 }
 0x74b   :  { %3416 = vmatprep.subr.bf16.mxu0 %v8190_v40  ;;  %3457 = vmatprep.subr.bf16.mxu1 %v8207_v18 }
 0x74e   :  { %3417 = vmatpush1.bf16.msra.mxu0 %v8197_v41  ;;  %3458 = vmatpush1.bf16.msra.mxu1 %v8202_v24 }
 0x74f   :  { %3418 = vmatprep.subr.bf16.mxu0 %v8216_v54  ;;  %3459 = vmatprep.subr.bf16.mxu1 %v8221_v42 }
 0x750   :  { %3083 = vmatmul.mubr.bf16.gmra.mrb[40].mxu0 %v2813_v35  ;;  %3156 = vmatmul.mubr.bf16.gmra.mrb[72].mxu1 %v2813_v35 }
 0x751   :  { %3092 = vmatprep.mubr.bf16.mxu0 %v9015_v48  ;;  %3165 = vmatprep.mubr.bf16.mxu1 %v9015_v48 }
 0x752   :  { %3419 = vmatpush1.bf16.msra.mxu0 %v8226_v20  ;;  %3460 = vmatpush1.bf16.msra.mxu1 %v8231_v22 }
 0x753   :  { %3420 = vmatprep.subr.bf16.mxu0 %v8240_v49  ;;  %3461 = vmatprep.subr.bf16.mxu1 %v8245_v62 }
 0x756   :  { %3421 = vmatpush1.bf16.msra.mxu0 %v8250_v0  ;;  %3462 = vmatpush1.bf16.msra.mxu1 %v8255_v19 }
 0x757   :  { %3422 = vmatprep.subr.bf16.mxu0 %v8264_v11  ;;  %3463 = vmatprep.subr.bf16.mxu1 %v8269_v31 }
 0x75a   :  { %3423 = vmatpush1.bf16.msra.mxu0 %v8274_v27  ;;  %3464 = vmatpush1.bf16.msra.mxu1 %v8279_v28 }
 0x75b   :  { %3424 = vmatprep.subr.bf16.mxu0 %v8288_v56  ;;  %3465 = vmatprep.subr.bf16.mxu1 %v8293_v10 }
 0x75e   :  { %3425 = vmatpush1.bf16.msra.mxu0 %v8298_v25  ;;  %3466 = vmatpush1.bf16.msra.mxu1 %v8303_v2 }
 0x75f   :  { %3716 = vmatprep.subr.bf16.mxu0 %v8120_v57  ;;  %3757 = vmatprep.subr.bf16.mxu1 %v8125_v21 }
 0x7f3   :  { %v2729_v7 = vpop.f32.mrb[28].mxu0  ;;  %v2770_v26 = vpop.f32.mrb[60].mxu1 }
 0x7f4   :  { %v2777_v1 = vadd.f32 %v2729_v7, %v9029_v50  ;;  %v2779_v30 = vadd.f32 %v2770_v26, %v9030_v52  ;;  %v2731_v5 = vpop.f32.mrb[29].mxu0  ;;  %v2772_v59 = vpop.f32.mrb[61].mxu1 }
 0x7f5   :  { %v2778_v58 = vadd.f32 %v2731_v5, %v9031_v9  ;;  %v2780_v17 = vadd.f32 %v2772_v59, %v9032_v63  ;;  %v2733_v51 = vpop.f32.mrb[30].mxu0  ;;  %v2774_v47 = vpop.f32.mrb[62].mxu1 }
 0x7f6   :  { %v2781_v43 = vmul.f32 0.5, %v2777_v1  ;;  %v2734_v44 = vpop.f32.mrb[31].mxu0  ;;  %v2775_v45 = vpop.f32.mrb[63].mxu1 }
 0x7f7   :  { %v2785_v61 = vmul.f32 0.5, %v2778_v58  ;;  %v2790_v46 = vmul.f32 0.5, %v2780_v17 }
 0x7f8   :  { %7049 = vtanh.f32 %v2781_v43 }
 0x7f9   :  { %7051 = vtanh.f32 %v2785_v61 }
 0x7fa   :  { %7053 = vtanh.f32 %v2779_v30 }
 0x7fb   :  { %7055 = vtanh.f32 %v2790_v46 }
 0x802   :  { %v7050_v4 = vpop.eup %7049 }
 0x803   :  { %v7052_v6 = vpop.eup %7051  ;;  %v2783_v8 = vmul.f32 0.5, %v7050_v4 }
 0x804   :  { %v2787_v14 = vmul.f32 0.5, %v7052_v6  ;;  %v7054_v60 = vpop.eup %7053 }
 0x805   :  { %v2784_v15 = vadd.f32 0.5, %v2783_v8  ;;  %v7056_v7 = vpop.eup %7055 }
 0x806   :  { %v2788_v32 = vadd.f32 0.5, %v2787_v14  ;;  %v2792_v26 = vmul.f32 0.5, %v7056_v7  ;;  %v9043_v14 = vmov 0.0|0.0   ;;  %v6102_v7 = vld [vmem:[%s8981_s4 + $0x4] sm:$0xf] }
 0x807   :  { %v2795_v33 = vmul.f32 %v7054_v60, %v2784_v15 }
 0x808   :  { %v2794_v34 = vmul.f32 %v2788_v32, %v8006_v23  ;;  %v2793_v5 = vadd.f32 0.5, %v2792_v26 }
 0x80a   :  { %v2796_v35 = vadd.f32 %v2795_v33, %v2794_v34 }
 0x80c   :  { %7057 = vtanh.f32 %v2796_v35 }
 0x813   :  { %v8316_v50 = vpop.f32.mrb[32].mxu0  ;;  %v8318_v1 = vpop.f32.mrb[64].mxu1 }
 0x814   :  { %v8320_v52 = vpop.f32.mrb[33].mxu0  ;;  %v8322_v30 = vpop.f32.mrb[65].mxu1 }
 0x815   :  { %v8324_v59 = vpop.f32.mrb[34].mxu0  ;;  %v8326_v9 = vpop.f32.mrb[66].mxu1 }
 0x816   :  { %v7058_v58 = vpop.eup %7057  ;;  %v8328_v63 = vpop.f32.mrb[35].mxu0 }
 0x817   :  { %v8330_v23 = vpop.f32.mrb[67].mxu1  ;;  %v2798_v17 = vmul.f32 %v7058_v58, %v2793_v5 }
 0x819   :  { %v2814_v51 = vpack.c.bf16 %v2798_v17, %v8009_v3 }
 0x81b   :  { %v8333_v47 = vpop.f32.mrb[36].mxu0  ;;  %v8335_v43 = vpop.f32.mrb[68].mxu1  ;;  %3093 = vmatmul.mubr.bf16.gmra.mrb[44].mxu0 %v2814_v51  ;;  %3166 = vmatmul.mubr.bf16.gmra.mrb[76].mxu1 %v2814_v51 }
 0x81c   :  { %9033 = vst [vmem:[#allocation15_spill] sm:$0xff] %v8333_v47  ;;  %9034 = vst [vmem:[#allocation7_spill] sm:$0xff] %v8335_v43  ;;  %v8337_v44 = vpop.f32.mrb[37].mxu0  ;;  %v8339_v45 = vpop.f32.mrb[69].mxu1  ;;  %3442 = vmatprep.mubr.bf16.mxu0 %v9015_v48  ;;  %3483 = vmatprep.mubr.bf16.mxu1 %v9015_v48 }
 0x81d   :  { %9035 = vst [vmem:[#allocation16_spill] sm:$0xff] %v8337_v44  ;;  %9036 = vst [vmem:[#allocation8_spill] sm:$0xff] %v8339_v45  ;;  %v8343_v61 = vpop.f32.mrb[38].mxu0  ;;  %v8345_v46 = vpop.f32.mrb[70].mxu1 }
 0x81e   :  { %9037 = vst [vmem:[#allocation17_spill] sm:$0xff] %v8343_v61  ;;  %9038 = vst [vmem:[#allocation9_spill] sm:$0xff] %v8345_v46  ;;  %v8347_v4 = vpop.f32.mrb[39].mxu0  ;;  %v8349_v3 = vpop.f32.mrb[71].mxu1 }
 0x81f   :  { %9039 = vst [vmem:[#allocation18_spill] sm:$0xff] %v8347_v4  ;;  %9040 = vst [vmem:[#allocation10_spill] sm:$0xff] %v8349_v3 }
 0x823   :  { %v8351_v6 = vpop.f32.mrb[40].mxu0  ;;  %v8353_v8 = vpop.f32.mrb[72].mxu1  ;;  %3443 = vmatmul.mubr.bf16.vlgmr.msra.gmra.mrb[48].mxu0 %v9043_v14  ;;  %3484 = vmatmul.mubr.bf16.vlgmr.msra.gmra.mrb[80].mxu1 %v9043_v14 }
 0x824   :  { %9041 = vst [vmem:[#allocation19_spill] sm:$0xff] %v8351_v6  ;;  %9042 = vst [vmem:[#allocation11_spill] sm:$0xff] %v8353_v8  ;;  %v8357_v15 = vpop.f32.mrb[41].mxu0  ;;  %v8359_v60 = vpop.f32.mrb[73].mxu1  ;;  %3717 = vmatpush1.bf16.msra.mxu0 %v8130_v53  ;;  %3758 = vmatpush1.bf16.msra.mxu1 %v8135_v55 }
 0x825   :  { %9044 = vst [vmem:[#allocation20_spill] sm:$0xff] %v8357_v15  ;;  %9045 = vst [vmem:[#allocation12_spill] sm:$0xff] %v8359_v60  ;;  %v8363_v32 = vpop.f32.mrb[42].mxu0  ;;  %v8365_v33 = vpop.f32.mrb[74].mxu1  ;;  %3718 = vmatprep.subr.bf16.mxu0 %v8144_v16  ;;  %3759 = vmatprep.subr.bf16.mxu1 %v8149_v29 }
 0x826   :  { %9046 = vst [vmem:[#allocation21_spill] sm:$0xff] %v8363_v32  ;;  %9047 = vst [vmem:[#allocation13_spill] sm:$0xff] %v8365_v33  ;;  %v8369_v34 = vpop.f32.mrb[43].mxu0  ;;  %v8371_v35 = vpop.f32.mrb[75].mxu1  ;;  %3748 = vmatprep.mubr.bf16.mxu0 %v9015_v48  ;;  %3789 = vmatprep.mubr.bf16.mxu1 %v9015_v48 }
 0x827   :  { %9048 = vst [vmem:[#allocation22_spill] sm:$0xff] %v8369_v34  ;;  %9049 = vst [vmem:[#allocation14_spill] sm:$0xff] %v8371_v35  ;;  %v9056_v35 = vld [vmem:[#allocation6_spill] sm:$0xff] }
 0x828   :  { %3719 = vmatpush1.bf16.msra.mxu0 %v8154_v36  ;;  %3760 = vmatpush1.bf16.msra.mxu1 %v8159_v12  ;;  %v9057_v34 = vsub.s32 0, %v9056_v35  ;;  %v9058_v32 = vsub.s32 2, %v9056_v35 }
 0x829   :  { %3720 = vmatprep.subr.bf16.mxu0 %v8168_v13  ;;  %3761 = vmatprep.subr.bf16.mxu1 %v8173_v37 }
 0x82a   :  { %v8420_v33 = vrot.slane %v6102_v7, %v9057_v34  ;;  %v8424_v60 = vrot.slane %v6102_v7, %v9058_v32 }
 0x82c   :  { %3721 = vmatpush1.bf16.msra.mxu0 %v8178_v38  ;;  %3762 = vmatpush1.bf16.msra.mxu1 %v8183_v39  ;;  %v3065_v34 = vadd.f32 %v8316_v50, %v8420_v33 }
 0x82d   :  { %3722 = vmatprep.subr.bf16.mxu0 %v8190_v40  ;;  %3763 = vmatprep.subr.bf16.mxu1 %v8207_v18 }
 0x830   :  { %3723 = vmatpush1.bf16.msra.mxu0 %v8197_v41  ;;  %3764 = vmatpush1.bf16.msra.mxu1 %v8202_v24 }
 0x831   :  { %3724 = vmatprep.subr.bf16.mxu0 %v8216_v54  ;;  %3765 = vmatprep.subr.bf16.mxu1 %v8221_v42 }
 0x834   :  { %3725 = vmatpush1.bf16.msra.mxu0 %v8226_v20  ;;  %3766 = vmatpush1.bf16.msra.mxu1 %v8231_v22 }
 0x835   :  { %3726 = vmatprep.subr.bf16.mxu0 %v8240_v49  ;;  %3767 = vmatprep.subr.bf16.mxu1 %v8245_v62 }
 0x838   :  { %3727 = vmatpush1.bf16.msra.mxu0 %v8250_v0  ;;  %3768 = vmatpush1.bf16.msra.mxu1 %v8255_v19 }
 0x839   :  { %3728 = vmatprep.subr.bf16.mxu0 %v8264_v11  ;;  %3769 = vmatprep.subr.bf16.mxu1 %v8269_v31 }
 0x83c   :  { %3729 = vmatpush1.bf16.msra.mxu0 %v8274_v27  ;;  %3770 = vmatpush1.bf16.msra.mxu1 %v8279_v28 }
 0x83d   :  { %3730 = vmatprep.subr.bf16.mxu0 %v8288_v56  ;;  %3771 = vmatprep.subr.bf16.mxu1 %v8293_v10 }
 0x840   :  { %3731 = vmatpush1.bf16.msra.mxu0 %v8298_v25  ;;  %3772 = vmatpush1.bf16.msra.mxu1 %v8303_v2 }
 0x841   :  { %4022 = vmatprep.subr.bf16.mxu0 %v8120_v57  ;;  %4063 = vmatprep.subr.bf16.mxu1 %v8125_v21 }
 0x8ee   :  { %v8406_v26 = vpop.f32.mrb[44].mxu0  ;;  %v8408_v5 = vpop.f32.mrb[76].mxu1 }
 0x8ef   :  { %9050 = vst [vmem:[#allocation23_spill] sm:$0xff] %v8406_v26  ;;  %9051 = vst [vmem:[#allocation24_spill] sm:$0xff] %v8408_v5  ;;  %v8410_v58 = vpop.f32.mrb[45].mxu0  ;;  %v8412_v17 = vpop.f32.mrb[77].mxu1 }
 0x8f0   :  { %9052 = vst [vmem:[#allocation25_spill] sm:$0xff] %v8410_v58  ;;  %9053 = vst [vmem:[#allocation26_spill] sm:$0xff] %v8412_v17  ;;  %v8414_v51 = vpop.f32.mrb[46].mxu0  ;;  %v8416_v14 = vpop.f32.mrb[78].mxu1  ;;  %v9061_v58 = vsub.s32 1, %v9056_v35 }
 0x8f1   :  { %9054 = vst [vmem:[#allocation27_spill] sm:$0xff] %v8414_v51  ;;  %9055 = vst [vmem:[#allocation28_spill] sm:$0xff] %v8416_v14  ;;  %v8426_v15 = vpop.f32.mrb[47].mxu0  ;;  %v8428_v26 = vpop.f32.mrb[79].mxu1  ;;  %v9062_v51 = vsub.s32 3, %v9056_v35  ;;  %v3138_v14 = vadd.f32 %v8318_v1, %v8424_v60 }
 0x8f2   :  { %9059 = vst [vmem:[#allocation6_spill] sm:$0xff] %v8426_v15  ;;  %9060 = vst [vmem:[#allocation29_spill] sm:$0xff] %v8428_v26  ;;  %v8432_v5 = vrot.slane %v6102_v7, %v9061_v58 }
 0x8f3   :  { %v8436_v17 = vrot.slane %v6102_v7, %v9062_v51 }
 0x8f4   :  { %v3067_v32 = vadd.f32 %v8320_v52, %v8432_v5 }
 0x8f5   :  { %v3140_v26 = vadd.f32 %v8322_v30, %v8436_v17 }
 0x8f6   :  { %v3444_v15 = vpop.f32.mrb[48].mxu0  ;;  %v3485_v8 = vpop.f32.mrb[80].mxu1 }
 0x8f7   :  { %v3492_v58 = vadd.f32 %v3444_v15, %v3065_v34  ;;  %v3494_v6 = vadd.f32 %v3485_v8, %v3138_v14  ;;  %v3446_v3 = vpop.f32.mrb[49].mxu0  ;;  %v3487_v35 = vpop.f32.mrb[81].mxu1 }
 0x8f8   :  { %v3493_v7 = vadd.f32 %v3446_v3, %v3067_v32  ;;  %v3495_v51 = vadd.f32 %v3487_v35, %v3140_v26  ;;  %v3448_v4 = vpop.f32.mrb[50].mxu0  ;;  %v3489_v46 = vpop.f32.mrb[82].mxu1  ;;  %v3071_v32 = vadd.f32 %v8328_v63, %v8432_v5 }
 0x8f9   :  { %v3496_v50 = vmul.f32 0.5, %v3492_v58  ;;  %v3449_v61 = vpop.f32.mrb[51].mxu0  ;;  %v3490_v45 = vpop.f32.mrb[83].mxu1  ;;  %v3144_v58 = vadd.f32 %v8330_v23, %v8436_v17 }
 0x8fa   :  { %v3500_v1 = vmul.f32 0.5, %v3493_v7  ;;  %v3505_v52 = vmul.f32 0.5, %v3495_v51 }
 0x8fb   :  { %7059 = vtanh.f32 %v3496_v50 }
 0x8fc   :  { %7061 = vtanh.f32 %v3500_v1 }
 0x8fd   :  { %7063 = vtanh.f32 %v3494_v6 }
 0x8fe   :  { %7065 = vtanh.f32 %v3505_v52 }
 0x905   :  { %v7060_v44 = vpop.eup %7059 }
 0x906   :  { %v7062_v30 = vpop.eup %7061  ;;  %v3498_v43 = vmul.f32 0.5, %v7060_v44 }
 0x907   :  { %v3502_v47 = vmul.f32 0.5, %v7062_v30  ;;  %v7064_v15 = vpop.eup %7063 }
 0x908   :  { %v3499_v8 = vadd.f32 0.5, %v3498_v43  ;;  %v7066_v45 = vpop.eup %7065  ;;  %v3142_v43 = vadd.f32 %v8326_v9, %v8424_v60 }
 0x909   :  { %v3503_v14 = vadd.f32 0.5, %v3502_v47  ;;  %v3507_v61 = vmul.f32 0.5, %v7066_v45  ;;  %v3069_v47 = vadd.f32 %v8324_v59, %v8420_v33 }
 0x90a   :  { %v3510_v3 = vmul.f32 %v7064_v15, %v3499_v8 }
 0x90b   :  { %v3509_v26 = vmul.f32 0.0, %v3503_v14  ;;  %v3508_v46 = vadd.f32 0.5, %v3507_v61 }
 0x90d   :  { %v8446_v4 = vadd.f32 %v3510_v3, %v3509_v26 }
 0x90f   :  { %7067 = vtanh.f32 %v8446_v4 }
 0x919   :  { %v7068_v34 = vpop.eup %7067 }
 0x91a   :  { %v8449_v6 = vmul.f32 %v7068_v34, %v3508_v46 }
 0x91c   :  { %v3523_v44 = vpack.c.bf16 %v8449_v6, %v8449_v6 }
 0x91e   :  { %3749 = vmatmul.mubr.bf16.vlgmr.msra.gmra.mrb[52].mxu0 %v3523_v44  ;;  %3790 = vmatmul.mubr.bf16.vlgmr.msra.gmra.mrb[84].mxu1 %v3523_v44 }
 0x91f   :  { %4023 = vmatpush1.bf16.msra.mxu0 %v8130_v53  ;;  %4064 = vmatpush1.bf16.msra.mxu1 %v8135_v55 }
 0x920   :  { %4024 = vmatprep.subr.bf16.mxu0 %v8144_v16  ;;  %4065 = vmatprep.subr.bf16.mxu1 %v8149_v29 }
 0x921   :  { %4054 = vmatprep.mubr.bf16.mxu0 %v9015_v48  ;;  %4095 = vmatprep.mubr.bf16.mxu1 %v9015_v48 }
 0x923   :  { %4025 = vmatpush1.bf16.msra.mxu0 %v8154_v36  ;;  %4066 = vmatpush1.bf16.msra.mxu1 %v8159_v12 }
 0x924   :  { %4026 = vmatprep.subr.bf16.mxu0 %v8168_v13  ;;  %4067 = vmatprep.subr.bf16.mxu1 %v8173_v37 }
 0x927   :  { %4027 = vmatpush1.bf16.msra.mxu0 %v8178_v38  ;;  %4068 = vmatpush1.bf16.msra.mxu1 %v8183_v39 }
 0x928   :  { %4028 = vmatprep.subr.bf16.mxu0 %v8190_v40  ;;  %4069 = vmatprep.subr.bf16.mxu1 %v8207_v18 }
 0x92b   :  { %4029 = vmatpush1.bf16.msra.mxu0 %v8197_v41  ;;  %4070 = vmatpush1.bf16.msra.mxu1 %v8202_v24 }
 0x92c   :  { %4030 = vmatprep.subr.bf16.mxu0 %v8216_v54  ;;  %4071 = vmatprep.subr.bf16.mxu1 %v8221_v42 }
 0x92f   :  { %4031 = vmatpush1.bf16.msra.mxu0 %v8226_v20  ;;  %4072 = vmatpush1.bf16.msra.mxu1 %v8231_v22 }
 0x930   :  { %4032 = vmatprep.subr.bf16.mxu0 %v8240_v49  ;;  %4073 = vmatprep.subr.bf16.mxu1 %v8245_v62 }
 0x933   :  { %4033 = vmatpush1.bf16.msra.mxu0 %v8250_v0  ;;  %4074 = vmatpush1.bf16.msra.mxu1 %v8255_v19 }
 0x934   :  { %4034 = vmatprep.subr.bf16.mxu0 %v8264_v11  ;;  %4075 = vmatprep.subr.bf16.mxu1 %v8269_v31 }
 0x937   :  { %4035 = vmatpush1.bf16.msra.mxu0 %v8274_v27  ;;  %4076 = vmatpush1.bf16.msra.mxu1 %v8279_v28 }
 0x938   :  { %4036 = vmatprep.subr.bf16.mxu0 %v8288_v56  ;;  %4077 = vmatprep.subr.bf16.mxu1 %v8293_v10 }
 0x93b   :  { %4037 = vmatpush1.bf16.msra.mxu0 %v8298_v25  ;;  %4078 = vmatpush1.bf16.msra.mxu1 %v8303_v2 }
 0x93c   :  { %4328 = vmatprep.subr.bf16.mxu0 %v8120_v57  ;;  %4369 = vmatprep.subr.bf16.mxu1 %v8125_v21 }
 0x9f1   :  { %v3750_v35 = vpop.f32.mrb[52].mxu0  ;;  %v3791_v7 = vpop.f32.mrb[84].mxu1 }
 0x9f2   :  { %v3798_v51 = vadd.f32 %v3750_v35, %v3069_v47  ;;  %v3800_v50 = vadd.f32 %v3791_v7, %v3142_v43  ;;  %v3752_v1 = vpop.f32.mrb[53].mxu0  ;;  %v3793_v57 = vpop.f32.mrb[85].mxu1 }
 0x9f3   :  { %v3799_v52 = vadd.f32 %v3752_v1, %v3071_v32  ;;  %v3801_v21 = vadd.f32 %v3793_v57, %v3144_v58  ;;  %v3754_v30 = vpop.f32.mrb[54].mxu0  ;;  %v3795_v8 = vpop.f32.mrb[86].mxu1 }
 0x9f4   :  { %v3802_v59 = vmul.f32 0.5, %v3798_v51  ;;  %v3755_v15 = vpop.f32.mrb[55].mxu0  ;;  %v3796_v14 = vpop.f32.mrb[87].mxu1 }
 0x9f5   :  { %v3806_v9 = vmul.f32 0.5, %v3799_v52  ;;  %v3811_v63 = vmul.f32 0.5, %v3801_v21  ;;  %v8556_v14 = vld [vmem:[%s8979_s3 + $0x104] ss:$16 sps:$4 sm:$0xff]  }
 0x9f6   :  { %7069 = vtanh.f32 %v3802_v59 }
 0x9f7   :  { %7071 = vtanh.f32 %v3806_v9  ;;  %v8561_v9 = vld [vmem:[%s8979_s3 + $0x10c] ss:$16 sps:$4 sm:$0xff]  }
 0x9f8   :  { %7073 = vtanh.f32 %v3800_v50 }
 0x9f9   :  { %7075 = vtanh.f32 %v3811_v63  ;;  %v8566_v63 = vld [vmem:[%s8979_s3 + $0x100] ss:$16 sps:$4 sm:$0xff]  }
 0xa00   :  { %v7070_v3 = vpop.eup %7069 }
 0xa01   :  { %v7072_v23 = vpop.eup %7071  ;;  %v3804_v26 = vmul.f32 0.5, %v7070_v3  ;;  %v8571_v3 = vld [vmem:[%s8979_s3 + $0x108] ss:$16 sps:$4 sm:$0xff]  }
 0xa02   :  { %v3808_v45 = vmul.f32 0.5, %v7072_v23  ;;  %v7074_v46 = vpop.eup %7073  ;;  %v8580_v23 = vld [vmem:[%s8979_s3 + $0x124] ss:$16 sps:$4 sm:$0xff]  }
 0xa03   :  { %v3805_v61 = vadd.f32 0.5, %v3804_v26  ;;  %v7076_v32 = vpop.eup %7075  ;;  %v8585_v26 = vld [vmem:[%s8979_s3 + $0x12c] ss:$16 sps:$4 sm:$0xff]  }
 0xa04   :  { %v3809_v34 = vadd.f32 0.5, %v3808_v45  ;;  %v3813_v58 = vmul.f32 0.5, %v7076_v32  ;;  %v8590_v45 = vld [vmem:[%s8979_s3 + $0x120] ss:$16 sps:$4 sm:$0xff]   ;;  %v8633_v32 = vld [vmem:[%s8979_s3 + $0x16c] ss:$16 sps:$4 sm:$0xff]  }
 0xa05   :  { %v3816_v44 = vmul.f32 %v7074_v46, %v3805_v61  ;;  %v8595_v61 = vld [vmem:[%s8979_s3 + $0x128] ss:$16 sps:$4 sm:$0xff]   ;;  %v8604_v46 = vld [vmem:[%s8979_s3 + $0x144] ss:$16 sps:$4 sm:$0xff]  }
 0xa06   :  { %v3815_v47 = vmul.f32 %v3809_v34, %v8446_v4  ;;  %v3814_v35 = vadd.f32 0.5, %v3813_v58  ;;  %v8609_v34 = vld [vmem:[%s8979_s3 + $0x14c] ss:$16 sps:$4 sm:$0xff]   ;;  %v8638_v58 = vld [vmem:[%s8979_s3 + $0x160] ss:$16 sps:$4 sm:$0xff]  }
 0xa08   :  { %v8496_v43 = vadd.f32 %v3816_v44, %v3815_v47  ;;  %v8614_v44 = vld [vmem:[%s8979_s3 + $0x140] ss:$16 sps:$4 sm:$0xff]   ;;  %v8619_v47 = vld [vmem:[%s8979_s3 + $0x148] ss:$16 sps:$4 sm:$0xff]  }
 0xa0a   :  { %7077 = vtanh.f32 %v8496_v43 }
 0xa14   :  { %v7078_v7 = vpop.eup %7077 }
 0xa15   :  { %v8499_v51 = vmul.f32 %v7078_v7, %v3814_v35  ;;  %v8643_v35 = vld [vmem:[%s8979_s3 + $0x168] ss:$16 sps:$4 sm:$0xff]   ;;  %v8652_v7 = vld [vmem:[%s8979_s3 + $0x184] ss:$16 sps:$4 sm:$0xff]  }
 0xa17   :  { %v3829_v50 = vpack.c.bf16 %v8499_v51, %v8499_v51 }
 0xa19   :  { %4055 = vmatmul.mubr.bf16.vlgmr.msra.gmra.mrb[56].mxu0 %v3829_v50  ;;  %4096 = vmatmul.mubr.bf16.vlgmr.msra.gmra.mrb[88].mxu1 %v3829_v50  ;;  %v8657_v50 = vld [vmem:[%s8979_s3 + $0x18c] ss:$16 sps:$4 sm:$0xff]  }
 0xa1a   :  { %4329 = vmatpush1.bf16.msra.mxu0 %v8130_v53  ;;  %4370 = vmatpush1.bf16.msra.mxu1 %v8135_v55  ;;  %v9063_v53 = vld [vmem:[#allocation15_spill] sm:$0xff] }
 0xa1b   :  { %4330 = vmatprep.subr.bf16.mxu0 %v8144_v16  ;;  %4371 = vmatprep.subr.bf16.mxu1 %v8149_v29  ;;  %v3075_v55 = vadd.f32 %v9063_v53, %v8420_v33  ;;  %v9064_v16 = vld [vmem:[#allocation7_spill] sm:$0xff]  ;;  %v8662_v53 = vld [vmem:[%s8979_s3 + $0x180] ss:$16 sps:$4 sm:$0xff]  }
 0xa1c   :  { %4360 = vmatprep.mubr.bf16.mxu0 %v9015_v48  ;;  %4401 = vmatprep.mubr.bf16.mxu1 %v9015_v48  ;;  %v3148_v29 = vadd.f32 %v9064_v16, %v8424_v60  ;;  %v8676_v16 = vld [vmem:[%s8979_s3 + $0x1a4] ss:$16 sps:$4 sm:$0xff]  }
 0xa1e   :  { %4331 = vmatpush1.bf16.msra.mxu0 %v8154_v36  ;;  %4372 = vmatpush1.bf16.msra.mxu1 %v8159_v12  ;;  %v9065_v36 = vld [vmem:[#allocation16_spill] sm:$0xff] }
 0xa1f   :  { %4332 = vmatprep.subr.bf16.mxu0 %v8168_v13  ;;  %4373 = vmatprep.subr.bf16.mxu1 %v8173_v37  ;;  %v3077_v12 = vadd.f32 %v9065_v36, %v8432_v5  ;;  %v9066_v13 = vld [vmem:[#allocation8_spill] sm:$0xff] }
 0xa20   :  { %v3150_v37 = vadd.f32 %v9066_v13, %v8436_v17  ;;  %v8686_v36 = vld [vmem:[%s8979_s3 + $0x1a0] ss:$16 sps:$4 sm:$0xff]   ;;  %v8700_v13 = vld [vmem:[%s8979_s3 + $0x1c4] ss:$16 sps:$4 sm:$0xff]  }
 0xa22   :  { %4333 = vmatpush1.bf16.msra.mxu0 %v8178_v38  ;;  %4374 = vmatpush1.bf16.msra.mxu1 %v8183_v39 }
 0xa23   :  { %4334 = vmatprep.subr.bf16.mxu0 %v8190_v40  ;;  %4375 = vmatprep.subr.bf16.mxu1 %v8207_v18 }
 0xa26   :  { %4335 = vmatpush1.bf16.msra.mxu0 %v8197_v41  ;;  %4376 = vmatpush1.bf16.msra.mxu1 %v8202_v24 }
 0xa27   :  { %4336 = vmatprep.subr.bf16.mxu0 %v8216_v54  ;;  %4377 = vmatprep.subr.bf16.mxu1 %v8221_v42 }
 0xa2a   :  { %4337 = vmatpush1.bf16.msra.mxu0 %v8226_v20  ;;  %4378 = vmatpush1.bf16.msra.mxu1 %v8231_v22 }
 0xa2b   :  { %4338 = vmatprep.subr.bf16.mxu0 %v8240_v49  ;;  %4379 = vmatprep.subr.bf16.mxu1 %v8245_v62 }
 0xa2e   :  { %4339 = vmatpush1.bf16.msra.mxu0 %v8250_v0  ;;  %4380 = vmatpush1.bf16.msra.mxu1 %v8255_v19 }
 0xa2f   :  { %4340 = vmatprep.subr.bf16.mxu0 %v8264_v11  ;;  %4381 = vmatprep.subr.bf16.mxu1 %v8269_v31 }
 0xa32   :  { %4341 = vmatpush1.bf16.msra.mxu0 %v8274_v27  ;;  %4382 = vmatpush1.bf16.msra.mxu1 %v8279_v28 }
 0xa33   :  { %4342 = vmatprep.subr.bf16.mxu0 %v8288_v56  ;;  %4383 = vmatprep.subr.bf16.mxu1 %v8293_v10 }
 0xa36   :  { %4343 = vmatpush1.bf16.msra.mxu0 %v8298_v25  ;;  %4384 = vmatpush1.bf16.msra.mxu1 %v8303_v2 }
 0xa37   :  { %4634 = vmatprep.subr.bf16.mxu0 %v8556_v14  ;;  %4675 = vmatprep.subr.bf16.mxu1 %v8561_v9 }
 0xaec   :  { %v4056_v38 = vpop.f32.mrb[56].mxu0  ;;  %v4097_v39 = vpop.f32.mrb[88].mxu1 }
 0xaed   :  { %v4104_v40 = vadd.f32 %v4056_v38, %v3075_v55  ;;  %v4106_v41 = vadd.f32 %v4097_v39, %v3148_v29  ;;  %v4058_v24 = vpop.f32.mrb[57].mxu0  ;;  %v4099_v18 = vpop.f32.mrb[89].mxu1  ;;  %v8667_v55 = vld [vmem:[%s8979_s3 + $0x188] ss:$16 sps:$4 sm:$0xff]   ;;  %v8681_v29 = vld [vmem:[%s8979_s3 + $0x1ac] ss:$16 sps:$4 sm:$0xff]  }
 0xaee   :  { %v4105_v54 = vadd.f32 %v4058_v24, %v3077_v12  ;;  %v4107_v42 = vadd.f32 %v4099_v18, %v3150_v37  ;;  %v4060_v20 = vpop.f32.mrb[58].mxu0  ;;  %v4101_v22 = vpop.f32.mrb[90].mxu1  ;;  %v8691_v12 = vld [vmem:[%s8979_s3 + $0x1a8] ss:$16 sps:$4 sm:$0xff]   ;;  %v8705_v37 = vld [vmem:[%s8979_s3 + $0x1cc] ss:$16 sps:$4 sm:$0xff]  }
 0xaef   :  { %v4108_v49 = vmul.f32 0.5, %v4104_v40  ;;  %v4061_v62 = vpop.f32.mrb[59].mxu0  ;;  %v4102_v0 = vpop.f32.mrb[91].mxu1  ;;  %v8710_v38 = vld [vmem:[%s8979_s3 + $0x1c0] ss:$16 sps:$4 sm:$0xff]   ;;  %v9068_v20 = vld [vmem:[#allocation9_spill] sm:$0xff] }
 0xaf0   :  { %v4112_v19 = vmul.f32 0.5, %v4105_v54  ;;  %v4117_v11 = vmul.f32 0.5, %v4107_v42  ;;  %v8715_v39 = vld [vmem:[%s8979_s3 + $0x1c8] ss:$16 sps:$4 sm:$0xff]   ;;  %v8724_v40 = vld [vmem:[%s8979_s3 + $0x1e4] ss:$16 sps:$4 sm:$0xff]   ;;  %v3152_v22 = vadd.f32 %v9068_v20, %v8424_v60 }
 0xaf1   :  { %7079 = vtanh.f32 %v4108_v49  ;;  %v8734_v24 = vld [vmem:[%s8979_s3 + $0x1e0] ss:$16 sps:$4 sm:$0xff]   ;;  %v8739_v18 = vld [vmem:[%s8979_s3 + $0x1e8] ss:$16 sps:$4 sm:$0xff]  }
 0xaf2   :  { %7081 = vtanh.f32 %v4112_v19  ;;  %v9067_v54 = vld [vmem:[#allocation17_spill] sm:$0xff]  ;;  %v9069_v49 = vld [vmem:[#allocation18_spill] sm:$0xff] }
 0xaf3   :  { %7083 = vtanh.f32 %v4106_v41  ;;  %v8729_v41 = vld [vmem:[%s8979_s3 + $0x1ec] ss:$16 sps:$4 sm:$0xff]   ;;  %v3079_v42 = vadd.f32 %v9067_v54, %v8420_v33  ;;  %v3081_v62 = vadd.f32 %v9069_v49, %v8432_v5  ;;  %v9070_v0 = vld [vmem:[#allocation10_spill] sm:$0xff] }
 0xaf4   :  { %7085 = vtanh.f32 %v4117_v11  ;;  %v3154_v19 = vadd.f32 %v9070_v0, %v8436_v17 }
 0xafb   :  { %v7080_v31 = vpop.eup %7079 }
 0xafc   :  { %v7082_v27 = vpop.eup %7081  ;;  %v4110_v28 = vmul.f32 0.5, %v7080_v31 }
 0xafd   :  { %v4114_v56 = vmul.f32 0.5, %v7082_v27  ;;  %v7084_v25 = vpop.eup %7083 }
 0xafe   :  { %v4111_v10 = vadd.f32 0.5, %v4110_v28  ;;  %v7086_v52 = vpop.eup %7085 }
 0xaff   :  { %v4115_v2 = vadd.f32 0.5, %v4114_v56  ;;  %v4119_v21 = vmul.f32 0.5, %v7086_v52 }
 0xb00   :  { %v4122_v4 = vmul.f32 %v7084_v25, %v4111_v10 }
 0xb01   :  { %v4121_v1 = vmul.f32 %v4115_v2, %v8496_v43  ;;  %v4120_v30 = vadd.f32 0.5, %v4119_v21  ;;  %v8628_v43 = vld [vmem:[%s8979_s3 + $0x164] ss:$16 sps:$4 sm:$0xff]  }
 0xb03   :  { %v8544_v57 = vadd.f32 %v4122_v4, %v4121_v1 }
 0xb05   :  { %7087 = vtanh.f32 %v8544_v57 }
 0xb0f   :  { %v7088_v8 = vpop.eup %7087 }
 0xb10   :  { %v8547_v59 = vmul.f32 %v7088_v8, %v4120_v30 }
 0xb12   :  { %v4135_v15 = vpack.c.bf16 %v8547_v59, %v8547_v59 }
 0xb14   :  { %4361 = vmatmul.mubr.bf16.vlgmr.msra.gmra.mrb[60].mxu0 %v4135_v15  ;;  %4402 = vmatmul.mubr.bf16.vlgmr.msra.gmra.mrb[92].mxu1 %v4135_v15 }
 0xb15   :  { %4666 = vmatprep.mubr.bf16.mxu0 %v9015_v48  ;;  %4707 = vmatprep.mubr.bf16.mxu1 %v9015_v48 }
 0xb16   :  { %4635 = vmatpush1.bf16.msra.mxu0 %v8566_v63  ;;  %4676 = vmatpush1.bf16.msra.mxu1 %v8571_v3 }
 0xb17   :  { %4636 = vmatprep.subr.bf16.mxu0 %v8580_v23  ;;  %4677 = vmatprep.subr.bf16.mxu1 %v8585_v26 }
 0xb1a   :  { %4637 = vmatpush1.bf16.msra.mxu0 %v8590_v45  ;;  %4678 = vmatpush1.bf16.msra.mxu1 %v8595_v61 }
 0xb1b   :  { %4638 = vmatprep.subr.bf16.mxu0 %v8604_v46  ;;  %4679 = vmatprep.subr.bf16.mxu1 %v8609_v34 }
 0xb1e   :  { %4639 = vmatpush1.bf16.msra.mxu0 %v8614_v44  ;;  %4680 = vmatpush1.bf16.msra.mxu1 %v8619_v47 }
 0xb1f   :  { %4640 = vmatprep.subr.bf16.mxu0 %v8628_v43  ;;  %4681 = vmatprep.subr.bf16.mxu1 %v8633_v32 }
 0xb22   :  { %4641 = vmatpush1.bf16.msra.mxu0 %v8638_v58  ;;  %4682 = vmatpush1.bf16.msra.mxu1 %v8643_v35 }
 0xb23   :  { %4642 = vmatprep.subr.bf16.mxu0 %v8652_v7  ;;  %4683 = vmatprep.subr.bf16.mxu1 %v8657_v50 }
 0xb26   :  { %4643 = vmatpush1.bf16.msra.mxu0 %v8662_v53  ;;  %4684 = vmatpush1.bf16.msra.mxu1 %v8667_v55 }
 0xb27   :  { %4644 = vmatprep.subr.bf16.mxu0 %v8676_v16  ;;  %4685 = vmatprep.subr.bf16.mxu1 %v8681_v29 }
 0xb2a   :  { %4645 = vmatpush1.bf16.msra.mxu0 %v8686_v36  ;;  %4686 = vmatpush1.bf16.msra.mxu1 %v8691_v12 }
 0xb2b   :  { %4646 = vmatprep.subr.bf16.mxu0 %v8700_v13  ;;  %4687 = vmatprep.subr.bf16.mxu1 %v8705_v37 }
 0xb2e   :  { %4647 = vmatpush1.bf16.msra.mxu0 %v8710_v38  ;;  %4688 = vmatpush1.bf16.msra.mxu1 %v8715_v39 }
 0xb2f   :  { %4648 = vmatprep.subr.bf16.mxu0 %v8724_v40  ;;  %4689 = vmatprep.subr.bf16.mxu1 %v8729_v41 }
 0xb32   :  { %4649 = vmatpush1.bf16.msra.mxu0 %v8734_v24  ;;  %4690 = vmatpush1.bf16.msra.mxu1 %v8739_v18 }
 0xb33   :  { %4940 = vmatprep.subr.bf16.mxu0 %v8556_v14  ;;  %4981 = vmatprep.subr.bf16.mxu1 %v8561_v9 }
 0xbe7   :  { %v4362_v11 = vpop.f32.mrb[60].mxu0  ;;  %v4403_v31 = vpop.f32.mrb[92].mxu1 }
 0xbe8   :  { %v4410_v27 = vadd.f32 %v4362_v11, %v3079_v42  ;;  %v4412_v28 = vadd.f32 %v4403_v31, %v3152_v22  ;;  %v4364_v56 = vpop.f32.mrb[61].mxu0  ;;  %v4405_v10 = vpop.f32.mrb[93].mxu1 }
 0xbe9   :  { %v4411_v25 = vadd.f32 %v4364_v56, %v3081_v62  ;;  %v4413_v2 = vadd.f32 %v4405_v10, %v3154_v19  ;;  %v4366_v4 = vpop.f32.mrb[62].mxu0  ;;  %v4407_v1 = vpop.f32.mrb[94].mxu1 }
 0xbea   :  { %v4414_v52 = vmul.f32 0.5, %v4410_v27  ;;  %v4367_v21 = vpop.f32.mrb[63].mxu0  ;;  %v4408_v30 = vpop.f32.mrb[95].mxu1  ;;  %v9073_v1 = vld [vmem:[#allocation11_spill] sm:$0xff] }
 0xbeb   :  { %v4418_v8 = vmul.f32 0.5, %v4411_v25  ;;  %v4423_v15 = vmul.f32 0.5, %v4413_v2  ;;  %v9074_v21 = vld [vmem:[#allocation20_spill] sm:$0xff] }
 0xbec   :  { %7089 = vtanh.f32 %v4414_v52  ;;  %v3158_v52 = vadd.f32 %v9073_v1, %v8424_v60  ;;  %v3087_v30 = vadd.f32 %v9074_v21, %v8432_v5 }
 0xbed   :  { %7091 = vtanh.f32 %v4418_v8  ;;  %v9075_v8 = vld [vmem:[#allocation12_spill] sm:$0xff] }
 0xbee   :  { %7093 = vtanh.f32 %v4412_v28 }
 0xbef   :  { %7095 = vtanh.f32 %v4423_v15  ;;  %v3160_v15 = vadd.f32 %v9075_v8, %v8436_v17 }
 0xbf6   :  { %v7090_v54 = vpop.eup %7089 }
 0xbf7   :  { %v7092_v20 = vpop.eup %7091  ;;  %v4416_v49 = vmul.f32 0.5, %v7090_v54 }
 0xbf8   :  { %v4420_v0 = vmul.f32 0.5, %v7092_v20  ;;  %v7094_v22 = vpop.eup %7093 }
 0xbf9   :  { %v4417_v42 = vadd.f32 0.5, %v4416_v49  ;;  %v7096_v27 = vpop.eup %7095 }
 0xbfa   :  { %v4421_v11 = vadd.f32 0.5, %v4420_v0  ;;  %v4425_v56 = vmul.f32 0.5, %v7096_v27 }
 0xbfb   :  { %v4428_v62 = vmul.f32 %v7094_v22, %v4417_v42 }
 0xbfc   :  { %v4427_v19 = vmul.f32 %v4421_v11, %v8544_v57  ;;  %v4426_v10 = vadd.f32 0.5, %v4425_v56  ;;  %v9072_v57 = vld [vmem:[#allocation19_spill] sm:$0xff] }
 0xbfd   :  { %v3085_v4 = vadd.f32 %v9072_v57, %v8420_v33 }
 0xbfe   :  { %v8756_v31 = vadd.f32 %v4428_v62, %v4427_v19 }
 0xc00   :  { %7097 = vtanh.f32 %v8756_v31 }
 0xc0a   :  { %v7098_v28 = vpop.eup %7097 }
 0xc0b   :  { %v8759_v25 = vmul.f32 %v7098_v28, %v4426_v10 }
 0xc0d   :  { %9071 = vst [vmem:[#allocation15_spill] sm:$0xff] %v8759_v25  ;;  %v4441_v2 = vpack.c.bf16 %v8759_v25, %v8759_v25 }
 0xc0f   :  { %4667 = vmatmul.mubr.bf16.vlgmr.msra.gmra.mrb[64].mxu0 %v4441_v2  ;;  %4708 = vmatmul.mubr.bf16.vlgmr.msra.gmra.mrb[96].mxu1 %v4441_v2 }
 0xc10   :  { %4941 = vmatpush1.bf16.msra.mxu0 %v8566_v63  ;;  %4982 = vmatpush1.bf16.msra.mxu1 %v8571_v3 }
 0xc11   :  { %4942 = vmatprep.subr.bf16.mxu0 %v8580_v23  ;;  %4983 = vmatprep.subr.bf16.mxu1 %v8585_v26 }
 0xc12   :  { %4972 = vmatprep.mubr.bf16.mxu0 %v9015_v48  ;;  %5013 = vmatprep.mubr.bf16.mxu1 %v9015_v48 }
 0xc14   :  { %4943 = vmatpush1.bf16.msra.mxu0 %v8590_v45  ;;  %4984 = vmatpush1.bf16.msra.mxu1 %v8595_v61 }
 0xc15   :  { %4944 = vmatprep.subr.bf16.mxu0 %v8604_v46  ;;  %4985 = vmatprep.subr.bf16.mxu1 %v8609_v34 }
 0xc18   :  { %4945 = vmatpush1.bf16.msra.mxu0 %v8614_v44  ;;  %4986 = vmatpush1.bf16.msra.mxu1 %v8619_v47 }
 0xc19   :  { %4946 = vmatprep.subr.bf16.mxu0 %v8628_v43  ;;  %4987 = vmatprep.subr.bf16.mxu1 %v8633_v32 }
 0xc1c   :  { %4947 = vmatpush1.bf16.msra.mxu0 %v8638_v58  ;;  %4988 = vmatpush1.bf16.msra.mxu1 %v8643_v35 }
 0xc1d   :  { %4948 = vmatprep.subr.bf16.mxu0 %v8652_v7  ;;  %4989 = vmatprep.subr.bf16.mxu1 %v8657_v50 }
 0xc20   :  { %4949 = vmatpush1.bf16.msra.mxu0 %v8662_v53  ;;  %4990 = vmatpush1.bf16.msra.mxu1 %v8667_v55 }
 0xc21   :  { %4950 = vmatprep.subr.bf16.mxu0 %v8676_v16  ;;  %4991 = vmatprep.subr.bf16.mxu1 %v8681_v29 }
 0xc24   :  { %4951 = vmatpush1.bf16.msra.mxu0 %v8686_v36  ;;  %4992 = vmatpush1.bf16.msra.mxu1 %v8691_v12 }
 0xc25   :  { %4952 = vmatprep.subr.bf16.mxu0 %v8700_v13  ;;  %4993 = vmatprep.subr.bf16.mxu1 %v8705_v37 }
 0xc28   :  { %4953 = vmatpush1.bf16.msra.mxu0 %v8710_v38  ;;  %4994 = vmatpush1.bf16.msra.mxu1 %v8715_v39 }
 0xc29   :  { %4954 = vmatprep.subr.bf16.mxu0 %v8724_v40  ;;  %4995 = vmatprep.subr.bf16.mxu1 %v8729_v41 }
 0xc2c   :  { %4955 = vmatpush1.bf16.msra.mxu0 %v8734_v24  ;;  %4996 = vmatpush1.bf16.msra.mxu1 %v8739_v18 }
 0xc2d   :  { %5246 = vmatprep.subr.bf16.mxu0 %v8556_v14  ;;  %5287 = vmatprep.subr.bf16.mxu1 %v8561_v9 }
 0xce2   :  { %v4668_v54 = vpop.f32.mrb[64].mxu0  ;;  %v4709_v20 = vpop.f32.mrb[96].mxu1 }
 0xce3   :  { %v4716_v49 = vadd.f32 %v4668_v54, %v3085_v4  ;;  %v4718_v0 = vadd.f32 %v4709_v20, %v3158_v52  ;;  %v4670_v42 = vpop.f32.mrb[65].mxu0  ;;  %v4711_v22 = vpop.f32.mrb[97].mxu1 }
 0xce4   :  { %v4717_v11 = vadd.f32 %v4670_v42, %v3087_v30  ;;  %v4719_v62 = vadd.f32 %v4711_v22, %v3160_v15  ;;  %v4672_v19 = vpop.f32.mrb[66].mxu0  ;;  %v4713_v27 = vpop.f32.mrb[98].mxu1 }
 0xce5   :  { %v4720_v56 = vmul.f32 0.5, %v4716_v49  ;;  %v4673_v10 = vpop.f32.mrb[67].mxu0  ;;  %v4714_v28 = vpop.f32.mrb[99].mxu1  ;;  %v9077_v19 = vld [vmem:[#allocation13_spill] sm:$0xff] }
 0xce6   :  { %v4724_v2 = vmul.f32 0.5, %v4717_v11  ;;  %v4729_v57 = vmul.f32 0.5, %v4719_v62  ;;  %v3162_v27 = vadd.f32 %v9077_v19, %v8424_v60  ;;  %v9079_v28 = vld [vmem:[#allocation14_spill] sm:$0xff] }
 0xce7   :  { %7099 = vtanh.f32 %v4720_v56  ;;  %v9078_v56 = vld [vmem:[#allocation22_spill] sm:$0xff] }
 0xce8   :  { %7101 = vtanh.f32 %v4724_v2  ;;  %v3091_v10 = vadd.f32 %v9078_v56, %v8432_v5  ;;  %v3164_v2 = vadd.f32 %v9079_v28, %v8436_v17 }
 0xce9   :  { %7103 = vtanh.f32 %v4718_v0 }
 0xcea   :  { %7105 = vtanh.f32 %v4729_v57 }
 0xcf1   :  { %v7100_v1 = vpop.eup %7099 }
 0xcf2   :  { %v7102_v21 = vpop.eup %7101  ;;  %v4722_v8 = vmul.f32 0.5, %v7100_v1 }
 0xcf3   :  { %v4726_v25 = vmul.f32 0.5, %v7102_v21  ;;  %v7104_v52 = vpop.eup %7103 }
 0xcf4   :  { %v4723_v4 = vadd.f32 0.5, %v4722_v8  ;;  %v7106_v49 = vpop.eup %7105 }
 0xcf5   :  { %v4727_v54 = vadd.f32 0.5, %v4726_v25  ;;  %v4731_v42 = vmul.f32 0.5, %v7106_v49 }
 0xcf6   :  { %v4734_v30 = vmul.f32 %v7104_v52, %v4723_v4 }
 0xcf7   :  { %v4733_v15 = vmul.f32 %v4727_v54, %v8756_v31  ;;  %v4732_v22 = vadd.f32 0.5, %v4731_v42  ;;  %v9076_v31 = vld [vmem:[#allocation21_spill] sm:$0xff] }
 0xcf8   :  { %v3089_v25 = vadd.f32 %v9076_v31, %v8420_v33 }
 0xcf9   :  { %v8806_v20 = vadd.f32 %v4734_v30, %v4733_v15 }
 0xcfb   :  { %7107 = vtanh.f32 %v8806_v20 }
 0xd05   :  { %v7108_v0 = vpop.eup %7107 }
 0xd06   :  { %v8809_v11 = vmul.f32 %v7108_v0, %v4732_v22 }
 0xd08   :  { %v4747_v62 = vpack.c.bf16 %v8809_v11, %v8809_v11 }
 0xd0a   :  { %4973 = vmatmul.mubr.bf16.vlgmr.msra.gmra.mrb[68].mxu0 %v4747_v62  ;;  %5014 = vmatmul.mubr.bf16.vlgmr.msra.gmra.mrb[100].mxu1 %v4747_v62 }
 0xd0b   :  { %5247 = vmatpush1.bf16.msra.mxu0 %v8566_v63  ;;  %5288 = vmatpush1.bf16.msra.mxu1 %v8571_v3 }
 0xd0c   :  { %5248 = vmatprep.subr.bf16.mxu0 %v8580_v23  ;;  %5289 = vmatprep.subr.bf16.mxu1 %v8585_v26 }
 0xd0d   :  { %5278 = vmatprep.mubr.bf16.mxu0 %v9015_v48  ;;  %5319 = vmatprep.mubr.bf16.mxu1 %v9015_v48 }
 0xd0f   :  { %5249 = vmatpush1.bf16.msra.mxu0 %v8590_v45  ;;  %5290 = vmatpush1.bf16.msra.mxu1 %v8595_v61 }
 0xd10   :  { %5250 = vmatprep.subr.bf16.mxu0 %v8604_v46  ;;  %5291 = vmatprep.subr.bf16.mxu1 %v8609_v34 }
 0xd13   :  { %5251 = vmatpush1.bf16.msra.mxu0 %v8614_v44  ;;  %5292 = vmatpush1.bf16.msra.mxu1 %v8619_v47 }
 0xd14   :  { %5252 = vmatprep.subr.bf16.mxu0 %v8628_v43  ;;  %5293 = vmatprep.subr.bf16.mxu1 %v8633_v32 }
 0xd17   :  { %5253 = vmatpush1.bf16.msra.mxu0 %v8638_v58  ;;  %5294 = vmatpush1.bf16.msra.mxu1 %v8643_v35 }
 0xd18   :  { %5254 = vmatprep.subr.bf16.mxu0 %v8652_v7  ;;  %5295 = vmatprep.subr.bf16.mxu1 %v8657_v50 }
 0xd1b   :  { %5255 = vmatpush1.bf16.msra.mxu0 %v8662_v53  ;;  %5296 = vmatpush1.bf16.msra.mxu1 %v8667_v55 }
 0xd1c   :  { %5256 = vmatprep.subr.bf16.mxu0 %v8676_v16  ;;  %5297 = vmatprep.subr.bf16.mxu1 %v8681_v29 }
 0xd1f   :  { %5257 = vmatpush1.bf16.msra.mxu0 %v8686_v36  ;;  %5298 = vmatpush1.bf16.msra.mxu1 %v8691_v12 }
 0xd20   :  { %5258 = vmatprep.subr.bf16.mxu0 %v8700_v13  ;;  %5299 = vmatprep.subr.bf16.mxu1 %v8705_v37 }
 0xd23   :  { %5259 = vmatpush1.bf16.msra.mxu0 %v8710_v38  ;;  %5300 = vmatpush1.bf16.msra.mxu1 %v8715_v39 }
 0xd24   :  { %5260 = vmatprep.subr.bf16.mxu0 %v8724_v40  ;;  %5301 = vmatprep.subr.bf16.mxu1 %v8729_v41 }
 0xd27   :  { %5261 = vmatpush1.bf16.msra.mxu0 %v8734_v24  ;;  %5302 = vmatpush1.bf16.msra.mxu1 %v8739_v18 }
 0xd28   :  { %5552 = vmatprep.subr.bf16.mxu0 %v8556_v14  ;;  %5593 = vmatprep.subr.bf16.mxu1 %v8561_v9 }
 0xddd   :  { %v4974_v57 = vpop.f32.mrb[68].mxu0  ;;  %v5015_v1 = vpop.f32.mrb[100].mxu1 }
 0xdde   :  { %v5022_v21 = vadd.f32 %v4974_v57, %v3089_v25  ;;  %v5024_v8 = vadd.f32 %v5015_v1, %v3162_v27  ;;  %v4976_v4 = vpop.f32.mrb[69].mxu0  ;;  %v5017_v14 = vpop.f32.mrb[101].mxu1 }
 0xddf   :  { %v5023_v52 = vadd.f32 %v4976_v4, %v3091_v10  ;;  %v5025_v9 = vadd.f32 %v5017_v14, %v3164_v2  ;;  %v4978_v54 = vpop.f32.mrb[70].mxu0  ;;  %v5019_v30 = vpop.f32.mrb[102].mxu1 }
 0xde0   :  { %v5026_v15 = vmul.f32 0.5, %v5022_v21  ;;  %v4979_v49 = vpop.f32.mrb[71].mxu0  ;;  %v5020_v42 = vpop.f32.mrb[103].mxu1 }
 0xde1   :  { %v5030_v22 = vmul.f32 0.5, %v5023_v52  ;;  %v5035_v0 = vmul.f32 0.5, %v5025_v9 }
 0xde2   :  { %7109 = vtanh.f32 %v5026_v15 }
 0xde3   :  { %7111 = vtanh.f32 %v5030_v22 }
 0xde4   :  { %7113 = vtanh.f32 %v5024_v8 }
 0xde5   :  { %7115 = vtanh.f32 %v5035_v0 }
 0xdec   :  { %v7110_v62 = vpop.eup %7109 }
 0xded   :  { %v7112_v31 = vpop.eup %7111  ;;  %v5028_v19 = vmul.f32 0.5, %v7110_v62  ;;  %v6972_v62 = vld [vmem:[%s8983_s5 + $0x8] sm:$0xff]  }
 0xdee   :  { %v5032_v56 = vmul.f32 0.5, %v7112_v31  ;;  %v7114_v27 = vpop.eup %7113  ;;  %v5667_v31 = vpack.c.bf16 %v8499_v51, %v8449_v6  ;;  %v6975_v6 = vld [vmem:[%s8983_s5 + $0x20] sm:$0xff]   ;;  %v6976_v51 = vld [vmem:[%s8983_s5 + $0x28] sm:$0xff]  }
 0xdef   :  { %v5029_v25 = vadd.f32 0.5, %v5028_v19  ;;  %v7116_v1 = vpop.eup %7115  ;;  %v6973_v19 = vld [vmem:[%s8983_s5 + $0x10] sm:$0xff]  }
 0xdf0   :  { %v5033_v28 = vadd.f32 0.5, %v5032_v56  ;;  %v5037_v21 = vmul.f32 0.5, %v7116_v1  ;;  %v6974_v56 = vld [vmem:[%s8983_s5 + $0x18] sm:$0xff]  }
 0xdf1   :  { %v5040_v10 = vmul.f32 %v7114_v27, %v5029_v25  ;;  %v6977_v25 = vld [vmem:[%s8983_s5 + $0x30] sm:$0xff]   ;;  %v6978_v27 = vld [vmem:[%s8983_s5 + $0x38] sm:$0xff]  }
 0xdf2   :  { %v5039_v2 = vmul.f32 %v5033_v28, %v8806_v20  ;;  %v5038_v4 = vadd.f32 0.5, %v5037_v21  ;;  %v9084_v28 = vld [vmem:[#allocation15_spill] sm:$0xff]  ;;  %v9086_v21 = vld [vmem:[#allocation28_spill] sm:$0xff] }
 0xdf4   :  { %v8856_v57 = vadd.f32 %v5040_v10, %v5039_v2  ;;  %v5668_v10 = vpack.c.bf16 %v9084_v28, %v8547_v59 }
 0xdf6   :  { %7117 = vtanh.f32 %v8856_v57 }
 0xe00   :  { %v7118_v8 = vpop.eup %7117 }
 0xe01   :  { %v8859_v14 = vmul.f32 %v7118_v8, %v5038_v4  ;;  %v3172_v4 = vadd.f32 %v9086_v21, %v8424_v60  ;;  %v9087_v8 = vld [vmem:[#allocation6_spill] sm:$0xff] }
 0xe03   :  { %v5053_v52 = vpack.c.bf16 %v8859_v14, %v8859_v14  ;;  %v5669_v2 = vpack.c.bf16 %v8859_v14, %v8809_v11 }
 0xe05   :  { %5279 = vmatmul.mubr.bf16.vlgmr.msra.gmra.mrb[72].mxu0 %v5053_v52  ;;  %5320 = vmatmul.mubr.bf16.vlgmr.msra.gmra.mrb[104].mxu1 %v5053_v52  ;;  %v3101_v52 = vadd.f32 %v9087_v8, %v8432_v5 }
 0xe06   :  { %5553 = vmatpush1.bf16.msra.mxu0 %v8566_v63  ;;  %5594 = vmatpush1.bf16.msra.mxu1 %v8571_v3  ;;  %v9080_v63 = vld [vmem:[#allocation23_spill] sm:$0xff] }
 0xe07   :  { %5554 = vmatprep.subr.bf16.mxu0 %v8580_v23  ;;  %5595 = vmatprep.subr.bf16.mxu1 %v8585_v26  ;;  %v3095_v3 = vadd.f32 %v9080_v63, %v8420_v33  ;;  %v9081_v23 = vld [vmem:[#allocation24_spill] sm:$0xff] }
 0xe08   :  { %5584 = vmatprep.mubr.bf16.mxu0 %v9015_v48  ;;  %5625 = vmatprep.mubr.bf16.mxu1 %v9015_v48  ;;  %v6971_v48 = vld [vmem:[%s8983_s5] sm:$0xff]   ;;  %v3168_v26 = vadd.f32 %v9081_v23, %v8424_v60 }
 0xe0a   :  { %5555 = vmatpush1.bf16.msra.mxu0 %v8590_v45  ;;  %5596 = vmatpush1.bf16.msra.mxu1 %v8595_v61  ;;  %v9082_v45 = vld [vmem:[#allocation25_spill] sm:$0xff] }
 0xe0b   :  { %5556 = vmatprep.subr.bf16.mxu0 %v8604_v46  ;;  %5597 = vmatprep.subr.bf16.mxu1 %v8609_v34  ;;  %v3097_v61 = vadd.f32 %v9082_v45, %v8432_v5  ;;  %v9083_v46 = vld [vmem:[#allocation26_spill] sm:$0xff] }
 0xe0c   :  { %v3170_v34 = vadd.f32 %v9083_v46, %v8436_v17 }
 0xe0e   :  { %5557 = vmatpush1.bf16.msra.mxu0 %v8614_v44  ;;  %5598 = vmatpush1.bf16.msra.mxu1 %v8619_v47 }
 0xe0f   :  { %5558 = vmatprep.subr.bf16.mxu0 %v8628_v43  ;;  %5599 = vmatprep.subr.bf16.mxu1 %v8633_v32 }
 0xe12   :  { %5559 = vmatpush1.bf16.msra.mxu0 %v8638_v58  ;;  %5600 = vmatpush1.bf16.msra.mxu1 %v8643_v35 }
 0xe13   :  { %5560 = vmatprep.subr.bf16.mxu0 %v8652_v7  ;;  %5601 = vmatprep.subr.bf16.mxu1 %v8657_v50 }
 0xe16   :  { %5561 = vmatpush1.bf16.msra.mxu0 %v8662_v53  ;;  %5602 = vmatpush1.bf16.msra.mxu1 %v8667_v55 }
 0xe17   :  { %5562 = vmatprep.subr.bf16.mxu0 %v8676_v16  ;;  %5603 = vmatprep.subr.bf16.mxu1 %v8681_v29 }
 0xe1a   :  { %5563 = vmatpush1.bf16.msra.mxu0 %v8686_v36  ;;  %5604 = vmatpush1.bf16.msra.mxu1 %v8691_v12 }
 0xe1b   :  { %5564 = vmatprep.subr.bf16.mxu0 %v8700_v13  ;;  %5605 = vmatprep.subr.bf16.mxu1 %v8705_v37 }
 0xe1e   :  { %5565 = vmatpush1.bf16.msra.mxu0 %v8710_v38  ;;  %5606 = vmatpush1.bf16.msra.mxu1 %v8715_v39 }
 0xe1f   :  { %5566 = vmatprep.subr.bf16.mxu0 %v8724_v40  ;;  %5607 = vmatprep.subr.bf16.mxu1 %v8729_v41 }
 0xe22   :  { %5567 = vmatpush1.bf16.msra.mxu0 %v8734_v24  ;;  %5608 = vmatpush1.bf16.msra.mxu1 %v8739_v18 }
 0xe23   :  { %6668 = vmatprep.subr.bf16.mxu0 %v6971_v48 }
 0xed8   :  { %v5280_v44 = vpop.f32.mrb[72].mxu0  ;;  %v5321_v47 = vpop.f32.mrb[104].mxu1 }
 0xed9   :  { %v5328_v43 = vadd.f32 %v5280_v44, %v3095_v3  ;;  %v5330_v32 = vadd.f32 %v5321_v47, %v3168_v26  ;;  %v5282_v58 = vpop.f32.mrb[73].mxu0  ;;  %v5323_v35 = vpop.f32.mrb[105].mxu1 }
 0xeda   :  { %v5329_v7 = vadd.f32 %v5282_v58, %v3097_v61  ;;  %v5331_v50 = vadd.f32 %v5323_v35, %v3170_v34  ;;  %v5284_v53 = vpop.f32.mrb[74].mxu0  ;;  %v5325_v55 = vpop.f32.mrb[106].mxu1 }
 0xedb   :  { %v5332_v16 = vmul.f32 0.5, %v5328_v43  ;;  %v5285_v29 = vpop.f32.mrb[75].mxu0  ;;  %v5326_v36 = vpop.f32.mrb[107].mxu1 }
 0xedc   :  { %v5336_v12 = vmul.f32 0.5, %v5329_v7  ;;  %v5341_v13 = vmul.f32 0.5, %v5331_v50 }
 0xedd   :  { %7119 = vtanh.f32 %v5332_v16 }
 0xede   :  { %7121 = vtanh.f32 %v5336_v12  ;;  %v6647_v12 = vld [vmem:[%s8984_s6] ss:$0 sm:$0xff] }
 0xedf   :  { %7123 = vtanh.f32 %v5330_v32 }
 0xee0   :  { %7125 = vtanh.f32 %v5341_v13 }
 0xee7   :  { %v7120_v37 = vpop.eup %7119 }
 0xee8   :  { %v7122_v38 = vpop.eup %7121  ;;  %v5334_v39 = vmul.f32 0.5, %v7120_v37 }
 0xee9   :  { %v5338_v40 = vmul.f32 0.5, %v7122_v38  ;;  %v7124_v24 = vpop.eup %7123 }
 0xeea   :  { %v5335_v41 = vadd.f32 0.5, %v5334_v39  ;;  %v7126_v30 = vpop.eup %7125 }
 0xeeb   :  { %v5339_v18 = vadd.f32 0.5, %v5338_v40  ;;  %v5343_v15 = vmul.f32 0.5, %v7126_v30 }
 0xeec   :  { %v5346_v20 = vmul.f32 %v7124_v24, %v5335_v41 }
 0xeed   :  { %v5345_v9 = vmul.f32 %v5339_v18, %v8856_v57  ;;  %v5344_v49 = vadd.f32 0.5, %v5343_v15  ;;  %v9085_v57 = vld [vmem:[#allocation27_spill] sm:$0xff] }
 0xeee   :  { %v3099_v1 = vadd.f32 %v9085_v57, %v8420_v33 }
 0xeef   :  { %v8907_v54 = vadd.f32 %v5346_v20, %v5345_v9 }
 0xef1   :  { %7127 = vtanh.f32 %v8907_v54 }
 0xefb   :  { %v7128_v42 = vpop.eup %7127 }
 0xefc   :  { %v8910_v22 = vmul.f32 %v7128_v42, %v5344_v49 }
 0xefe   :  { %v5359_v0 = vpack.c.bf16 %v8910_v22, %v8910_v22 }
 0xf00   :  { %5585 = vmatmul.mubr.bf16.vlgmr.msra.gmra.mrb[76].mxu0 %v5359_v0  ;;  %5626 = vmatmul.mubr.bf16.vlgmr.msra.gmra.mrb[108].mxu1 %v5359_v0 }
 0xf01   :  { %6669 = vmatpush3.bf16.msra.mxu0 %v6971_v48  ;;  %6684 = vmatprep.mubr.bf16.mxu0 %v5667_v31  ;;  %v9088_v48 = vld [vmem:[#allocation29_spill] sm:$0xff] }
 0xf02   :  { %6670 = vmatprep.subr.bf16.mxu0 %v6972_v62  ;;  %v3174_v63 = vadd.f32 %v9088_v48, %v8436_v17 }
 0xf05   :  { %6671 = vmatpush3.bf16.msra.mxu0 %v6972_v62 }
 0xf06   :  { %6672 = vmatprep.subr.bf16.mxu0 %v6973_v19 }
 0xf09   :  { %6673 = vmatpush3.bf16.msra.mxu0 %v6973_v19 }
 0xf0a   :  { %6674 = vmatprep.subr.bf16.mxu0 %v6974_v56 }
 0xf0d   :  { %6675 = vmatpush3.bf16.msra.mxu0 %v6974_v56 }
 0xf0e   :  { %6676 = vmatprep.subr.bf16.mxu0 %v6975_v6 }
 0xf11   :  { %6677 = vmatpush3.bf16.msra.mxu0 %v6975_v6 }
 0xf12   :  { %6678 = vmatprep.subr.bf16.mxu0 %v6976_v51 }
 0xf15   :  { %6679 = vmatpush3.bf16.msra.mxu0 %v6976_v51 }
 0xf16   :  { %6680 = vmatprep.subr.bf16.mxu0 %v6977_v25 }
 0xf19   :  { %6681 = vmatpush3.bf16.msra.mxu0 %v6977_v25 }
 0xf1a   :  { %6682 = vmatprep.subr.bf16.mxu0 %v6978_v27 }
 0xf1d   :  { %6683 = vmatpush3.bf16.msra.mxu0 %v6978_v27 }
 0xf20   :  { %6685 = vmatmul.mubr.bf16.vlgmr.msra.gmra.mrb[80].mxu0 %v5668_v10 }
 0xf21   :  { %6688 = vmatprep.mubr.bf16.mxu0 %v5669_v2 }
 0xfd3   :  { %v5586_v3 = vpop.f32.mrb[76].mxu0  ;;  %v5627_v23 = vpop.f32.mrb[108].mxu1 }
 0xfd4   :  { %v5634_v59 = vadd.f32 %v5586_v3, %v3099_v1  ;;  %v5636_v26 = vadd.f32 %v5627_v23, %v3172_v4  ;;  %v5588_v45 = vpop.f32.mrb[77].mxu0  ;;  %v5629_v11 = vpop.f32.mrb[109].mxu1 }
 0xfd5   :  { %v5635_v14 = vadd.f32 %v5588_v45, %v3101_v52  ;;  %v5637_v61 = vadd.f32 %v5629_v11, %v3174_v63  ;;  %v5590_v46 = vpop.f32.mrb[78].mxu0  ;;  %v5631_v34 = vpop.f32.mrb[110].mxu1 }
 0xfd6   :  { %v5638_v33 = vmul.f32 0.5, %v5634_v59  ;;  %v5591_v44 = vpop.f32.mrb[79].mxu0  ;;  %v5632_v47 = vpop.f32.mrb[111].mxu1 }
 0xfd7   :  { %v5642_v60 = vmul.f32 0.5, %v5635_v14  ;;  %v5647_v5 = vmul.f32 0.5, %v5637_v61 }
 0xfd8   :  { %7129 = vtanh.f32 %v5638_v33 }
 0xfd9   :  { %7131 = vtanh.f32 %v5642_v60 }
 0xfda   :  { %7133 = vtanh.f32 %v5636_v26 }
 0xfdb   :  { %7135 = vtanh.f32 %v5647_v5 }
 0xfe2   :  { %v7130_v43 = vpop.eup %7129 }
 0xfe3   :  { %v7132_v17 = vpop.eup %7131  ;;  %v5640_v32 = vmul.f32 0.5, %v7130_v43 }
 0xfe4   :  { %v5644_v58 = vmul.f32 0.5, %v7132_v17  ;;  %v7134_v7 = vpop.eup %7133 }
 0xfe5   :  { %v5641_v35 = vadd.f32 0.5, %v5640_v32  ;;  %v7136_v29 = vpop.eup %7135 }
 0xfe6   :  { %v5645_v50 = vadd.f32 0.5, %v5644_v58  ;;  %v5649_v36 = vmul.f32 0.5, %v7136_v29 }
 0xfe7   :  { %v5652_v53 = vmul.f32 %v7134_v7, %v5641_v35 }
 0xfe8   :  { %v5651_v55 = vmul.f32 %v5645_v50, %v8907_v54  ;;  %v5650_v39 = vadd.f32 0.5, %v5649_v36 }
 0xfea   :  { %v5653_v16 = vadd.f32 %v5652_v53, %v5651_v55 }
 0xfec   :  { %7137 = vtanh.f32 %v5653_v16 }
 0xff3   :  { %v6686_v13 = vpop.f32.mrb[80].mxu0 }
 0xff4   :  { %v5785_v37 = vadd.f32 %v6686_v13, %v6647_v12  ;;  %v5776_v38 = vpop.f32.mrb[81].mxu0 }
 0xff5   :  { %v5777_v40 = vadd.f32 %v6647_v12, %v5776_v38  ;;  %v6687_v41 = vpop.f32.mrb[82].mxu0 }
 0xff6   :  { %v7138_v24 = vpop.eup %7137  ;;  %5809 = vst [vmem:[%s8985_s7 + $0x10] sm:$0xff] %v5785_v37  ;;  %v5788_v18 = vadd.f32 %v6687_v41, %v6647_v12  ;;  %v5779_v20 = vpop.f32.mrb[83].mxu0 }
 0xff7   :  { %5807 = vst [vmem:[%s8985_s7] sm:$0xff] %v5777_v40  ;;  %v5780_v9 = vadd.f32 %v6647_v12, %v5779_v20  ;;  %v5655_v54 = vmul.f32 %v7138_v24, %v5650_v39 }
 0xff8   :  { %5810 = vst [vmem:[%s8985_s7 + $0x18] sm:$0xff] %v5788_v18 }
 0xff9   :  { %5808 = vst [vmem:[%s8985_s7 + $0x8] sm:$0xff] %v5780_v9  ;;  %v5670_v30 = vpack.c.bf16 %v5655_v54, %v8910_v22 }
 0xffb   :  { %6689 = vmatmul.mubr.bf16.gmra.mrb[84].mxu0 %v5670_v30 }
0x10ce   :  { %v6690_v15 = vpop.f32.mrb[84].mxu0 }
0x10cf   :  { %v5801_v49 = vadd.f32 %v6690_v15, %v6647_v12  ;;  %v5792_v42 = vpop.f32.mrb[85].mxu0 }
0x10d0   :  { %v5793_v0 = vadd.f32 %v6647_v12, %v5792_v42  ;;  %v6691_v62 = vpop.f32.mrb[86].mxu0 }
0x10d1   :  { %5813 = vst [vmem:[%s8985_s7 + $0x30] sm:$0xff] %v5801_v49  ;;  %v5804_v31 = vadd.f32 %v6691_v62, %v6647_v12  ;;  %v5795_v19 = vpop.f32.mrb[87].mxu0 }
0x10d2   :  { %5811 = vst [vmem:[%s8985_s7 + $0x20] sm:$0xff] %v5793_v0  ;;  %v5796_v56 = vadd.f32 %v6647_v12, %v5795_v19 }
0x10d3   :  { %5814 = vst [vmem:[%s8985_s7 + $0x38] sm:$0xff] %v5804_v31 }
0x10d4   :  { %5812 = vst [vmem:[%s8985_s7 + $0x28] sm:$0xff] %v5796_v56 }

</bundles_post_ra>
